<compile_context>
chip_gen: v6e
topology: v6e:2x2x1
jax: 0.10.0
libtpu: 0.0.40
codegen_flags: <defaults>
</compile_context>

<pallas_src>
import functools
import math

import jax
import jax.numpy as jnp
from jax import lax
from jax.experimental import pallas as pl
from jax.experimental.pallas import tpu as pltpu

# ----- small config (scaled-down but structurally identical to the module) ---
INPUT_DIM = 63        # module default 63 (ragged on purpose; padded in wrapper)
EMBED_DIM = 64        # module default 512
NUM_HEADS = 4         # module default 8
FF_DIM = 4 * EMBED_DIM
NUM_LAYERS = 2        # module default 8
NUM_CLASSES = 8
LEVEL_CLASSES = 3
SEQ_LEN = 32          # module forward says L=100; kept small (multiple of 8)
BATCH = 2
LN_EPS = 1e-5
FF_CHUNK = 512        # FFN streamed in <=512-column chunks


# ----------------------------- kernel helpers --------------------------------
def _layer_norm(x, gamma, beta):
    mu = jnp.mean(x, axis=-1, keepdims=True)
    var = jnp.mean(jnp.square(x - mu), axis=-1, keepdims=True)
    return (x - mu) * lax.rsqrt(var + LN_EPS) * gamma + beta


# ------------------------------- fused kernel --------------------------------
def fused_forward_kernel(x_ref, ew_ref, eb_ref, pe_ref,
                         wqkv_ref, bqkv_ref, wo_ref, bo_ref,
                         g1_ref, be1_ref, w1_ref, b1_ref,
                         w2_ref, b2_ref, g2_ref, be2_ref,
                         hw_ref, hb_ref,
                         out_ref, act_ref, *, bg, seq_len, num_heads):
    layer = pl.program_id(1)
    num_layers = pl.num_programs(1)
    L = seq_len
    E = act_ref.shape[-1]
    dh = E // num_heads
    rows = bg * L

    # ---- embedding + positional encoding, once per batch group (layer 0) ----
    @pl.when(layer == 0)
    def _():
        x2 = x_ref[...].reshape(rows, x_ref.shape[-1])
        emb = jnp.dot(x2, ew_ref[...], preferred_element_type=jnp.float32)
        emb = emb + eb_ref[...]
        emb = emb.reshape(bg, L, E) + pe_ref[...]
        act_ref[...] = emb.reshape(rows, E)

    # ---- one post-norm TransformerEncoderLayer (dropout = identity, eval) ----
    x = act_ref[...]                                   # (rows, E) f32, VMEM-resident
    x_bf = x.astype(jnp.bfloat16)

    wqkv = wqkv_ref[0]                                 # bf16 (E, 3E); q cols pre-scaled
    bqkv = bqkv_ref[0]                                 # f32
    wo = wo_ref[0]                                     # bf16
    bo = bo_ref[0]
    g1 = g1_ref[0]
    be1 = be1_ref[0]
    w1 = w1_ref[0]                                     # bf16
    b1 = b1_ref[0]
    w2 = w2_ref[0]                                     # bf16
    b2 = b2_ref[0]
    g2 = g2_ref[0]
    be2 = be2_ref[0]

    qkv = jnp.dot(x_bf, wqkv, preferred_element_type=jnp.float32) + bqkv   # (rows, 3E)

    # Multi-head self attention.
    # TODO(synk): at the real config pad L to 128 with key masking in softmax
    #             and exclusion of padded rows from the mean-pool; reorder the
    #             wqkv columns so each head's q/k/v block is 128-lane aligned.
    ctx_rows = []
    for b in range(bg):                                # static, tiny (bg <= 2)
        r = b * L
        head_ctx = []
        for h in range(num_heads):                     # static, tiny
            c = h * dh
            qh = qkv[r:r + L, c:c + dh].astype(jnp.bfloat16)
            kh = qkv[r:r + L, E + c:E + c + dh].astype(jnp.bfloat16)
            vh = qkv[r:r + L, 2 * E + c:2 * E + c + dh].astype(jnp.bfloat16)
            # contract the dh axis of q against the dh axis of k (no kh.T copy)
            s = lax.dot_general(qh, kh, (((1,), (1,)), ((), ())),
                                preferred_element_type=jnp.float32)        # (L, L)
            s = s - jnp.max(s, axis=-1, keepdims=True)
            p = jnp.exp(s)
            # softmax normalization on the EUP (reciprocal), not a VPU divide
            p = p * pl.reciprocal(jnp.sum(p, axis=-1, keepdims=True), approx=True)
            head_ctx.append(jnp.dot(p.astype(jnp.bfloat16), vh,
                                    preferred_element_type=jnp.float32))   # (L, dh)
        ctx_rows.append(jnp.concatenate(head_ctx, axis=-1))                # (L, E)
    ctx = ctx_rows[0] if bg == 1 else jnp.concatenate(ctx_rows, axis=0)    # (rows, E)
    # single MXU-dense K=E out-projection over all rows
    attn = jnp.dot(ctx.astype(jnp.bfloat16), wo,
                   preferred_element_type=jnp.float32) + bo

    x1 = _layer_norm(x + attn, g1, be1)                # f32

    # FFN streamed over the FF dim in chunks (caps the ReLU intermediate).
    x1_bf = x1.astype(jnp.bfloat16)
    FF = w1.shape[-1]
    step = min(FF, FF_CHUNK)
    acc = None
    for c0 in range(0, FF, step):                      # static chunk loop
        hcol = jnp.dot(x1_bf, w1[:, c0:c0 + step],
                       preferred_element_type=jnp.float32) + b1[:, c0:c0 + step]
        hcol = jnp.maximum(hcol, 0.0).astype(jnp.bfloat16)
        part = jnp.dot(hcol, w2[c0:c0 + step, :],
                       preferred_element_type=jnp.float32)
        acc = part if acc is None else acc + part
    ff = acc + b2
    y = _layer_norm(x1 + ff, g2, be2)
    act_ref[...] = y                                   # stays in VMEM for next layer

    # ---- mean-pool + both classifier heads (lane-dense packed output) -------
    @pl.when(layer == num_layers - 1)
    def _():
        pooled = jnp.mean(y.reshape(bg, L, E), axis=1)   # (bg, E)
        out_ref[0] = (jnp.dot(pooled, hw_ref[...],
                              preferred_element_type=jnp.float32) + hb_ref[...])


# --------------------------------- wrapper ------------------------------------
def _num_batch_groups(batch):
    """Split the batch over a leading 'parallel' grid axis only on 2-TC parts
    (v7x megacore). On single-TC v5e/v6e the split would just re-stream the
    per-layer weight stack twice for zero parallelism."""
    if batch < 2 or batch % 2 != 0:
        return 1
    try:
        kind = jax.devices()[0].device_kind.lower()
    except Exception:
        return 1
    return 2 if "v7" in kind else 1


def _nbytes(a):
    return int(math.prod(a.shape)) * jnp.dtype(a.dtype).itemsize


def _fused_forward(x, params, *, num_heads):
    B, L, din = x.shape
    E = params["embed_w"].shape[1]
    NL = params["wqkv"].shape[0]
    C = params["cls_w"].shape[1]
    LV = params["lvl_w"].shape[1]
    FF = params["w1"].shape[-1]
    dh = E // num_heads

    # pad ragged input-feature dim (63 in the real model) up to 128 lanes
    # (zero rows of the embed weight contribute nothing)
    dp = -(-din // 128) * 128
    ew = params["embed_w"]
    if dp != din:
        x = jnp.pad(x, ((0, 0), (0, 0), (0, dp - din)))
        ew = jnp.pad(ew, ((0, dp - din), (0, 0)))

    # fold 1/sqrt(dh) into the q projection, then cast the big per-layer
    # weights to bf16 (halves weight-streaming HBM bytes and VMEM footprint;
    # in-kernel accumulation stays f32)
    scale = 1.0 / (float(dh) ** 0.5)
    wqkv = params["wqkv"].at[:, :, :E].multiply(scale).astype(jnp.bfloat16)
    bqkv = params["bqkv"].at[:, :, :E].multiply(scale)
    wo = params["wo"].astype(jnp.bfloat16)
    w1 = params["w1"].astype(jnp.bfloat16)
    w2 = params["w2"].astype(jnp.bfloat16)

    G = _num_batch_groups(B)
    Bg = B // G

    # pack both classifier heads into one lane-dense (E, 128) slab
    OUT_PAD = 128
    assert C + LV <= OUT_PAD
    hw = jnp.zeros((E, OUT_PAD), jnp.float32)
    hw = hw.at[:, :C].set(params["cls_w"]).at[:, C:C + LV].set(params["lvl_w"])
    hb = jnp.zeros((1, OUT_PAD), jnp.float32)
    hb = hb.at[:, :C].set(params["cls_b"]).at[:, C:C + LV].set(params["lvl_b"])

    def rep2(g, l):
        return (0, 0)

    def per_layer(g, l):
        return (l, 0, 0)

    def per_group(g, l):
        return (g, 0, 0)

    def lspec(arr):
        return pl.BlockSpec((1,) + arr.shape[1:], per_layer)

    kernel = functools.partial(fused_forward_kernel, bg=Bg, seq_len=L,
                               num_heads=num_heads)

    # advisory cost estimate for XLA scheduling around the fused custom call
    rows = B * L
    flops = (2 * rows * dp * E
             + NL * (2 * rows * E * 3 * E                      # qkv projection
                     + 2 * B * num_heads * 2 * L * L * dh      # scores + ctx
                     + 2 * rows * E * E                        # out projection
                     + 2 * rows * E * FF * 2)                  # FFN
             + 2 * B * E * OUT_PAD)
    layer_inputs = [wqkv, bqkv, wo, params["bo"], params["ln1_g"], params["ln1_b"],
                    w1, params["b1"], w2, params["b2"], params["ln2_g"], params["ln2_b"]]
    bytes_accessed = (G * sum(_nbytes(a) for a in layer_inputs)
                      + _nbytes(x) + _nbytes(ew) + _nbytes(params["pe"])
                      + _nbytes(hw) + _nbytes(hb) + B * OUT_PAD * 4)
    cost = pl.CostEstimate(flops=flops,
                           transcendentals=NL * B * num_heads * L * L,
                           bytes_accessed=bytes_accessed)

    out = pl.pallas_call(
        kernel,
        out_shape=jax.ShapeDtypeStruct((G, Bg, OUT_PAD), jnp.float32),
        grid=(G, NL),
        in_specs=[
            pl.BlockSpec((Bg, L, dp), per_group),       # motion sequence
            pl.BlockSpec((dp, E), rep2),                # embed W (f32, tiny)
            pl.BlockSpec((1, E), rep2),                 # embed b
            pl.BlockSpec((L, E), rep2),                 # positional encoding
            lspec(wqkv), lspec(bqkv),
            lspec(wo), lspec(params["bo"]),
            lspec(params["ln1_g"]), lspec(params["ln1_b"]),
            lspec(w1), lspec(params["b1"]),
            lspec(w2), lspec(params["b2"]),
            lspec(params["ln2_g"]), lspec(params["ln2_b"]),
            pl.BlockSpec((E, OUT_PAD), rep2),           # packed classifier W
            pl.BlockSpec((1, OUT_PAD), rep2),           # packed classifier b
        ],
        out_specs=pl.BlockSpec((1, Bg, OUT_PAD), per_group),
        scratch_shapes=[pltpu.VMEM((Bg * L, E), jnp.float32)],   # resident activations
        compiler_params=pltpu.CompilerParams(
            dimension_semantics=("parallel", "arbitrary"),
            vmem_limit_bytes=48 * 1024 * 1024),          # headroom under v7x's 64 MiB
        cost_estimate=cost,
    )(x, ew, params["embed_b"], params["pe"],
      wqkv, bqkv, wo, params["bo"],
      params["ln1_g"], params["ln1_b"], w1, params["b1"],
      w2, params["b2"], params["ln2_g"], params["ln2_b"],
      hw, hb)

    out = out.reshape(B, OUT_PAD)
    return out[:, :C], out[:, C:C + LV]


@jax.jit
def emotion_transformer_forward(x, params):
    return _fused_forward(x, params, num_heads=NUM_HEADS)


# ------------------------- parameter construction -----------------------------
def sinusoidal_pe(L, E):
    pos = jnp.arange(L, dtype=jnp.float32)[:, None]
    div = jnp.exp(jnp.arange(0, E, 2, dtype=jnp.float32) * (-jnp.log(10000.0) / E))
    pe = jnp.zeros((L, E), jnp.float32)
    pe = pe.at[:, 0::2].set(jnp.sin(pos * div))
    pe = pe.at[:, 1::2].set(jnp.cos(pos * div))
    return pe


def init_params(key):
    def nrm(k, shape, scale=0.02):
        return scale * jax.random.normal(k, shape, dtype=jnp.float32)

    ks = jax.random.split(key, 7)
    return {
        # embedding + heads (weights stored as [in, out] so kernels do x @ W + b)
        "embed_w": nrm(ks[0], (INPUT_DIM, EMBED_DIM)),
        "embed_b": jnp.zeros((1, EMBED_DIM), jnp.float32),
        "pe": sinusoidal_pe(SEQ_LEN, EMBED_DIM),
        "cls_w": nrm(ks[1], (EMBED_DIM, NUM_CLASSES)),
        "cls_b": jnp.zeros((1, NUM_CLASSES), jnp.float32),
        "lvl_w": nrm(ks[2], (EMBED_DIM, LEVEL_CLASSES)),
        "lvl_b": jnp.zeros((1, LEVEL_CLASSES), jnp.float32),
        # encoder layer weights stacked along a leading NUM_LAYERS axis
        "wqkv": nrm(ks[3], (NUM_LAYERS, EMBED_DIM, 3 * EMBED_DIM)),   # in_proj.T
        "bqkv": jnp.zeros((NUM_LAYERS, 1, 3 * EMBED_DIM), jnp.float32),
        "wo": nrm(ks[4], (NUM_LAYERS, EMBED_DIM, EMBED_DIM)),         # out_proj.T
        "bo": jnp.zeros((NUM_LAYERS, 1, EMBED_DIM), jnp.float32),
        "ln1_g": jnp.ones((NUM_LAYERS, 1, EMBED_DIM), jnp.float32),
        "ln1_b": jnp.zeros((NUM_LAYERS, 1, EMBED_DIM), jnp.float32),
        "w1": nrm(ks[5], (NUM_LAYERS, EMBED_DIM, FF_DIM)),
        "b1": jnp.zeros((NUM_LAYERS, 1, FF_DIM), jnp.float32),
        "w2": nrm(ks[6], (NUM_LAYERS, FF_DIM, EMBED_DIM)),
        "b2": jnp.zeros((NUM_LAYERS, 1, EMBED_DIM), jnp.float32),
        "ln2_g": jnp.ones((NUM_LAYERS, 1, EMBED_DIM), jnp.float32),
        "ln2_b": jnp.zeros((NUM_LAYERS, 1, EMBED_DIM), jnp.float32),
    }


# ----------------------------------- main --------------------------------------
if __name__ == "__main__":
    key = jax.random.PRNGKey(0)
    pkey, xkey = jax.random.split(key)
    params = init_params(pkey)
    x = jax.random.normal(xkey, (BATCH, SEQ_LEN, INPUT_DIM), dtype=jnp.float32)

    out_emo, out_level = emotion_transformer_forward(x, params)
    out_emo = jax.block_until_ready(out_emo)
    out_level = jax.block_until_ready(out_level)

    assert out_emo.shape == (BATCH, NUM_CLASSES)
    assert out_level.shape == (BATCH, LEVEL_CLASSES)
    assert bool(jnp.all(jnp.isfinite(out_emo))) and bool(jnp.all(jnp.isfinite(out_level)))
    print("KERNEL_OK")
</pallas_src>

<mosaic_0001>
module attributes {stable_mosaic.version = 11 : i64} {
  func.func @fused_forward_kernel(%arg0: i32, %arg1: i32, %arg2: memref<2x32x128xf32, #tpu.memory_space<vmem>>, %arg3: memref<128x64xf32, #tpu.memory_space<vmem>>, %arg4: memref<1x64xf32, #tpu.memory_space<vmem>>, %arg5: memref<32x64xf32, #tpu.memory_space<vmem>>, %arg6: memref<1x64x192xbf16, #tpu.memory_space<vmem>>, %arg7: memref<1x1x192xf32, #tpu.memory_space<vmem>>, %arg8: memref<1x64x64xbf16, #tpu.memory_space<vmem>>, %arg9: memref<1x1x64xf32, #tpu.memory_space<vmem>>, %arg10: memref<1x1x64xf32, #tpu.memory_space<vmem>>, %arg11: memref<1x1x64xf32, #tpu.memory_space<vmem>>, %arg12: memref<1x64x256xbf16, #tpu.memory_space<vmem>>, %arg13: memref<1x1x256xf32, #tpu.memory_space<vmem>>, %arg14: memref<1x256x64xbf16, #tpu.memory_space<vmem>>, %arg15: memref<1x1x64xf32, #tpu.memory_space<vmem>>, %arg16: memref<1x1x64xf32, #tpu.memory_space<vmem>>, %arg17: memref<1x1x64xf32, #tpu.memory_space<vmem>>, %arg18: memref<64x128xf32, #tpu.memory_space<vmem>>, %arg19: memref<1x128xf32, #tpu.memory_space<vmem>>, %arg20: memref<1x2x128xf32, #tpu.memory_space<vmem>>, %arg21: memref<64x64xf32, #tpu.memory_space<vmem>>) attributes {dimension_semantics = [#tpu.dimension_semantics<parallel>, #tpu.dimension_semantics<arbitrary>], iteration_bounds = array<i64: 1, 2>, scalar_prefetch = 0 : i64, scratch_operands = 1 : i64, tpu.core_type = #tpu.core_type<tc>, window_params = [{transform_indices = @transform_0, window_bounds = array<i64: 2, 32, 128>}, {pipeline_mode = #tpu.pipeline_mode<synchronous>, transform_indices = @transform_1, window_bounds = array<i64: 128, 64>}, {pipeline_mode = #tpu.pipeline_mode<synchronous>, transform_indices = @transform_2, window_bounds = array<i64: 1, 64>}, {pipeline_mode = #tpu.pipeline_mode<synchronous>, transform_indices = @transform_3, window_bounds = array<i64: 32, 64>}, {transform_indices = @transform_4, window_bounds = array<i64: 1, 64, 192>}, {transform_indices = @transform_5, window_bounds = array<i64: 1, 1, 192>}, {transform_indices = @transform_6, window_bounds = array<i64: 1, 64, 64>}, {transform_indices = @transform_7, window_bounds = array<i64: 1, 1, 64>}, {transform_indices = @transform_8, window_bounds = array<i64: 1, 1, 64>}, {transform_indices = @transform_9, window_bounds = array<i64: 1, 1, 64>}, {transform_indices = @transform_10, window_bounds = array<i64: 1, 64, 256>}, {transform_indices = @transform_11, window_bounds = array<i64: 1, 1, 256>}, {transform_indices = @transform_12, window_bounds = array<i64: 1, 256, 64>}, {transform_indices = @transform_13, window_bounds = array<i64: 1, 1, 64>}, {transform_indices = @transform_14, window_bounds = array<i64: 1, 1, 64>}, {transform_indices = @transform_15, window_bounds = array<i64: 1, 1, 64>}, {pipeline_mode = #tpu.pipeline_mode<synchronous>, transform_indices = @transform_16, window_bounds = array<i64: 64, 128>}, {pipeline_mode = #tpu.pipeline_mode<synchronous>, transform_indices = @transform_17, window_bounds = array<i64: 1, 128>}, {transform_indices = @transform_18, window_bounds = array<i64: 1, 2, 128>}]} {
    %c0_i32 = arith.constant 0 : i32
    %0 = arith.cmpi eq, %arg1, %c0_i32 : i32
    %1 = arith.extui %0 : i1 to i32
    %c0_i32_0 = arith.constant 0 : i32
    %2 = arith.cmpi ne, %1, %c0_i32_0 : i32
    scf.if %2 {
      %c0_87 = arith.constant 0 : index
      %c0_88 = arith.constant 0 : index
      %c0_89 = arith.constant 0 : index
      %251 = vector.load %arg2[%c0_87, %c0_88, %c0_89] : memref<2x32x128xf32, #tpu.memory_space<vmem>>, vector<2x32x128xf32>
      %252 = vector.shape_cast %251 : vector<2x32x128xf32> to vector<64x128xf32>
      %c0_90 = arith.constant 0 : index
      %c0_91 = arith.constant 0 : index
      %253 = vector.load %arg3[%c0_90, %c0_91] : memref<128x64xf32, #tpu.memory_space<vmem>>, vector<128x64xf32>
      %cst_92 = arith.constant dense<0.000000e+00> : vector<64x64xf32>
      %254 = tpu.matmul %252, %253, %cst_92 {dimension_numbers = #tpu.dot_dimension_numbers<[1], [0], [0], [1], [0, 0, 1, 1], [], []>} : vector<64x128xf32>, vector<128x64xf32>, vector<64x64xf32> -> vector<64x64xf32>
      %c0_93 = arith.constant 0 : index
      %c0_94 = arith.constant 0 : index
      %255 = vector.load %arg4[%c0_93, %c0_94] : memref<1x64xf32, #tpu.memory_space<vmem>>, vector<1x64xf32>
      %256 = vector.broadcast %255 : vector<1x64xf32> to vector<64x64xf32>
      %257 = arith.addf %254, %256 : vector<64x64xf32>
      %258 = vector.shape_cast %257 : vector<64x64xf32> to vector<2x32x64xf32>
      %c0_95 = arith.constant 0 : index
      %c0_96 = arith.constant 0 : index
      %259 = vector.load %arg5[%c0_95, %c0_96] : memref<32x64xf32, #tpu.memory_space<vmem>>, vector<32x64xf32>
      %260 = vector.shape_cast %259 : vector<32x64xf32> to vector<1x32x64xf32>
      %261 = vector.broadcast %260 : vector<1x32x64xf32> to vector<2x32x64xf32>
      %262 = arith.addf %258, %261 : vector<2x32x64xf32>
      %263 = vector.shape_cast %262 : vector<2x32x64xf32> to vector<64x64xf32>
      %c0_97 = arith.constant 0 : index
      %c0_98 = arith.constant 0 : index
      %264 = vector.load %arg21[%c0_97, %c0_98] : memref<64x64xf32, #tpu.memory_space<vmem>>, vector<64x64xf32>
      tpu.vector_store %arg21[%c0_97, %c0_98], %263 {strides = array<i32>} : memref<64x64xf32, #tpu.memory_space<vmem>>, vector<64x64xf32>,
    } else {
    }
    %c0 = arith.constant 0 : index
    %c0_1 = arith.constant 0 : index
    %3 = vector.load %arg21[%c0, %c0_1] : memref<64x64xf32, #tpu.memory_space<vmem>>, vector<64x64xf32>
    %4 = arith.truncf %3 : vector<64x64xf32> to vector<64x64xbf16>
    %c0_2 = arith.constant 0 : index
    %c0_3 = arith.constant 0 : index
    %c0_4 = arith.constant 0 : index
    %5 = vector.load %arg6[%c0_2, %c0_3, %c0_4] : memref<1x64x192xbf16, #tpu.memory_space<vmem>>, vector<1x64x192xbf16>
    %6 = vector.shape_cast %5 : vector<1x64x192xbf16> to vector<64x192xbf16>
    %c0_5 = arith.constant 0 : index
    %c0_6 = arith.constant 0 : index
    %c0_7 = arith.constant 0 : index
    %7 = vector.load %arg7[%c0_5, %c0_6, %c0_7] : memref<1x1x192xf32, #tpu.memory_space<vmem>>, vector<1x1x192xf32>
    %8 = vector.shape_cast %7 : vector<1x1x192xf32> to vector<1x192xf32>
    %c0_8 = arith.constant 0 : index
    %c0_9 = arith.constant 0 : index
    %c0_10 = arith.constant 0 : index
    %9 = vector.load %arg8[%c0_8, %c0_9, %c0_10] : memref<1x64x64xbf16, #tpu.memory_space<vmem>>, vector<1x64x64xbf16>
    %10 = vector.shape_cast %9 : vector<1x64x64xbf16> to vector<64x64xbf16>
    %c0_11 = arith.constant 0 : index
    %c0_12 = arith.constant 0 : index
    %c0_13 = arith.constant 0 : index
    %11 = vector.load %arg9[%c0_11, %c0_12, %c0_13] : memref<1x1x64xf32, #tpu.memory_space<vmem>>, vector<1x1x64xf32>
    %12 = vector.shape_cast %11 : vector<1x1x64xf32> to vector<1x64xf32>
    %c0_14 = arith.constant 0 : index
    %c0_15 = arith.constant 0 : index
    %c0_16 = arith.constant 0 : index
    %13 = vector.load %arg10[%c0_14, %c0_15, %c0_16] : memref<1x1x64xf32, #tpu.memory_space<vmem>>, vector<1x1x64xf32>
    %14 = vector.shape_cast %13 : vector<1x1x64xf32> to vector<1x64xf32>
    %c0_17 = arith.constant 0 : index
    %c0_18 = arith.constant 0 : index
    %c0_19 = arith.constant 0 : index
    %15 = vector.load %arg11[%c0_17, %c0_18, %c0_19] : memref<1x1x64xf32, #tpu.memory_space<vmem>>, vector<1x1x64xf32>
    %16 = vector.shape_cast %15 : vector<1x1x64xf32> to vector<1x64xf32>
    %c0_20 = arith.constant 0 : index
    %c0_21 = arith.constant 0 : index
    %c0_22 = arith.constant 0 : index
    %17 = vector.load %arg12[%c0_20, %c0_21, %c0_22] : memref<1x64x256xbf16, #tpu.memory_space<vmem>>, vector<1x64x256xbf16>
    %18 = vector.shape_cast %17 : vector<1x64x256xbf16> to vector<64x256xbf16>
    %c0_23 = arith.constant 0 : index
    %c0_24 = arith.constant 0 : index
    %c0_25 = arith.constant 0 : index
    %19 = vector.load %arg13[%c0_23, %c0_24, %c0_25] : memref<1x1x256xf32, #tpu.memory_space<vmem>>, vector<1x1x256xf32>
    %20 = vector.shape_cast %19 : vector<1x1x256xf32> to vector<1x256xf32>
    %c0_26 = arith.constant 0 : index
    %c0_27 = arith.constant 0 : index
    %c0_28 = arith.constant 0 : index
    %21 = vector.load %arg14[%c0_26, %c0_27, %c0_28] : memref<1x256x64xbf16, #tpu.memory_space<vmem>>, vector<1x256x64xbf16>
    %22 = vector.shape_cast %21 : vector<1x256x64xbf16> to vector<256x64xbf16>
    %c0_29 = arith.constant 0 : index
    %c0_30 = arith.constant 0 : index
    %c0_31 = arith.constant 0 : index
    %23 = vector.load %arg15[%c0_29, %c0_30, %c0_31] : memref<1x1x64xf32, #tpu.memory_space<vmem>>, vector<1x1x64xf32>
    %24 = vector.shape_cast %23 : vector<1x1x64xf32> to vector<1x64xf32>
    %c0_32 = arith.constant 0 : index
    %c0_33 = arith.constant 0 : index
    %c0_34 = arith.constant 0 : index
    %25 = vector.load %arg16[%c0_32, %c0_33, %c0_34] : memref<1x1x64xf32, #tpu.memory_space<vmem>>, vector<1x1x64xf32>
    %26 = vector.shape_cast %25 : vector<1x1x64xf32> to vector<1x64xf32>
    %c0_35 = arith.constant 0 : index
    %c0_36 = arith.constant 0 : index
    %c0_37 = arith.constant 0 : index
    %27 = vector.load %arg17[%c0_35, %c0_36, %c0_37] : memref<1x1x64xf32, #tpu.memory_space<vmem>>, vector<1x1x64xf32>
    %28 = vector.shape_cast %27 : vector<1x1x64xf32> to vector<1x64xf32>
    %cst = arith.constant dense<0.000000e+00> : vector<64x192xf32>
    %29 = tpu.matmul %4, %6, %cst {dimension_numbers = #tpu.dot_dimension_numbers<[1], [0], [0], [1], [0, 0, 1, 1], [], []>} : vector<64x64xbf16>, vector<64x192xbf16>, vector<64x192xf32> -> vector<64x192xf32>
    %30 = vector.broadcast %8 : vector<1x192xf32> to vector<64x192xf32>
    %31 = arith.addf %29, %30 : vector<64x192xf32>
    %32 = vector.extract_strided_slice %31 {offsets = [0, 0], sizes = [32, 16], strides = [1, 1]} : vector<64x192xf32> to vector<32x16xf32>
    %33 = arith.truncf %32 : vector<32x16xf32> to vector<32x16xbf16>
    %34 = vector.extract_strided_slice %31 {offsets = [0, 64], sizes = [32, 16], strides = [1, 1]} : vector<64x192xf32> to vector<32x16xf32>
    %35 = arith.truncf %34 : vector<32x16xf32> to vector<32x16xbf16>
    %36 = vector.extract_strided_slice %31 {offsets = [0, 128], sizes = [32, 16], strides = [1, 1]} : vector<64x192xf32> to vector<32x16xf32>
    %37 = arith.truncf %36 : vector<32x16xf32> to vector<32x16xbf16>
    %cst_38 = arith.constant dense<0.000000e+00> : vector<32x32xf32>
    %38 = tpu.matmul %33, %35, %cst_38 {dimension_numbers = #tpu.dot_dimension_numbers<[1], [1], [0], [0], [0, 0, 1, 0], [], []>} : vector<32x16xbf16>, vector<32x16xbf16>, vector<32x32xf32> -> vector<32x32xf32>
    %cst_39 = arith.constant dense<0xFF800000> : vector<32xf32>
    %39 = vector.multi_reduction <maximumf>, %38, %cst_39 [1] : vector<32x32xf32> to vector<32xf32>
    %40 = vector.shape_cast %39 : vector<32xf32> to vector<32x1xf32>
    %41 = vector.broadcast %40 : vector<32x1xf32> to vector<32x32xf32>
    %42 = arith.subf %38, %41 : vector<32x32xf32>
    %43 = math.exp %42 : vector<32x32xf32>
    %cst_40 = arith.constant dense<0.000000e+00> : vector<32xf32>
    %44 = vector.multi_reduction <add>, %43, %cst_40 [1] : vector<32x32xf32> to vector<32xf32>
    %45 = vector.shape_cast %44 : vector<32xf32> to vector<32x1xf32>
    %46 = tpu.reciprocal %45 {approx = true} : vector<32x1xf32> -> vector<32x1xf32>
    %47 = vector.broadcast %46 : vector<32x1xf32> to vector<32x32xf32>
    %48 = arith.mulf %43, %47 : vector<32x32xf32>
    %49 = arith.truncf %48 : vector<32x32xf32> to vector<32x32xbf16>
    %cst_41 = arith.constant dense<0.000000e+00> : vector<32x16xf32>
    %50 = tpu.matmul %49, %37, %cst_41 {dimension_numbers = #tpu.dot_dimension_numbers<[1], [0], [0], [1], [0, 0, 1, 1], [], []>} : vector<32x32xbf16>, vector<32x16xbf16>, vector<32x16xf32> -> vector<32x16xf32>
    %51 = vector.extract_strided_slice %31 {offsets = [0, 16], sizes = [32, 16], strides = [1, 1]} : vector<64x192xf32> to vector<32x16xf32>
    %52 = arith.truncf %51 : vector<32x16xf32> to vector<32x16xbf16>
    %53 = vector.extract_strided_slice %31 {offsets = [0, 80], sizes = [32, 16], strides = [1, 1]} : vector<64x192xf32> to vector<32x16xf32>
    %54 = arith.truncf %53 : vector<32x16xf32> to vector<32x16xbf16>
    %55 = vector.extract_strided_slice %31 {offsets = [0, 144], sizes = [32, 16], strides = [1, 1]} : vector<64x192xf32> to vector<32x16xf32>
    %56 = arith.truncf %55 : vector<32x16xf32> to vector<32x16xbf16>
    %cst_42 = arith.constant dense<0.000000e+00> : vector<32x32xf32>
    %57 = tpu.matmul %52, %54, %cst_42 {dimension_numbers = #tpu.dot_dimension_numbers<[1], [1], [0], [0], [0, 0, 1, 0], [], []>} : vector<32x16xbf16>, vector<32x16xbf16>, vector<32x32xf32> -> vector<32x32xf32>
    %cst_43 = arith.constant dense<0xFF800000> : vector<32xf32>
    %58 = vector.multi_reduction <maximumf>, %57, %cst_43 [1] : vector<32x32xf32> to vector<32xf32>
    %59 = vector.shape_cast %58 : vector<32xf32> to vector<32x1xf32>
    %60 = vector.broadcast %59 : vector<32x1xf32> to vector<32x32xf32>
    %61 = arith.subf %57, %60 : vector<32x32xf32>
    %62 = math.exp %61 : vector<32x32xf32>
    %cst_44 = arith.constant dense<0.000000e+00> : vector<32xf32>
    %63 = vector.multi_reduction <add>, %62, %cst_44 [1] : vector<32x32xf32> to vector<32xf32>
    %64 = vector.shape_cast %63 : vector<32xf32> to vector<32x1xf32>
    %65 = tpu.reciprocal %64 {approx = true} : vector<32x1xf32> -> vector<32x1xf32>
    %66 = vector.broadcast %65 : vector<32x1xf32> to vector<32x32xf32>
    %67 = arith.mulf %62, %66 : vector<32x32xf32>
    %68 = arith.truncf %67 : vector<32x32xf32> to vector<32x32xbf16>
    %cst_45 = arith.constant dense<0.000000e+00> : vector<32x16xf32>
    %69 = tpu.matmul %68, %56, %cst_45 {dimension_numbers = #tpu.dot_dimension_numbers<[1], [0], [0], [1], [0, 0, 1, 1], [], []>} : vector<32x32xbf16>, vector<32x16xbf16>, vector<32x16xf32> -> vector<32x16xf32>
    %70 = vector.extract_strided_slice %31 {offsets = [0, 32], sizes = [32, 16], strides = [1, 1]} : vector<64x192xf32> to vector<32x16xf32>
    %71 = arith.truncf %70 : vector<32x16xf32> to vector<32x16xbf16>
    %72 = vector.extract_strided_slice %31 {offsets = [0, 96], sizes = [32, 16], strides = [1, 1]} : vector<64x192xf32> to vector<32x16xf32>
    %73 = arith.truncf %72 : vector<32x16xf32> to vector<32x16xbf16>
    %74 = vector.extract_strided_slice %31 {offsets = [0, 160], sizes = [32, 16], strides = [1, 1]} : vector<64x192xf32> to vector<32x16xf32>
    %75 = arith.truncf %74 : vector<32x16xf32> to vector<32x16xbf16>
    %cst_46 = arith.constant dense<0.000000e+00> : vector<32x32xf32>
    %76 = tpu.matmul %71, %73, %cst_46 {dimension_numbers = #tpu.dot_dimension_numbers<[1], [1], [0], [0], [0, 0, 1, 0], [], []>} : vector<32x16xbf16>, vector<32x16xbf16>, vector<32x32xf32> -> vector<32x32xf32>
    %cst_47 = arith.constant dense<0xFF800000> : vector<32xf32>
    %77 = vector.multi_reduction <maximumf>, %76, %cst_47 [1] : vector<32x32xf32> to vector<32xf32>
    %78 = vector.shape_cast %77 : vector<32xf32> to vector<32x1xf32>
    %79 = vector.broadcast %78 : vector<32x1xf32> to vector<32x32xf32>
    %80 = arith.subf %76, %79 : vector<32x32xf32>
    %81 = math.exp %80 : vector<32x32xf32>
    %cst_48 = arith.constant dense<0.000000e+00> : vector<32xf32>
    %82 = vector.multi_reduction <add>, %81, %cst_48 [1] : vector<32x32xf32> to vector<32xf32>
    %83 = vector.shape_cast %82 : vector<32xf32> to vector<32x1xf32>
    %84 = tpu.reciprocal %83 {approx = true} : vector<32x1xf32> -> vector<32x1xf32>
    %85 = vector.broadcast %84 : vector<32x1xf32> to vector<32x32xf32>
    %86 = arith.mulf %81, %85 : vector<32x32xf32>
    %87 = arith.truncf %86 : vector<32x32xf32> to vector<32x32xbf16>
    %cst_49 = arith.constant dense<0.000000e+00> : vector<32x16xf32>
    %88 = tpu.matmul %87, %75, %cst_49 {dimension_numbers = #tpu.dot_dimension_numbers<[1], [0], [0], [1], [0, 0, 1, 1], [], []>} : vector<32x32xbf16>, vector<32x16xbf16>, vector<32x16xf32> -> vector<32x16xf32>
    %89 = vector.extract_strided_slice %31 {offsets = [0, 48], sizes = [32, 16], strides = [1, 1]} : vector<64x192xf32> to vector<32x16xf32>
    %90 = arith.truncf %89 : vector<32x16xf32> to vector<32x16xbf16>
    %91 = vector.extract_strided_slice %31 {offsets = [0, 112], sizes = [32, 16], strides = [1, 1]} : vector<64x192xf32> to vector<32x16xf32>
    %92 = arith.truncf %91 : vector<32x16xf32> to vector<32x16xbf16>
    %93 = vector.extract_strided_slice %31 {offsets = [0, 176], sizes = [32, 16], strides = [1, 1]} : vector<64x192xf32> to vector<32x16xf32>
    %94 = arith.truncf %93 : vector<32x16xf32> to vector<32x16xbf16>
    %cst_50 = arith.constant dense<0.000000e+00> : vector<32x32xf32>
    %95 = tpu.matmul %90, %92, %cst_50 {dimension_numbers = #tpu.dot_dimension_numbers<[1], [1], [0], [0], [0, 0, 1, 0], [], []>} : vector<32x16xbf16>, vector<32x16xbf16>, vector<32x32xf32> -> vector<32x32xf32>
    %cst_51 = arith.constant dense<0xFF800000> : vector<32xf32>
    %96 = vector.multi_reduction <maximumf>, %95, %cst_51 [1] : vector<32x32xf32> to vector<32xf32>
    %97 = vector.shape_cast %96 : vector<32xf32> to vector<32x1xf32>
    %98 = vector.broadcast %97 : vector<32x1xf32> to vector<32x32xf32>
    %99 = arith.subf %95, %98 : vector<32x32xf32>
    %100 = math.exp %99 : vector<32x32xf32>
    %cst_52 = arith.constant dense<0.000000e+00> : vector<32xf32>
    %101 = vector.multi_reduction <add>, %100, %cst_52 [1] : vector<32x32xf32> to vector<32xf32>
    %102 = vector.shape_cast %101 : vector<32xf32> to vector<32x1xf32>
    %103 = tpu.reciprocal %102 {approx = true} : vector<32x1xf32> -> vector<32x1xf32>
    %104 = vector.broadcast %103 : vector<32x1xf32> to vector<32x32xf32>
    %105 = arith.mulf %100, %104 : vector<32x32xf32>
    %106 = arith.truncf %105 : vector<32x32xf32> to vector<32x32xbf16>
    %cst_53 = arith.constant dense<0.000000e+00> : vector<32x16xf32>
    %107 = tpu.matmul %106, %94, %cst_53 {dimension_numbers = #tpu.dot_dimension_numbers<[1], [0], [0], [1], [0, 0, 1, 1], [], []>} : vector<32x32xbf16>, vector<32x16xbf16>, vector<32x16xf32> -> vector<32x16xf32>
    %108 = tpu.concatenate %50, %69, %88, %107 in 1 : vector<32x16xf32>, vector<32x16xf32>, vector<32x16xf32>, vector<32x16xf32> -> vector<32x64xf32>
    %109 = vector.extract_strided_slice %31 {offsets = [32, 0], sizes = [32, 16], strides = [1, 1]} : vector<64x192xf32> to vector<32x16xf32>
    %110 = arith.truncf %109 : vector<32x16xf32> to vector<32x16xbf16>
    %111 = vector.extract_strided_slice %31 {offsets = [32, 64], sizes = [32, 16], strides = [1, 1]} : vector<64x192xf32> to vector<32x16xf32>
    %112 = arith.truncf %111 : vector<32x16xf32> to vector<32x16xbf16>
    %113 = vector.extract_strided_slice %31 {offsets = [32, 128], sizes = [32, 16], strides = [1, 1]} : vector<64x192xf32> to vector<32x16xf32>
    %114 = arith.truncf %113 : vector<32x16xf32> to vector<32x16xbf16>
    %cst_54 = arith.constant dense<0.000000e+00> : vector<32x32xf32>
    %115 = tpu.matmul %110, %112, %cst_54 {dimension_numbers = #tpu.dot_dimension_numbers<[1], [1], [0], [0], [0, 0, 1, 0], [], []>} : vector<32x16xbf16>, vector<32x16xbf16>, vector<32x32xf32> -> vector<32x32xf32>
    %cst_55 = arith.constant dense<0xFF800000> : vector<32xf32>
    %116 = vector.multi_reduction <maximumf>, %115, %cst_55 [1] : vector<32x32xf32> to vector<32xf32>
    %117 = vector.shape_cast %116 : vector<32xf32> to vector<32x1xf32>
    %118 = vector.broadcast %117 : vector<32x1xf32> to vector<32x32xf32>
    %119 = arith.subf %115, %118 : vector<32x32xf32>
    %120 = math.exp %119 : vector<32x32xf32>
    %cst_56 = arith.constant dense<0.000000e+00> : vector<32xf32>
    %121 = vector.multi_reduction <add>, %120, %cst_56 [1] : vector<32x32xf32> to vector<32xf32>
    %122 = vector.shape_cast %121 : vector<32xf32> to vector<32x1xf32>
    %123 = tpu.reciprocal %122 {approx = true} : vector<32x1xf32> -> vector<32x1xf32>
    %124 = vector.broadcast %123 : vector<32x1xf32> to vector<32x32xf32>
    %125 = arith.mulf %120, %124 : vector<32x32xf32>
    %126 = arith.truncf %125 : vector<32x32xf32> to vector<32x32xbf16>
    %cst_57 = arith.constant dense<0.000000e+00> : vector<32x16xf32>
    %127 = tpu.matmul %126, %114, %cst_57 {dimension_numbers = #tpu.dot_dimension_numbers<[1], [0], [0], [1], [0, 0, 1, 1], [], []>} : vector<32x32xbf16>, vector<32x16xbf16>, vector<32x16xf32> -> vector<32x16xf32>
    %128 = vector.extract_strided_slice %31 {offsets = [32, 16], sizes = [32, 16], strides = [1, 1]} : vector<64x192xf32> to vector<32x16xf32>
    %129 = arith.truncf %128 : vector<32x16xf32> to vector<32x16xbf16>
    %130 = vector.extract_strided_slice %31 {offsets = [32, 80], sizes = [32, 16], strides = [1, 1]} : vector<64x192xf32> to vector<32x16xf32>
    %131 = arith.truncf %130 : vector<32x16xf32> to vector<32x16xbf16>
    %132 = vector.extract_strided_slice %31 {offsets = [32, 144], sizes = [32, 16], strides = [1, 1]} : vector<64x192xf32> to vector<32x16xf32>
    %133 = arith.truncf %132 : vector<32x16xf32> to vector<32x16xbf16>
    %cst_58 = arith.constant dense<0.000000e+00> : vector<32x32xf32>
    %134 = tpu.matmul %129, %131, %cst_58 {dimension_numbers = #tpu.dot_dimension_numbers<[1], [1], [0], [0], [0, 0, 1, 0], [], []>} : vector<32x16xbf16>, vector<32x16xbf16>, vector<32x32xf32> -> vector<32x32xf32>
    %cst_59 = arith.constant dense<0xFF800000> : vector<32xf32>
    %135 = vector.multi_reduction <maximumf>, %134, %cst_59 [1] : vector<32x32xf32> to vector<32xf32>
    %136 = vector.shape_cast %135 : vector<32xf32> to vector<32x1xf32>
    %137 = vector.broadcast %136 : vector<32x1xf32> to vector<32x32xf32>
    %138 = arith.subf %134, %137 : vector<32x32xf32>
    %139 = math.exp %138 : vector<32x32xf32>
    %cst_60 = arith.constant dense<0.000000e+00> : vector<32xf32>
    %140 = vector.multi_reduction <add>, %139, %cst_60 [1] : vector<32x32xf32> to vector<32xf32>
    %141 = vector.shape_cast %140 : vector<32xf32> to vector<32x1xf32>
    %142 = tpu.reciprocal %141 {approx = true} : vector<32x1xf32> -> vector<32x1xf32>
    %143 = vector.broadcast %142 : vector<32x1xf32> to vector<32x32xf32>
    %144 = arith.mulf %139, %143 : vector<32x32xf32>
    %145 = arith.truncf %144 : vector<32x32xf32> to vector<32x32xbf16>
    %cst_61 = arith.constant dense<0.000000e+00> : vector<32x16xf32>
    %146 = tpu.matmul %145, %133, %cst_61 {dimension_numbers = #tpu.dot_dimension_numbers<[1], [0], [0], [1], [0, 0, 1, 1], [], []>} : vector<32x32xbf16>, vector<32x16xbf16>, vector<32x16xf32> -> vector<32x16xf32>
    %147 = vector.extract_strided_slice %31 {offsets = [32, 32], sizes = [32, 16], strides = [1, 1]} : vector<64x192xf32> to vector<32x16xf32>
    %148 = arith.truncf %147 : vector<32x16xf32> to vector<32x16xbf16>
    %149 = vector.extract_strided_slice %31 {offsets = [32, 96], sizes = [32, 16], strides = [1, 1]} : vector<64x192xf32> to vector<32x16xf32>
    %150 = arith.truncf %149 : vector<32x16xf32> to vector<32x16xbf16>
    %151 = vector.extract_strided_slice %31 {offsets = [32, 160], sizes = [32, 16], strides = [1, 1]} : vector<64x192xf32> to vector<32x16xf32>
    %152 = arith.truncf %151 : vector<32x16xf32> to vector<32x16xbf16>
    %cst_62 = arith.constant dense<0.000000e+00> : vector<32x32xf32>
    %153 = tpu.matmul %148, %150, %cst_62 {dimension_numbers = #tpu.dot_dimension_numbers<[1], [1], [0], [0], [0, 0, 1, 0], [], []>} : vector<32x16xbf16>, vector<32x16xbf16>, vector<32x32xf32> -> vector<32x32xf32>
    %cst_63 = arith.constant dense<0xFF800000> : vector<32xf32>
    %154 = vector.multi_reduction <maximumf>, %153, %cst_63 [1] : vector<32x32xf32> to vector<32xf32>
    %155 = vector.shape_cast %154 : vector<32xf32> to vector<32x1xf32>
    %156 = vector.broadcast %155 : vector<32x1xf32> to vector<32x32xf32>
    %157 = arith.subf %153, %156 : vector<32x32xf32>
    %158 = math.exp %157 : vector<32x32xf32>
    %cst_64 = arith.constant dense<0.000000e+00> : vector<32xf32>
    %159 = vector.multi_reduction <add>, %158, %cst_64 [1] : vector<32x32xf32> to vector<32xf32>
    %160 = vector.shape_cast %159 : vector<32xf32> to vector<32x1xf32>
    %161 = tpu.reciprocal %160 {approx = true} : vector<32x1xf32> -> vector<32x1xf32>
    %162 = vector.broadcast %161 : vector<32x1xf32> to vector<32x32xf32>
    %163 = arith.mulf %158, %162 : vector<32x32xf32>
    %164 = arith.truncf %163 : vector<32x32xf32> to vector<32x32xbf16>
    %cst_65 = arith.constant dense<0.000000e+00> : vector<32x16xf32>
    %165 = tpu.matmul %164, %152, %cst_65 {dimension_numbers = #tpu.dot_dimension_numbers<[1], [0], [0], [1], [0, 0, 1, 1], [], []>} : vector<32x32xbf16>, vector<32x16xbf16>, vector<32x16xf32> -> vector<32x16xf32>
    %166 = vector.extract_strided_slice %31 {offsets = [32, 48], sizes = [32, 16], strides = [1, 1]} : vector<64x192xf32> to vector<32x16xf32>
    %167 = arith.truncf %166 : vector<32x16xf32> to vector<32x16xbf16>
    %168 = vector.extract_strided_slice %31 {offsets = [32, 112], sizes = [32, 16], strides = [1, 1]} : vector<64x192xf32> to vector<32x16xf32>
    %169 = arith.truncf %168 : vector<32x16xf32> to vector<32x16xbf16>
    %170 = vector.extract_strided_slice %31 {offsets = [32, 176], sizes = [32, 16], strides = [1, 1]} : vector<64x192xf32> to vector<32x16xf32>
    %171 = arith.truncf %170 : vector<32x16xf32> to vector<32x16xbf16>
    %cst_66 = arith.constant dense<0.000000e+00> : vector<32x32xf32>
    %172 = tpu.matmul %167, %169, %cst_66 {dimension_numbers = #tpu.dot_dimension_numbers<[1], [1], [0], [0], [0, 0, 1, 0], [], []>} : vector<32x16xbf16>, vector<32x16xbf16>, vector<32x32xf32> -> vector<32x32xf32>
    %cst_67 = arith.constant dense<0xFF800000> : vector<32xf32>
    %173 = vector.multi_reduction <maximumf>, %172, %cst_67 [1] : vector<32x32xf32> to vector<32xf32>
    %174 = vector.shape_cast %173 : vector<32xf32> to vector<32x1xf32>
    %175 = vector.broadcast %174 : vector<32x1xf32> to vector<32x32xf32>
    %176 = arith.subf %172, %175 : vector<32x32xf32>
    %177 = math.exp %176 : vector<32x32xf32>
    %cst_68 = arith.constant dense<0.000000e+00> : vector<32xf32>
    %178 = vector.multi_reduction <add>, %177, %cst_68 [1] : vector<32x32xf32> to vector<32xf32>
    %179 = vector.shape_cast %178 : vector<32xf32> to vector<32x1xf32>
    %180 = tpu.reciprocal %179 {approx = true} : vector<32x1xf32> -> vector<32x1xf32>
    %181 = vector.broadcast %180 : vector<32x1xf32> to vector<32x32xf32>
    %182 = arith.mulf %177, %181 : vector<32x32xf32>
    %183 = arith.truncf %182 : vector<32x32xf32> to vector<32x32xbf16>
    %cst_69 = arith.constant dense<0.000000e+00> : vector<32x16xf32>
    %184 = tpu.matmul %183, %171, %cst_69 {dimension_numbers = #tpu.dot_dimension_numbers<[1], [0], [0], [1], [0, 0, 1, 1], [], []>} : vector<32x32xbf16>, vector<32x16xbf16>, vector<32x16xf32> -> vector<32x16xf32>
    %185 = tpu.concatenate %127, %146, %165, %184 in 1 : vector<32x16xf32>, vector<32x16xf32>, vector<32x16xf32>, vector<32x16xf32> -> vector<32x64xf32>
    %186 = tpu.concatenate %108, %185 in 0 : vector<32x64xf32>, vector<32x64xf32> -> vector<64x64xf32>
    %187 = arith.truncf %186 : vector<64x64xf32> to vector<64x64xbf16>
    %cst_70 = arith.constant dense<0.000000e+00> : vector<64x64xf32>
    %188 = tpu.matmul %187, %10, %cst_70 {dimension_numbers = #tpu.dot_dimension_numbers<[1], [0], [0], [1], [0, 0, 1, 1], [], []>} : vector<64x64xbf16>, vector<64x64xbf16>, vector<64x64xf32> -> vector<64x64xf32>
    %189 = vector.broadcast %12 : vector<1x64xf32> to vector<64x64xf32>
    %190 = arith.addf %188, %189 : vector<64x64xf32>
    %191 = arith.addf %3, %190 : vector<64x64xf32>
    %cst_71 = arith.constant dense<0.000000e+00> : vector<64xf32>
    %192 = vector.multi_reduction <add>, %191, %cst_71 [1] : vector<64x64xf32> to vector<64xf32>
    %193 = vector.shape_cast %192 : vector<64xf32> to vector<64x1xf32>
    %cst_72 = arith.constant 6.400000e+01 : f32
    %194 = vector.broadcast %cst_72 : f32 to vector<64x1xf32>
    %195 = arith.divf %193, %194 : vector<64x1xf32>
    %196 = vector.broadcast %195 : vector<64x1xf32> to vector<64x64xf32>
    %197 = arith.subf %191, %196 : vector<64x64xf32>
    %198 = arith.mulf %197, %197 : vector<64x64xf32>
    %cst_73 = arith.constant dense<0.000000e+00> : vector<64xf32>
    %199 = vector.multi_reduction <add>, %198, %cst_73 [1] : vector<64x64xf32> to vector<64xf32>
    %200 = vector.shape_cast %199 : vector<64xf32> to vector<64x1xf32>
    %cst_74 = arith.constant 6.400000e+01 : f32
    %201 = vector.broadcast %cst_74 : f32 to vector<64x1xf32>
    %202 = arith.divf %200, %201 : vector<64x1xf32>
    %203 = vector.broadcast %195 : vector<64x1xf32> to vector<64x64xf32>
    %204 = arith.subf %191, %203 : vector<64x64xf32>
    %cst_75 = arith.constant 9.99999974E-6 : f32
    %205 = vector.broadcast %cst_75 : f32 to vector<64x1xf32>
    %206 = arith.addf %202, %205 : vector<64x1xf32>
    %207 = math.rsqrt %206 : vector<64x1xf32>
    %208 = vector.broadcast %207 : vector<64x1xf32> to vector<64x64xf32>
    %209 = arith.mulf %204, %208 : vector<64x64xf32>
    %210 = vector.broadcast %14 : vector<1x64xf32> to vector<64x64xf32>
    %211 = arith.mulf %209, %210 : vector<64x64xf32>
    %212 = vector.broadcast %16 : vector<1x64xf32> to vector<64x64xf32>
    %213 = arith.addf %211, %212 : vector<64x64xf32>
    %214 = arith.truncf %213 : vector<64x64xf32> to vector<64x64xbf16>
    %cst_76 = arith.constant dense<0.000000e+00> : vector<64x256xf32>
    %215 = tpu.matmul %214, %18, %cst_76 {dimension_numbers = #tpu.dot_dimension_numbers<[1], [0], [0], [1], [0, 0, 1, 1], [], []>} : vector<64x64xbf16>, vector<64x256xbf16>, vector<64x256xf32> -> vector<64x256xf32>
    %216 = vector.broadcast %20 : vector<1x256xf32> to vector<64x256xf32>
    %217 = arith.addf %215, %216 : vector<64x256xf32>
    %cst_77 = arith.constant 0.000000e+00 : f32
    %218 = vector.broadcast %cst_77 : f32 to vector<64x256xf32>
    %219 = arith.maximumf %217, %218 : vector<64x256xf32>
    %220 = arith.truncf %219 : vector<64x256xf32> to vector<64x256xbf16>
    %cst_78 = arith.constant dense<0.000000e+00> : vector<64x64xf32>
    %221 = tpu.matmul %220, %22, %cst_78 {dimension_numbers = #tpu.dot_dimension_numbers<[1], [0], [0], [1], [0, 0, 1, 1], [], []>} : vector<64x256xbf16>, vector<256x64xbf16>, vector<64x64xf32> -> vector<64x64xf32>
    %222 = vector.broadcast %24 : vector<1x64xf32> to vector<64x64xf32>
    %223 = arith.addf %221, %222 : vector<64x64xf32>
    %224 = arith.addf %213, %223 : vector<64x64xf32>
    %cst_79 = arith.constant dense<0.000000e+00> : vector<64xf32>
    %225 = vector.multi_reduction <add>, %224, %cst_79 [1] : vector<64x64xf32> to vector<64xf32>
    %226 = vector.shape_cast %225 : vector<64xf32> to vector<64x1xf32>
    %cst_80 = arith.constant 6.400000e+01 : f32
    %227 = vector.broadcast %cst_80 : f32 to vector<64x1xf32>
    %228 = arith.divf %226, %227 : vector<64x1xf32>
    %229 = vector.broadcast %228 : vector<64x1xf32> to vector<64x64xf32>
    %230 = arith.subf %224, %229 : vector<64x64xf32>
    %231 = arith.mulf %230, %230 : vector<64x64xf32>
    %cst_81 = arith.constant dense<0.000000e+00> : vector<64xf32>
    %232 = vector.multi_reduction <add>, %231, %cst_81 [1] : vector<64x64xf32> to vector<64xf32>
    %233 = vector.shape_cast %232 : vector<64xf32> to vector<64x1xf32>
    %cst_82 = arith.constant 6.400000e+01 : f32
    %234 = vector.broadcast %cst_82 : f32 to vector<64x1xf32>
    %235 = arith.divf %233, %234 : vector<64x1xf32>
    %236 = vector.broadcast %228 : vector<64x1xf32> to vector<64x64xf32>
    %237 = arith.subf %224, %236 : vector<64x64xf32>
    %cst_83 = arith.constant 9.99999974E-6 : f32
    %238 = vector.broadcast %cst_83 : f32 to vector<64x1xf32>
    %239 = arith.addf %235, %238 : vector<64x1xf32>
    %240 = math.rsqrt %239 : vector<64x1xf32>
    %241 = vector.broadcast %240 : vector<64x1xf32> to vector<64x64xf32>
    %242 = arith.mulf %237, %241 : vector<64x64xf32>
    %243 = vector.broadcast %26 : vector<1x64xf32> to vector<64x64xf32>
    %244 = arith.mulf %242, %243 : vector<64x64xf32>
    %245 = vector.broadcast %28 : vector<1x64xf32> to vector<64x64xf32>
    %246 = arith.addf %244, %245 : vector<64x64xf32>
    %c0_84 = arith.constant 0 : index
    %c0_85 = arith.constant 0 : index
    %247 = vector.load %arg21[%c0_84, %c0_85] : memref<64x64xf32, #tpu.memory_space<vmem>>, vector<64x64xf32>
    tpu.vector_store %arg21[%c0_84, %c0_85], %246 {strides = array<i32>} : memref<64x64xf32, #tpu.memory_space<vmem>>, vector<64x64xf32>,
    %c1_i32 = arith.constant 1 : i32
    %248 = arith.cmpi eq, %arg1, %c1_i32 : i32
    %249 = arith.extui %248 : i1 to i32
    %c0_i32_86 = arith.constant 0 : i32
    %250 = arith.cmpi ne, %249, %c0_i32_86 : i32
    scf.if %250 {
      %251 = vector.shape_cast %246 : vector<64x64xf32> to vector<2x32x64xf32>
      %cst_87 = arith.constant dense<0.000000e+00> : vector<2x64xf32>
      %252 = vector.multi_reduction <add>, %251, %cst_87 [1] : vector<2x32x64xf32> to vector<2x64xf32>
      %cst_88 = arith.constant 3.200000e+01 : f32
      %253 = vector.broadcast %cst_88 : f32 to vector<2x64xf32>
      %254 = arith.divf %252, %253 : vector<2x64xf32>
      %c0_89 = arith.constant 0 : index
      %c0_90 = arith.constant 0 : index
      %255 = vector.load %arg18[%c0_89, %c0_90] : memref<64x128xf32, #tpu.memory_space<vmem>>, vector<64x128xf32>
      %cst_91 = arith.constant dense<0.000000e+00> : vector<2x128xf32>
      %256 = tpu.matmul %254, %255, %cst_91 {dimension_numbers = #tpu.dot_dimension_numbers<[1], [0], [0], [1], [0, 0, 1, 1], [], []>} : vector<2x64xf32>, vector<64x128xf32>, vector<2x128xf32> -> vector<2x128xf32>
      %c0_92 = arith.constant 0 : index
      %c0_93 = arith.constant 0 : index
      %257 = vector.load %arg19[%c0_92, %c0_93] : memref<1x128xf32, #tpu.memory_space<vmem>>, vector<1x128xf32>
      %258 = vector.broadcast %257 : vector<1x128xf32> to vector<2x128xf32>
      %259 = arith.addf %256, %258 : vector<2x128xf32>
      %c0_94 = arith.constant 0 : index
      %c0_95 = arith.constant 0 : index
      %c0_96 = arith.constant 0 : index
      %260 = vector.load %arg20[%c0_94, %c0_95, %c0_96] : memref<1x2x128xf32, #tpu.memory_space<vmem>>, vector<1x2x128xf32>
      %261 = vector.shape_cast %260 : vector<1x2x128xf32> to vector<2x128xf32>
      %262 = vector.shape_cast %259 : vector<2x128xf32> to vector<1x2x128xf32>
      tpu.vector_store %arg20[%c0_94, %c0_95, %c0_96], %262 {strides = array<i32>} : memref<1x2x128xf32, #tpu.memory_space<vmem>>, vector<1x2x128xf32>,
    } else {
    }
    return
  }
  func.func @transform_0(%arg0: i32, %arg1: i32) -> (i32, i32, i32) {
    %c0_i32 = arith.constant 0 : i32
    %c0_i32_0 = arith.constant 0 : i32
    %c0_i32_1 = arith.constant 0 : i32
    return %arg0, %c0_i32, %c0_i32_0 : i32, i32, i32
  }
  func.func @transform_1(%arg0: i32, %arg1: i32) -> (i32, i32) {
    %c0_i32 = arith.constant 0 : i32
    %c0_i32_0 = arith.constant 0 : i32
    %c0_i32_1 = arith.constant 0 : i32
    return %c0_i32, %c0_i32_0 : i32, i32
  }
  func.func @transform_2(%arg0: i32, %arg1: i32) -> (i32, i32) {
    %c0_i32 = arith.constant 0 : i32
    %c0_i32_0 = arith.constant 0 : i32
    %c0_i32_1 = arith.constant 0 : i32
    return %c0_i32, %c0_i32_0 : i32, i32
  }
  func.func @transform_3(%arg0: i32, %arg1: i32) -> (i32, i32) {
    %c0_i32 = arith.constant 0 : i32
    %c0_i32_0 = arith.constant 0 : i32
    %c0_i32_1 = arith.constant 0 : i32
    return %c0_i32, %c0_i32_0 : i32, i32
  }
  func.func @transform_4(%arg0: i32, %arg1: i32) -> (i32, i32, i32) {
    %c0_i32 = arith.constant 0 : i32
    %c0_i32_0 = arith.constant 0 : i32
    %c0_i32_1 = arith.constant 0 : i32
    return %arg1, %c0_i32, %c0_i32_0 : i32, i32, i32
  }
  func.func @transform_5(%arg0: i32, %arg1: i32) -> (i32, i32, i32) {
    %c0_i32 = arith.constant 0 : i32
    %c0_i32_0 = arith.constant 0 : i32
    %c0_i32_1 = arith.constant 0 : i32
    return %arg1, %c0_i32, %c0_i32_0 : i32, i32, i32
  }
  func.func @transform_6(%arg0: i32, %arg1: i32) -> (i32, i32, i32) {
    %c0_i32 = arith.constant 0 : i32
    %c0_i32_0 = arith.constant 0 : i32
    %c0_i32_1 = arith.constant 0 : i32
    return %arg1, %c0_i32, %c0_i32_0 : i32, i32, i32
  }
  func.func @transform_7(%arg0: i32, %arg1: i32) -> (i32, i32, i32) {
    %c0_i32 = arith.constant 0 : i32
    %c0_i32_0 = arith.constant 0 : i32
    %c0_i32_1 = arith.constant 0 : i32
    return %arg1, %c0_i32, %c0_i32_0 : i32, i32, i32
  }
  func.func @transform_8(%arg0: i32, %arg1: i32) -> (i32, i32, i32) {
    %c0_i32 = arith.constant 0 : i32
    %c0_i32_0 = arith.constant 0 : i32
    %c0_i32_1 = arith.constant 0 : i32
    return %arg1, %c0_i32, %c0_i32_0 : i32, i32, i32
  }
  func.func @transform_9(%arg0: i32, %arg1: i32) -> (i32, i32, i32) {
    %c0_i32 = arith.constant 0 : i32
    %c0_i32_0 = arith.constant 0 : i32
    %c0_i32_1 = arith.constant 0 : i32
    return %arg1, %c0_i32, %c0_i32_0 : i32, i32, i32
  }
  func.func @transform_10(%arg0: i32, %arg1: i32) -> (i32, i32, i32) {
    %c0_i32 = arith.constant 0 : i32
    %c0_i32_0 = arith.constant 0 : i32
    %c0_i32_1 = arith.constant 0 : i32
    return %arg1, %c0_i32, %c0_i32_0 : i32, i32, i32
  }
  func.func @transform_11(%arg0: i32, %arg1: i32) -> (i32, i32, i32) {
    %c0_i32 = arith.constant 0 : i32
    %c0_i32_0 = arith.constant 0 : i32
    %c0_i32_1 = arith.constant 0 : i32
    return %arg1, %c0_i32, %c0_i32_0 : i32, i32, i32
  }
  func.func @transform_12(%arg0: i32, %arg1: i32) -> (i32, i32, i32) {
    %c0_i32 = arith.constant 0 : i32
    %c0_i32_0 = arith.constant 0 : i32
    %c0_i32_1 = arith.constant 0 : i32
    return %arg1, %c0_i32, %c0_i32_0 : i32, i32, i32
  }
  func.func @transform_13(%arg0: i32, %arg1: i32) -> (i32, i32, i32) {
    %c0_i32 = arith.constant 0 : i32
    %c0_i32_0 = arith.constant 0 : i32
    %c0_i32_1 = arith.constant 0 : i32
    return %arg1, %c0_i32, %c0_i32_0 : i32, i32, i32
  }
  func.func @transform_14(%arg0: i32, %arg1: i32) -> (i32, i32, i32) {
    %c0_i32 = arith.constant 0 : i32
    %c0_i32_0 = arith.constant 0 : i32
    %c0_i32_1 = arith.constant 0 : i32
    return %arg1, %c0_i32, %c0_i32_0 : i32, i32, i32
  }
  func.func @transform_15(%arg0: i32, %arg1: i32) -> (i32, i32, i32) {
    %c0_i32 = arith.constant 0 : i32
    %c0_i32_0 = arith.constant 0 : i32
    %c0_i32_1 = arith.constant 0 : i32
    return %arg1, %c0_i32, %c0_i32_0 : i32, i32, i32
  }
  func.func @transform_16(%arg0: i32, %arg1: i32) -> (i32, i32) {
    %c0_i32 = arith.constant 0 : i32
    %c0_i32_0 = arith.constant 0 : i32
    %c0_i32_1 = arith.constant 0 : i32
    return %c0_i32, %c0_i32_0 : i32, i32
  }
  func.func @transform_17(%arg0: i32, %arg1: i32) -> (i32, i32) {
    %c0_i32 = arith.constant 0 : i32
    %c0_i32_0 = arith.constant 0 : i32
    %c0_i32_1 = arith.constant 0 : i32
    return %c0_i32, %c0_i32_0 : i32, i32
  }
  func.func @transform_18(%arg0: i32, %arg1: i32) -> (i32, i32, i32) {
    %c0_i32 = arith.constant 0 : i32
    %c0_i32_0 = arith.constant 0 : i32
    %c0_i32_1 = arith.constant 0 : i32
    return %arg0, %c0_i32, %c0_i32_0 : i32, i32, i32
  }
}

</mosaic_0001>

<bundles_post_ra>
// kernel: emotion_transformer_forward.1
= control target key start
LH: loop header
LB: loop body
LE: loop exit
PB: predicated region body
PF: predicated region fallthrough
CT: control target
= control target key end

     0   :  { %s4683_s27 = smov 0   ;;  %s4685_s28 = smov 0   ;;  %s5600_s0 = inlined_call_operand.vmem [shape: f32[2,32,128], index: 0, kind: input, shape index: {}]   ;;  %s5601_s1 = inlined_call_operand.vmem [shape: f32[128,64], index: 1, kind: input, shape index: {}]   ;;  %s5602_s2 = inlined_call_operand.vmem [shape: f32[1,64], index: 2, kind: input, shape index: {}]   ;;  %s5603_s3 = inlined_call_operand.vmem [shape: f32[32,64], index: 3, kind: input, shape index: {}]   ;;  %s5604_s4 = inlined_call_operand.vmem [shape: bf16[2,64,192], index: 4, kind: input, shape index: {}]   ;;  %s5605_s5 = inlined_call_operand.vmem [shape: f32[2,1,192], index: 5, kind: input, shape index: {}]   ;;  %s5606_s6 = inlined_call_operand.vmem [shape: bf16[2,64,64], index: 6, kind: input, shape index: {}]   ;;  %s5607_s7 = inlined_call_operand.vmem [shape: f32[2,1,64], index: 7, kind: input, shape index: {}]   ;;  %s5608_s8 = inlined_call_operand.vmem [shape: f32[2,1,64], index: 8, kind: input, shape index: {}]   ;;  %s5609_s9 = inlined_call_operand.vmem [shape: f32[2,1,64], index: 9, kind: input, shape index: {}]   ;;  %s5610_s10 = inlined_call_operand.vmem [shape: bf16[2,64,256], index: 10, kind: input, shape index: {}]   ;;  %s5611_s11 = inlined_call_operand.vmem [shape: f32[2,1,256], index: 11, kind: input, shape index: {}]   ;;  %s5612_s12 = inlined_call_operand.vmem [shape: bf16[2,256,64], index: 12, kind: input, shape index: {}]   ;;  %s5613_s13 = inlined_call_operand.vmem [shape: f32[2,1,64], index: 13, kind: input, shape index: {}]   ;;  %s5614_s14 = inlined_call_operand.vmem [shape: f32[2,1,64], index: 14, kind: input, shape index: {}]   ;;  %s5615_s15 = inlined_call_operand.vmem [shape: f32[2,1,64], index: 15, kind: input, shape index: {}]   ;;  %s5616_s16 = inlined_call_operand.vmem [shape: f32[64,128], index: 16, kind: input, shape index: {}]   ;;  %s5617_s17 = inlined_call_operand.vmem [shape: f32[1,128], index: 17, kind: input, shape index: {}]   ;;  %s5618_s18 = inlined_call_operand.vmem [shape: f32[1,2,128], index: 18, kind: output, shape index: {}]  }
   0x1   :  { %5625 = sst [smem:[#allocation7_spill]] %s5600_s0  ;;  %s4687_s29 = smov 0  }
   0x2   :  { %5626 = sst [smem:[#allocation8_spill]] %s5601_s1 }
   0x3   :  { %5627 = sst [smem:[#allocation9_spill]] %s5602_s2 }
   0x4   :  { %5628 = sst [smem:[#allocation10_spill]] %s5603_s3 }
   0x5   :  { %5629 = sst [smem:[#allocation11_spill]] %s5604_s4 }
   0x6   :  { %5630 = sst [smem:[#allocation12_spill]] %s5605_s5 }
   0x7   :  { %5631 = sst [smem:[#allocation13_spill]] %s5606_s6 }
   0x8   :  { %5632 = sst [smem:[#allocation14_spill]] %s5616_s16 }
   0x9   :  { %5633 = sst [smem:[#allocation15_spill]] %s5617_s17 }
   0xa   :  { %5634 = sst [smem:[#allocation16_spill]] %s5618_s18 }
   0xb LB: > { %5635 = sst [smem:[#allocation3_spill]] %s4572_s28  ;;  %s37_s30 = sadd.s32 1, %s4572_s28  ;;  %s4576_s29 = sphi %s4687_s29, %s28_s29   ;;  %s4572_s28 = sphi %s4685_s28, %s5656_s28   ;;  %s4568_s27 = sphi %s4683_s27, %s5655_s27  }
   0xc   : > { %5636 = sst [smem:[#allocation4_spill]] %s4576_s29  ;;  %p3739_p0 = scmp.ge.s32.totalorder %s4576_s29, 1 }
   0xd   : > { %p38_p1 = scmp.ge.s32.totalorder %s37_s30, 2  ;;  %p632_p2 = scmp.lt.s32.totalorder %s4576_s29, 3 }
   0xf   : > { %s5658_s30 = smov (%p38_p1, %s37_s30), 0  ;;  %p633_p3 = pnand %p3739_p0, %p632_p2 }
  0x10   : > { %5637 = sst [smem:[#allocation5_spill]] %s5658_s30 }
  0x11   : > { %636 = sbr.rel (%p633_p3) target bundleno = 6178 (0x1822), region = 92 }
  0x16   : > { %p739_p4 = scmp.lt.s32.totalorder %s4568_s27, 1  ;;  %s5638_s4 = sld [smem:[#allocation11_spill]] }
  0x17   : > { %s5639_s5 = sld [smem:[#allocation12_spill]]  ;;  %p3750_p5 = scmp.ne.s32.totalorder %s4568_s27, 0 }
  0x18   : > { %s4705_s0 = scalar_select %p739_p4, %s4568_s27, 1 }
  0x19   : > { %s5641_s6 = sld [smem:[#allocation13_spill]] }
  0x1a   : > { %s3844_s19 = sshll.u32 %s4705_s0, 6  ;;  %s3742_s1 = sshll.u32 %s4705_s0, 1 }
  0x1b   : > { %s3845_s25 = sshll.u32 %s4705_s0, 5  ;;  %s4745_s28 = scalar_lea.vmem %s5611_s11, %s3742_s1 }
  0x1c   : > { %s4712_s22 = scalar_lea.vmem %s5638_s4, %s3844_s19  ;;  %s3847_s18 = sshll.u32 %s4705_s0, 7 }
  0x1d   : > { %s4717_s24 = scalar_lea.vmem %s5639_s5, %s3742_s1  ;;  %s4751_s3 = scalar_lea.vmem %s5612_s12, %s3847_s18 }
  0x1e   : > { %5640 = sst [smem:[#allocation6_spill]] %s4717_s24  ;;  %s4740_s24 = scalar_lea.vmem %s5610_s10, %s3844_s19 }
  0x1f   : > { %s4727_s17 = scalar_lea.vmem %s5641_s6, %s3845_s25  ;;  %s778_s4 = scalar_lea.vmem %s5613_s13, %s4705_s0 }
  0x20   : > { %s781_s5 = scalar_lea.vmem %s5614_s14, %s4705_s0  ;;  %s784_s30 = scalar_lea.vmem %s5615_s15, %s4705_s0 }
  0x21   : > { %793 = sbr.rel (%p3750_p5) target bundleno = 277 (0x115), region = 96  ;;  %s5642_s29 = sld [smem:[#allocation8_spill]] (!%p3750_p5) }
  0x22   : > { %s5644_s26 = sld [smem:[#allocation7_spill]] (!%p3750_p5) }
  0x23   : > { %s5645_s6 = sld [smem:[#allocation9_spill]] (!%p3750_p5) }
  0x24   : > { %s5646_s1 = sld [smem:[#allocation10_spill]] (!%p3750_p5) }
  0x26   : > { %vm942_vm0 = vcmask 523264  }
  0x27   : > { %s5643_s25 = smov %s5642_s29  ;;  %v817_v0 = vld [vmem:[%s5642_s29 + $0x78] sm:$0xff] }
  0x28   : > { %v816_v1 = vld [vmem:[%s5643_s25 + $0x70] sm:$0xff]  ;;  %3993 = vmatprep.subr.mxu0 %v817_v0  ;;  %4200 = vmatprep.subr.mxu1 %v817_v0  ;;  %v815_v2 = vld [vmem:[%s5643_s25 + $0x68] sm:$0xff]  ;;  %v814_v3 = vld [vmem:[%s5643_s25 + $0x60] sm:$0xff] }
  0x29   : > { %3994 = vmatpush3.msra.mxu0 %v817_v0  ;;  %4216 = vmatpush3.msra.mxu1 %v817_v0  ;;  %v813_v4 = vld [vmem:[%s5643_s25 + $0x58] sm:$0xff]  ;;  %v812_v5 = vld [vmem:[%s5643_s25 + $0x50] sm:$0xff]  ;;  %v811_v6 = vld [vmem:[%s5643_s25 + $0x48] sm:$0xff] }
  0x2a   : > { %3995 = vmatprep.subr.mxu0 %v816_v1  ;;  %4201 = vmatprep.subr.mxu1 %v816_v1  ;;  %v810_v7 = vld [vmem:[%s5643_s25 + $0x40] sm:$0xff]  ;;  %v809_v8 = vld [vmem:[%s5643_s25 + $0x38] sm:$0xff]  ;;  %v808_v9 = vld [vmem:[%s5643_s25 + $0x30] sm:$0xff] }
  0x2b   : > { %3996 = vmatpush3.msra.mxu0 %v816_v1  ;;  %4217 = vmatpush3.msra.mxu1 %v816_v1  ;;  %v807_v10 = vld [vmem:[%s5643_s25 + $0x28] sm:$0xff]  ;;  %v806_v11 = vld [vmem:[%s5643_s25 + $0x20] sm:$0xff]  ;;  %v805_v12 = vld [vmem:[%s5643_s25 + $0x18] sm:$0xff] }
  0x2c   : > { %3997 = vmatprep.subr.mxu0 %v815_v2  ;;  %4202 = vmatprep.subr.mxu1 %v815_v2  ;;  %v804_v13 = vld [vmem:[%s5643_s25 + $0x10] sm:$0xff]  ;;  %v803_v14 = vld [vmem:[%s5643_s25 + $0x8] sm:$0xff]  ;;  %v802_v15 = vld [vmem:[%s5643_s25] sm:$0xff] }
  0x2d   : > { %3998 = vmatpush3.msra.mxu0 %v815_v2  ;;  %4218 = vmatpush3.msra.mxu1 %v815_v2  ;;  %v794_v16 = vld [vmem:[%s5644_s26] sm:$0xff]  ;;  %v795_v18 = vld [vmem:[%s5644_s26 + $0x8] sm:$0xff]  ;;  %v796_v20 = vld [vmem:[%s5644_s26 + $0x10] sm:$0xff] }
  0x2e   : > { %3999 = vmatprep.subr.mxu0 %v814_v3  ;;  %4203 = vmatprep.subr.mxu1 %v814_v3  ;;  %v798_v17 = vld [vmem:[%s5644_s26 + $0x20] sm:$0xff]  ;;  %v799_v19 = vld [vmem:[%s5644_s26 + $0x28] sm:$0xff]  ;;  %v800_v21 = vld [vmem:[%s5644_s26 + $0x30] sm:$0xff] }
  0x2f   : > { %4000 = vmatpush3.msra.mxu0 %v814_v3  ;;  %4219 = vmatpush3.msra.mxu1 %v814_v3  ;;  %v797_v22 = vld [vmem:[%s5644_s26 + $0x18] sm:$0xff]  ;;  %v3751_v24 = vld [vmem:[%s5645_s6] ss:$0 sm:$0xff]  ;;  %v931_v26 = vld [vmem:[%s5646_s1 + $0x8] sm:$0xff] }
  0x30   : > { %4001 = vmatprep.subr.mxu0 %v813_v4  ;;  %4204 = vmatprep.subr.mxu1 %v813_v4  ;;  %v801_v23 = vld [vmem:[%s5644_s26 + $0x38] sm:$0xff]  ;;  %v930_v31 = vld [vmem:[%s5646_s1] sm:$0xff]  ;;  %v932_v45 = vld [vmem:[%s5646_s1 + $0x10] sm:$0xff] }
  0x31   : > { %4002 = vmatpush3.msra.mxu0 %v813_v4  ;;  %4220 = vmatpush3.msra.mxu1 %v813_v4  ;;  %v933_v38 = vld [vmem:[%s5646_s1 + $0x18] sm:$0xff] }
  0x32   : > { %4003 = vmatprep.subr.mxu0 %v812_v5  ;;  %4205 = vmatprep.subr.mxu1 %v812_v5 }
  0x33   : > { %4004 = vmatpush3.msra.mxu0 %v812_v5  ;;  %4221 = vmatpush3.msra.mxu1 %v812_v5 }
  0x34   : > { %4005 = vmatprep.subr.mxu0 %v811_v6  ;;  %4206 = vmatprep.subr.mxu1 %v811_v6 }
  0x35   : > { %4006 = vmatpush3.msra.mxu0 %v811_v6  ;;  %4222 = vmatpush3.msra.mxu1 %v811_v6 }
  0x36   : > { %4007 = vmatprep.subr.mxu0 %v810_v7  ;;  %4207 = vmatprep.subr.mxu1 %v810_v7 }
  0x37   : > { %4008 = vmatpush3.msra.mxu0 %v810_v7  ;;  %4223 = vmatpush3.msra.mxu1 %v810_v7 }
  0x38   : > { %4009 = vmatprep.subr.mxu0 %v809_v8  ;;  %4208 = vmatprep.subr.mxu1 %v809_v8 }
  0x39   : > { %4010 = vmatpush3.msra.mxu0 %v809_v8  ;;  %4224 = vmatpush3.msra.mxu1 %v809_v8 }
  0x3a   : > { %4011 = vmatprep.subr.mxu0 %v808_v9  ;;  %4209 = vmatprep.subr.mxu1 %v808_v9 }
  0x3b   : > { %4012 = vmatpush3.msra.mxu0 %v808_v9  ;;  %4225 = vmatpush3.msra.mxu1 %v808_v9 }
  0x3c   : > { %4013 = vmatprep.subr.mxu0 %v807_v10  ;;  %4210 = vmatprep.subr.mxu1 %v807_v10 }
  0x3d   : > { %4014 = vmatpush3.msra.mxu0 %v807_v10  ;;  %4226 = vmatpush3.msra.mxu1 %v807_v10 }
  0x3e   : > { %4015 = vmatprep.subr.mxu0 %v806_v11  ;;  %4211 = vmatprep.subr.mxu1 %v806_v11 }
  0x3f   : > { %4016 = vmatpush3.msra.mxu0 %v806_v11  ;;  %4227 = vmatpush3.msra.mxu1 %v806_v11 }
  0x40   : > { %4017 = vmatprep.subr.mxu0 %v805_v12  ;;  %4212 = vmatprep.subr.mxu1 %v805_v12 }
  0x41   : > { %4018 = vmatpush3.msra.mxu0 %v805_v12  ;;  %4228 = vmatpush3.msra.mxu1 %v805_v12 }
  0x42   : > { %4019 = vmatprep.subr.mxu0 %v804_v13  ;;  %4213 = vmatprep.subr.mxu1 %v804_v13 }
  0x43   : > { %4020 = vmatpush3.msra.mxu0 %v804_v13  ;;  %4229 = vmatpush3.msra.mxu1 %v804_v13 }
  0x44   : > { %4021 = vmatprep.subr.mxu0 %v803_v14  ;;  %4214 = vmatprep.subr.mxu1 %v803_v14 }
  0x45   : > { %4022 = vmatpush3.msra.mxu0 %v803_v14  ;;  %4230 = vmatpush3.msra.mxu1 %v803_v14 }
  0x46   : > { %4023 = vmatprep.subr.mxu0 %v802_v15  ;;  %4215 = vmatprep.subr.mxu1 %v802_v15 }
  0x47   : > { %4024 = vmatpush3.msra.mxu0 %v802_v15  ;;  %4231 = vmatpush3.msra.mxu1 %v802_v15 }
  0x48   : > { %4025 = vmatprep.mubr.f32.mxu0 %v794_v16  ;;  %4031 = vmatprep.mubr.f32.mxu1 %v798_v17 }
  0x49   : > { %4026 = vmatmul.mubr.f32.vlgmr.msra.gmra.mxu0 %v795_v18  ;;  %4032 = vmatmul.mubr.f32.vlgmr.msra.gmra.mxu1 %v799_v19 }
  0x4a   : > { %4028 = vmatprep.mubr.f32.mxu0 %v796_v20  ;;  %4034 = vmatprep.mubr.f32.mxu1 %v800_v21 }
  0x4d   : > { %4029 = vmatmul.mubr.f32.gmra.mxu0 %v797_v22  ;;  %4035 = vmatmul.mubr.f32.gmra.mxu1 %v801_v23 }
 0x109   : > { %v4027_v25 = vpop.f32.mrf.mxu0  ;;  %v4033_v27 = vpop.f32.mrf.mxu1 }
 0x10a   : > { %v897_v28 = vadd.f32 %v4027_v25, %v3751_v24  ;;  %v917_v29 = vadd.f32 %v4033_v27, %v3751_v24 }
 0x10b   : > { %v891_v30 = vpop.f32.mrf.mxu0  ;;  %v911_v32 = vpop.f32.mrf.mxu1 }
 0x10c   : > { %v935_v33 = vadd.f32 %v931_v26, %v897_v28  ;;  %v939_v34 = vadd.f32 %v931_v26, %v917_v29  ;;  %v892_v35 = vadd.f32 %v3751_v24, %v891_v30  ;;  %v912_v36 = vadd.f32 %v3751_v24, %v911_v32 }
 0x10d   : > { %v4030_v37 = vpop.f32.mrf.mxu0  ;;  %v4036_v39 = vpop.f32.mrf.mxu1 }
 0x10e   : > { %944 = vst.msk [vmem:[#allocation2 + $0x8] sm:$0xff] %vm942_vm0, %v935_v33  ;;  %948 = vst.msk [vmem:[#allocation2 + $0x28] sm:$0xff] %vm942_vm0, %v939_v34  ;;  %v934_v40 = vadd.f32 %v930_v31, %v892_v35  ;;  %v938_v41 = vadd.f32 %v930_v31, %v912_v36  ;;  %v907_v42 = vadd.f32 %v4030_v37, %v3751_v24 }
 0x10f   : > { %v927_v43 = vadd.f32 %v4036_v39, %v3751_v24  ;;  %v901_v44 = vpop.f32.mrf.mxu0  ;;  %v921_v46 = vpop.f32.mrf.mxu1 }
 0x110   : > { %943 = vst.msk [vmem:[#allocation2] sm:$0xff] %vm942_vm0, %v934_v40  ;;  %947 = vst.msk [vmem:[#allocation2 + $0x20] sm:$0xff] %vm942_vm0, %v938_v41  ;;  %v937_v47 = vadd.f32 %v933_v38, %v907_v42  ;;  %v902_v49 = vadd.f32 %v3751_v24, %v901_v44  ;;  %v922_v50 = vadd.f32 %v3751_v24, %v921_v46 }
 0x111   : > { %v941_v48 = vadd.f32 %v933_v38, %v927_v43 }
 0x112   : > { %946 = vst.msk [vmem:[#allocation2 + $0x18] sm:$0xff] %vm942_vm0, %v937_v47  ;;  %v936_v51 = vadd.f32 %v932_v45, %v902_v49  ;;  %v940_v52 = vadd.f32 %v932_v45, %v922_v50 }
 0x113   : > { %950 = vst.msk [vmem:[#allocation2 + $0x38] sm:$0xff] %vm942_vm0, %v941_v48 }
 0x114   : > { %945 = vst.msk [vmem:[#allocation2 + $0x10] sm:$0xff] %vm942_vm0, %v936_v51  ;;  %949 = vst.msk [vmem:[#allocation2 + $0x30] sm:$0xff] %vm942_vm0, %v940_v52 }
 0x115 PF: > { %v4342_v53 = vld [vmem:[%s4712_s22 + $0x34] ss:$8 sps:$4 sm:$0xff]   ;;  %v4344_v54 = vld [vmem:[%s4712_s22 + $0x30] ss:$8 sps:$4 sm:$0xff]   ;;  %v4578_v55 = vmov 0   ;;  %v952_v63 = vld [vmem:[#allocation2 + $0x8] sm:$0xff]  ;;  %v1028_v10 = vlaneseq  ;;  %s5648_s21 = scalar_lea.vmem %s5607_s7, %s4705_s0 }
 0x116   : > { %1123 = vmatprep.mubr.bf16.mxu0 %v4578_v55  ;;  %1099 = vmatprep.subr.bf16.mxu0 %v4342_v53  ;;  %v4345_v56 = vld [vmem:[%s4712_s22 + $0x24] ss:$8 sps:$4 sm:$0xff]   ;;  %v4347_v57 = vld [vmem:[%s4712_s22 + $0x20] ss:$8 sps:$4 sm:$0xff]   ;;  %v4348_v58 = vld [vmem:[%s4712_s22 + $0x14] ss:$8 sps:$4 sm:$0xff]  }
 0x117   : > { %1100 = vmatpush1.bf16.msra.mxu0 %v4344_v54  ;;  %v4350_v59 = vld [vmem:[%s4712_s22 + $0x10] ss:$8 sps:$4 sm:$0xff]   ;;  %v4351_v60 = vld [vmem:[%s4712_s22 + $0x4] ss:$8 sps:$4 sm:$0xff]   ;;  %v4353_v61 = vld [vmem:[%s4712_s22] ss:$8 sps:$4 sm:$0xff]  }
 0x118   : > { %1101 = vmatprep.subr.bf16.mxu0 %v4345_v56  ;;  %v951_v62 = vld [vmem:[#allocation2] sm:$0xff]  ;;  %vm1078_vm1 = vcmask 523264   ;;  %s5647_s6 = sld [smem:[#allocation6_spill]]  ;;  %v956_v5 = vld [vmem:[#allocation2 + $0x28] sm:$0xff]  ;;  %v4877_v11 = vshrl.u32 %v1028_v10, 7  ;;  %vm1174_vm2 = vcmask 130048  }
 0x119   : > { %v959_v0 = vpack.c.bf16 %v952_v63, %v951_v62  ;;  %v954_v2 = vld [vmem:[#allocation2 + $0x18] sm:$0xff]  ;;  %v955_v4 = vld [vmem:[#allocation2 + $0x20] sm:$0xff]  ;;  %s4579_s22 = smov 64   ;;  %vm1236_vm3 = vcmask 261120   ;;  %s4580_s19 = smov 48   ;;  %vm1924_vm4 = vcmask 392192  }
 0x11a   : > { %v961_v6 = vpack.c.bf16 %v956_v5, %v955_v4  ;;  %v958_v8 = vld [vmem:[#allocation2 + $0x38] sm:$0xff]  ;;  %v1030_v12 = vsub.s32 0, %v4877_v11  ;;  %v1034_v23 = vsub.s32 1, %v4877_v11  ;;  %s4581_s23 = smov 96   ;;  %s4582_s29 = smov 112  }
 0x11b   : > { %1102 = vmatpush1.bf16.msra.mxu0 %v4347_v57  ;;  %v953_v1 = vld [vmem:[#allocation2 + $0x10] sm:$0xff]  ;;  %s4583_s18 = smov 32   ;;  %s4584_s20 = smov 16  }
 0x11c   : > { %1103 = vmatprep.subr.bf16.mxu0 %v4348_v58  ;;  %v960_v3 = vpack.c.bf16 %v954_v2, %v953_v1  ;;  %v957_v7 = vld [vmem:[#allocation2 + $0x30] sm:$0xff]  ;;  %s4585_s2 = smov 80   ;;  %p3838_p6 = scmp.ne.s32.totalorder %s4568_s27, 1 }
 0x11d   : > { %v962_v9 = vpack.c.bf16 %v958_v8, %v957_v7  ;;  %s5653_s16 = sld [smem:[#allocation16_spill]] (!%p3838_p6) }
 0x11e   : > { %v971_v13 = vld [vmem:[%s5647_s6] sm:$0x3] }
 0x11f   : > { %1104 = vmatpush1.bf16.msra.mxu0 %v4350_v59  ;;  %v1031_v15 = vrot.slane %v971_v13, %v1030_v12  ;;  %v4890_v26 = vrot.slane %v971_v13, %v1034_v23 }
 0x120   : > { %1105 = vmatprep.subr.bf16.mxu0 %v4351_v60 }
 0x123   : > { %1106 = vmatpush1.bf16.msra.mxu0 %v4353_v61 }
 0x126   : > { %3760 = vmatmul.mubr.msk.bf16.vlgmr.msra.gmra.mxu0 %vm1078_vm1, %v959_v0 }
 0x127   : > { %1133 = vmatprep.mubr.bf16.mxu0 %v4578_v55 }
 0x12e   : > { %3761 = vmatmul.mubr.msk.bf16.gmra.mxu0 %vm1078_vm1, %v960_v3 }
 0x12f   : > { %1143 = vmatprep.mubr.bf16.mxu0 %v4578_v55 }
 0x136   : > { %3762 = vmatmul.mubr.msk.bf16.gmra.mxu0 %vm1078_vm1, %v961_v6 }
 0x137   : > { %1153 = vmatprep.mubr.bf16.mxu0 %v4578_v55 }
 0x13e   : > { %3763 = vmatmul.mubr.msk.bf16.gmra.mxu0 %vm1078_vm1, %v962_v9 }
 0x1e6   : > { %v1125_v14 = vpop.f32.mrf.mxu0 }
 0x1e7   : > { %v1126_v18 = vadd.f32 %v1125_v14, %v1031_v15 }
 0x1e8   : > { %v1127_v16 = vpop.f32.mrf.mxu0 }
 0x1e9   : > { %v1128_v34 = vadd.f32 %v1127_v16, %v4890_v26 }
 0x1ea   : > { %v1129_v17 = vpop.f32.mrf.mxu0 }
 0x1eb   : > { %v1130_v19 = vadd.f32 %v1129_v17, %v1031_v15 }
 0x1ec   : > { %v1131_v20 = vpop.f32.mrf.mxu0 }
 0x1ed   : > { %v4883_v21 = vpack.c.bf16 %v1130_v19, %v1126_v18  ;;  %v1132_v30 = vadd.f32 %v1131_v20, %v4890_v26 }
 0x1ee   : > { %v1135_v22 = vpop.f32.mrf.mxu0 }
 0x1ef   : > { %4041 = vmatprep.mubr.msk.bf16.mxu0 %vm1174_vm2, %v4883_v21  ;;  %v1136_v27 = vadd.f32 %v1135_v22, %v1031_v15  ;;  %v4902_v36 = vpack.c.bf16 %v1132_v30, %v1128_v34 }
 0x1f0   : > { %v1137_v24 = vpop.f32.mrf.mxu0 }
 0x1f1   : > { %v1138_v31 = vadd.f32 %v1137_v24, %v4890_v26 }
 0x1f2   : > { %v1139_v25 = vpop.f32.mrf.mxu0 }
 0x1f3   : > { %v1140_v28 = vadd.f32 %v1139_v25, %v1031_v15 }
 0x1f4   : > { %v1141_v29 = vpop.f32.mrf.mxu0 }
 0x1f5   : > { %v4894_v32 = vpack.c.bf16 %v1140_v28, %v1136_v27  ;;  %v1142_v33 = vadd.f32 %v1141_v29, %v4890_v26 }
 0x1f6   : > { %v1145_v37 = vpop.f32.mrf.mxu0 }
 0x1f7   : > { %v4898_v35 = vpack.c.bf16 %v1142_v33, %v1138_v31  ;;  %1172 = vrot.lane.b32.xlu0 %v4894_v32, %s4579_s22  ;;  %v1146_v39 = vadd.f32 %v1145_v37, %v1031_v15 }
 0x1f8   : > { %v1147_v38 = vpop.f32.mrf.mxu0 }
 0x1f9   : > { %4045 = vmatprep.subr.bf16.mxu1 %v4898_v35  ;;  %v1148_v41 = vadd.f32 %v1147_v38, %v4890_v26 }
 0x1fa   : > { %4046 = vmatpush3.bf16.msra.mxu1 %v4898_v35  ;;  %v1149_v40 = vpop.f32.mrf.mxu0 }
 0x1fb   : > { %4047 = vmatprep.subr.bf16.mxu1 %v4902_v36  ;;  %1170 = vrot.lane.b32.xlu0 %v4883_v21, %s4579_s22  ;;  %v1150_v42 = vadd.f32 %v1149_v40, %v1031_v15 }
 0x1fc   : > { %v1151_v43 = vpop.f32.mrf.mxu0 }
 0x1fd   : > { %v4911_v44 = vpack.c.bf16 %v1150_v42, %v1146_v39  ;;  %v1152_v45 = vadd.f32 %v1151_v43, %v4890_v26 }
 0x1fe   : > { %4048 = vmatpush3.bf16.msra.mxu1 %v4902_v36  ;;  %v1155_v46 = vpop.f32.mrf.mxu0 }
 0x1ff   : > { %v4914_v47 = vpack.c.bf16 %v1152_v45, %v1148_v41  ;;  %v1156_v49 = vadd.f32 %v1155_v46, %v1031_v15 }
 0x200   : > { %v4916_v48 = vpop.f32.mrf.mxu0 }
 0x202   : > { %v1159_v50 = vpop.f32.mrf.mxu0 }
 0x203   : > { %v1160_v51 = vadd.f32 %v1159_v50, %v1031_v15 }
 0x204   : > { %v4926_v58 = vpop.f32.mrf.mxu0 }
 0x205   : > { %v4918_v52 = vpack.c.bf16 %v1160_v51, %v1156_v49 }
 0x269   : > { %v1173_v53 = vpop.permute.xlu0 %1172 }
 0x26a   : > { %4232 = vmatprep.subr.msk.bf16.mxu0 %vm1174_vm2, %v1173_v53  ;;  %v1185_v54 = vsel %vm1174_vm2, %v1173_v53, 0 }
 0x26b   : > { %4038 = vmatpush3.bf16.xpose.msra.mxu0 %v1185_v54 }
 0x26d   : > { %v1171_v56 = vpop.permute.xlu0 %1170 }
 0x26e   : > { %4233 = vmatprep.subr.msk.bf16.mxu0 %vm1174_vm2, %v1171_v56  ;;  %v1182_v57 = vsel %vm1174_vm2, %v1171_v56, 0 }
 0x273   : > { %4040 = vmatpush3.bf16.xpose.msra.mxu0 %v1182_v57 }
 0x27a   : > { %4042 = vmatmul.mubr.msk.bf16.vlgmr.msra.gmra.mxu0 %vm1174_vm2, %v4894_v32 }
 0x33a   : > { %v4043_v59 = vpop.f32.mrf.mxu0 }
 0x33b   : > { %v1243_v60 = vsel %vm1236_vm3, %v4043_v59, -inf }
 0x33c   : > { %1244 = vmax.xlane.f32.xlu0 %v1243_v60  ;;  %v1221_v61 = vpop.f32.mrf.mxu0 }
 0x33d   : > { %v1237_v62 = vsel %vm1236_vm3, %v1221_v61, -inf }
 0x33e   : > { %1238 = vmax.xlane.f32.xlu1 %v1237_v62  ;;  %v4044_v63 = vpop.f32.mrf.mxu0 }
 0x33f   : > { %v1246_v2 = vsel %vm1236_vm3, %v4044_v63, -inf }
 0x340   : > { %v1224_v0 = vpop.f32.mrf.mxu0 }
 0x341   : > { %v1240_v1 = vsel %vm1236_vm3, %v1224_v0, -inf }
 0x342   : > { %1241 = vmax.xlane.f32.xlu1 %v1240_v1 }
 0x346   : > { %1247 = vmax.xlane.f32.xlu1 %v1246_v2 }
 0x352   : > { %1342 = vrot.lane.b32.xlu0 %v4883_v21, %s4580_s19 }
 0x356   : > { %1516 = vrot.lane.b32.xlu0 %v4883_v21, %s4581_s23 }
 0x3c5   : > { %v1245_v3 = vpop.xlane.xlu0 %1244 }
 0x3c6   : > { %v1251_v4 = vsub.f32 %v4043_v59, %v1245_v3 }
 0x3c7   : > { %v1239_v5 = vpop.xlane.xlu1 %1238 }
 0x3c8   : > { %v1257_v6 = vmul.f32 1.442695, %v1251_v4  ;;  %v1249_v7 = vsub.f32 %v1221_v61, %v1239_v5 }
 0x3c9   : > { %v1343_v51 = vpop.permute.xlu0 %1342 }
 0x3ca   : > { %4386 = vpow2.f32 %v1257_v6  ;;  %v1253_v8 = vmul.f32 1.442695, %v1249_v7  ;;  %v1353_v54 = vsel %vm1174_vm2, %v1343_v51, 0 }
 0x3cb   : > { %v1242_v9 = vpop.xlane.xlu1 %1241 }
 0x3cc   : > { %4388 = vpow2.f32 %v1253_v8  ;;  %v1250_v10 = vsub.f32 %v1224_v0, %v1242_v9 }
 0x3cd   : > { %v1517_v57 = vpop.permute.xlu0 %1516 }
 0x3ce   : > { %v1255_v15 = vmul.f32 1.442695, %v1250_v10 }
 0x3cf   : > { %v1248_v13 = vpop.xlane.xlu1 %1247 }
 0x3d0   : > { %v1252_v14 = vsub.f32 %v4044_v63, %v1248_v13 }
 0x3d2   : > { %v1259_v16 = vmul.f32 1.442695, %v1252_v14 }
 0x3d4   : > { %4390 = vpow2.f32 %v1259_v16 }
 0x3d5   : > { %4392 = vpow2.f32 %v1255_v15 }
 0x3d7   : > { %v4387_v17 = vpop.eup %4386 }
 0x3d8   : > { %v1267_v18 = vsel %vm1236_vm3, %v4387_v17, 0.0 }
 0x3d9   : > { %v4389_v19 = vpop.eup %4388  ;;  %1268 = vadd.xlane.f32.xlu1 %v1267_v18 }
 0x3da   : > { %v1261_v20 = vsel %vm1236_vm3, %v4389_v19, 0.0 }
 0x3dd   : > { %1262 = vadd.xlane.f32.xlu1 %v1261_v20 }
 0x3e1   : > { %v4391_v22 = vpop.eup %4390 }
 0x3e2   : > { %v1270_v24 = vsel %vm1236_vm3, %v4391_v22, 0.0  ;;  %v4393_v25 = vpop.eup %4392 }
 0x3e3   : > { %1271 = vadd.xlane.f32.xlu1 %v1270_v24  ;;  %v1264_v27 = vsel %vm1236_vm3, %v4393_v25, 0.0 }
 0x3e7   : > { %1265 = vadd.xlane.f32.xlu1 %v1264_v27 }
 0x3f8   : > { %1344 = vrot.lane.b32.xlu1 %v4894_v32, %s4580_s19 }
 0x3fc   : > { %1338 = vrot.lane.b32.xlu1 %v4883_v21, %s4582_s29 }
 0x400   : > { %1522 = vrot.lane.b32.xlu1 %v4894_v32, %s4583_s18 }
 0x404   : > { %1340 = vrot.lane.b32.xlu1 %v4894_v32, %s4582_s29 }
 0x408   : > { %1520 = vrot.lane.b32.xlu1 %v4883_v21, %s4583_s18 }
 0x40c   : > { %1518 = vrot.lane.b32.xlu1 %v4894_v32, %s4581_s23 }
 0x462   : > { %v1269_v28 = vpop.xlane.xlu1 %1268 }
 0x466   : > { %v1263_v29 = vpop.xlane.xlu1 %1262 }
 0x46c   : > { %v1272_v30 = vpop.xlane.xlu1 %1271 }
 0x46d   : > { %4394 = vrcp.f32 %v1272_v30 }
 0x46e   : > { %4396 = vrcp.f32 %v1263_v29 }
 0x46f   : > { %4398 = vrcp.f32 %v1269_v28 }
 0x470   : > { %v1266_v31 = vpop.xlane.xlu1 %1265 }
 0x471   : > { %4400 = vrcp.f32 %v1266_v31 }
 0x474   : > { %v1345_v33 = vpop.permute.xlu1 %1344 }
 0x475   : > { %4234 = vmatprep.subr.msk.bf16.mxu1 %vm1174_vm2, %v1345_v33  ;;  %v1356_v50 = vsel %vm1174_vm2, %v1345_v33, 0 }
 0x478   : > { %v1339_v49 = vpop.permute.xlu1 %1338 }
 0x47a   : > { %v4395_v34 = vpop.eup %4394 }
 0x47b   : > { %v4397_v37 = vpop.eup %4396  ;;  %v1280_v40 = vmul.f32 %v4395_v34, %v4391_v22 }
 0x47c   : > { %v4399_v38 = vpop.eup %4398  ;;  %v1277_v41 = vmul.f32 %v4397_v37, %v4389_v19  ;;  %v1523_v53 = vpop.permute.xlu1 %1522 }
 0x47d   : > { %v1279_v43 = vmul.f32 %v4399_v38, %v4387_v17  ;;  %v1534_v59 = vsel %vm1174_vm2, %v1523_v53, 0 }
 0x47e   : > { %v4401_v39 = vpop.eup %4400 }
 0x47f   : > { %v1278_v42 = vmul.f32 %v4401_v39, %v4393_v25  ;;  %v1282_v46 = vpack.c.bf16 %v1280_v40, %v1279_v43 }
 0x480   : > { %v1341_v56 = vpop.permute.xlu1 %1340 }
 0x481   : > { %v1281_v45 = vpack.c.bf16 %v1278_v42, %v1277_v41 }
 0x483   : > { %4049 = vmatprep.mubr.msk.bf16.mxu1 %vm1236_vm3, %v1281_v45 }
 0x484   : > { %4050 = vmatmul.mubr.msk.bf16.vlgmr.msra.gmra.mxu1 %vm1236_vm3, %v1282_v46  ;;  %v1521_v60 = vpop.permute.xlu1 %1520 }
 0x485   : > { %4054 = vmatpush3.bf16.xpose.msra.mxu1 %v1356_v50  ;;  %4057 = vmatprep.mubr.msk.bf16.mxu1 %vm1174_vm2, %v1339_v49  ;;  %v1531_v61 = vsel %vm1174_vm2, %v1521_v60, 0 }
 0x486   : > { %4235 = vmatprep.subr.msk.bf16.mxu1 %vm1174_vm2, %v1343_v51 }
 0x488   : > { %v1519_v62 = vpop.permute.xlu1 %1518 }
 0x48d   : > { %4056 = vmatpush3.bf16.xpose.msra.mxu1 %v1353_v54 }
 0x48e   : > { %4236 = vmatprep.subr.msk.bf16.mxu1 %vm1174_vm2, %v1523_v53 }
 0x494   : > { %4058 = vmatmul.mubr.msk.bf16.vlgmr.msra.gmra.mxu1 %vm1174_vm2, %v1341_v56 }
 0x495   : > { %4070 = vmatpush3.bf16.xpose.msra.mxu1 %v1534_v59  ;;  %4073 = vmatprep.mubr.msk.bf16.mxu1 %vm1174_vm2, %v1517_v57 }
 0x496   : > { %4237 = vmatprep.subr.msk.bf16.mxu1 %vm1174_vm2, %v1521_v60 }
 0x49d   : > { %4072 = vmatpush3.bf16.xpose.msra.mxu1 %v1531_v61 }
 0x4a4   : > { %4074 = vmatmul.mubr.msk.bf16.vlgmr.msra.gmra.mxu1 %vm1174_vm2, %v1519_v62 }
 0x544   : > { %v4966_v63 = vpop.f32.mrf.mxu1 }
 0x546   : > { %v4968_v0 = vpop.f32.mrf.mxu1 }
 0x548   : > { %v4970_v1 = vpop.f32.mrf.mxu1 }
 0x54a   : > { %v4972_v2 = vpop.f32.mrf.mxu1 }
 0x554   : > { %v4059_v3 = vpop.f32.mrf.mxu1 }
 0x555   : > { %v1413_v8 = vsel %vm1236_vm3, %v4059_v3, -inf }
 0x556   : > { %v1392_v4 = vpop.f32.mrf.mxu1 }
 0x557   : > { %v1407_v5 = vsel %vm1236_vm3, %v1392_v4, -inf }
 0x558   : > { %1408 = vmax.xlane.f32.xlu0 %v1407_v5  ;;  %v4060_v6 = vpop.f32.mrf.mxu1 }
 0x559   : > { %v1416_v10 = vsel %vm1236_vm3, %v4060_v6, -inf }
 0x55a   : > { %v1395_v7 = vpop.f32.mrf.mxu1 }
 0x55b   : > { %v1410_v9 = vsel %vm1236_vm3, %v1395_v7, -inf }
 0x55c   : > { %1414 = vmax.xlane.f32.xlu0 %v1413_v8  ;;  %1411 = vmax.xlane.f32.xlu1 %v1410_v9 }
 0x560   : > { %1417 = vmax.xlane.f32.xlu0 %v1416_v10 }
 0x564   : > { %v4075_v13 = vpop.f32.mrf.mxu1 }
 0x565   : > { %v1591_v18 = vsel %vm1236_vm3, %v4075_v13, -inf }
 0x566   : > { %v1570_v14 = vpop.f32.mrf.mxu1 }
 0x567   : > { %v1585_v15 = vsel %vm1236_vm3, %v1570_v14, -inf }
 0x568   : > { %1586 = vmax.xlane.f32.xlu1 %v1585_v15  ;;  %v4076_v16 = vpop.f32.mrf.mxu1 }
 0x569   : > { %v1594_v20 = vsel %vm1236_vm3, %v4076_v16, -inf }
 0x56a   : > { %v1573_v17 = vpop.f32.mrf.mxu1 }
 0x56b   : > { %v1588_v19 = vsel %vm1236_vm3, %v1573_v17, -inf }
 0x56c   : > { %1592 = vmax.xlane.f32.xlu1 %v1591_v18  ;;  %1589 = vmax.xlane.f32.xlu0 %v1588_v19 }
 0x570   : > { %1595 = vmax.xlane.f32.xlu0 %v1594_v20 }
 0x57d   : > { %1457 = vrot.lane.b32.xlu1 %v4898_v35, %s4582_s29 }
 0x581   : > { %1633 = vrot.lane.b32.xlu1 %v4898_v35, %s4581_s23 }
 0x586   : > { %1455 = vrot.lane.b32.xlu0 %v4902_v36, %s4582_s29 }
 0x5e1   : > { %v1409_v22 = vpop.xlane.xlu0 %1408 }
 0x5e2   : > { %v1419_v24 = vsub.f32 %v1392_v4, %v1409_v22 }
 0x5e4   : > { %v1423_v29 = vmul.f32 1.442695, %v1419_v24 }
 0x5e5   : > { %v1415_v25 = vpop.xlane.xlu0 %1414  ;;  %v1412_v27 = vpop.xlane.xlu1 %1411 }
 0x5e6   : > { %v1421_v28 = vsub.f32 %v4059_v3, %v1415_v25  ;;  %v1420_v31 = vsub.f32 %v1395_v7, %v1412_v27 }
 0x5e8   : > { %v1427_v30 = vmul.f32 1.442695, %v1421_v28  ;;  %v1425_v37 = vmul.f32 1.442695, %v1420_v31 }
 0x5e9   : > { %v1418_v33 = vpop.xlane.xlu0 %1417 }
 0x5ea   : > { %4402 = vpow2.f32 %v1427_v30  ;;  %v1422_v34 = vsub.f32 %v4060_v6, %v1418_v33 }
 0x5eb   : > { %4404 = vpow2.f32 %v1423_v29 }
 0x5ec   : > { %v1429_v38 = vmul.f32 1.442695, %v1422_v34 }
 0x5ee   : > { %4406 = vpow2.f32 %v1429_v38 }
 0x5ef   : > { %4408 = vpow2.f32 %v1425_v37 }
 0x5f1   : > { %v1587_v39 = vpop.xlane.xlu1 %1586 }
 0x5f2   : > { %v1597_v40 = vsub.f32 %v1570_v14, %v1587_v39 }
 0x5f4   : > { %v1601_v53 = vmul.f32 1.442695, %v1597_v40 }
 0x5f5   : > { %v1590_v41 = vpop.xlane.xlu0 %1589  ;;  %v1593_v42 = vpop.xlane.xlu1 %1592 }
 0x5f6   : > { %v1599_v43 = vsub.f32 %v4075_v13, %v1593_v42  ;;  %v1598_v46 = vsub.f32 %v1573_v17, %v1590_v41 }
 0x5f7   : > { %v4988_v45 = vpop.eup %4402 }
 0x5f8   : > { %v1605_v49 = vmul.f32 1.442695, %v1599_v43  ;;  %v1437_v50 = vsel %vm1236_vm3, %v4988_v45, 0.0  ;;  %v4992_v51 = vpop.eup %4404  ;;  %v1603_v60 = vmul.f32 1.442695, %v1598_v46 }
 0x5f9   : > { %1438 = vadd.xlane.f32.xlu1 %v1437_v50  ;;  %v1596_v54 = vpop.xlane.xlu0 %1595  ;;  %v1458_v56 = vpop.permute.xlu1 %1457  ;;  %v1431_v62 = vsel %vm1236_vm3, %v4992_v51, 0.0 }
 0x5fa   : > { %v1600_v57 = vsub.f32 %v4076_v16, %v1596_v54  ;;  %4061 = vmatprep.subr.bf16.mxu0 %v1458_v56  ;;  %4410 = vpow2.f32 %v1605_v49 }
 0x5fb   : > { %v4407_v59 = vpop.eup %4406  ;;  %4062 = vmatpush3.bf16.msra.mxu0 %v1458_v56  ;;  %4412 = vpow2.f32 %v1601_v53 }
 0x5fc   : > { %v1607_v61 = vmul.f32 1.442695, %v1600_v57  ;;  %v1440_v3 = vsel %vm1236_vm3, %v4407_v59, 0.0  ;;  %v4409_v4 = vpop.eup %4408 }
 0x5fd   : > { %1432 = vadd.xlane.f32.xlu1 %v1431_v62  ;;  %1441 = vadd.xlane.f32.xlu0 %v1440_v3  ;;  %v1456_v5 = vpop.permute.xlu0 %1455  ;;  %v1634_v6 = vpop.permute.xlu1 %1633  ;;  %v1434_v7 = vsel %vm1236_vm3, %v4409_v4, 0.0  ;;  %v1162_v62 = vadd.f32 %v4926_v58, %v4890_v26 }
 0x5fe   : > { %4414 = vpow2.f32 %v1607_v61  ;;  %4063 = vmatprep.subr.bf16.mxu0 %v1456_v5  ;;  %v1158_v61 = vadd.f32 %v4916_v48, %v4890_v26 }
 0x5ff   : > { %4064 = vmatpush3.bf16.msra.mxu0 %v1456_v5  ;;  %4416 = vpow2.f32 %v1603_v60 }
 0x600   : > { %4077 = vmatprep.subr.bf16.mxu0 %v1634_v6  ;;  %v5026_v3 = vpack.c.bf16 %v1162_v62, %v1158_v61 }
 0x601   : > { %1435 = vadd.xlane.f32.xlu0 %v1434_v7 }
 0x607   : > { %v4411_v8 = vpop.eup %4410 }
 0x608   : > { %v1615_v9 = vsel %vm1236_vm3, %v4411_v8, 0.0  ;;  %v4413_v10 = vpop.eup %4412 }
 0x609   : > { %1616 = vadd.xlane.f32.xlu1 %v1615_v9  ;;  %v1609_v16 = vsel %vm1236_vm3, %v4413_v10, 0.0 }
 0x60b   : > { %v4415_v13 = vpop.eup %4414 }
 0x60c   : > { %v1618_v14 = vsel %vm1236_vm3, %v4415_v13, 0.0  ;;  %v4417_v15 = vpop.eup %4416 }
 0x60d   : > { %1619 = vadd.xlane.f32.xlu0 %v1618_v14  ;;  %1610 = vadd.xlane.f32.xlu1 %v1609_v16  ;;  %v1612_v17 = vsel %vm1236_vm3, %v4417_v15, 0.0 }
 0x611   : > { %1613 = vadd.xlane.f32.xlu0 %v1612_v17 }
 0x61e   : > { %1631 = vrot.lane.b32.xlu1 %v4902_v36, %s4581_s23 }
 0x622   : > { %1696 = vrot.lane.b32.xlu1 %v4883_v21, %s4584_s20 }
 0x626   : > { %1694 = vrot.lane.b32.xlu1 %v4894_v32, %s4585_s2 }
 0x627   : > { %1698 = vrot.lane.b32.xlu0 %v4894_v32, %s4584_s20 }
 0x62b   : > { %1692 = vrot.lane.b32.xlu0 %v4883_v21, %s4585_s2 }
 0x682   : > { %v1439_v18 = vpop.xlane.xlu1 %1438 }
 0x686   : > { %v1442_v19 = vpop.xlane.xlu0 %1441  ;;  %v1433_v20 = vpop.xlane.xlu1 %1432 }
 0x687   : > { %4418 = vrcp.f32 %v1442_v19 }
 0x688   : > { %4420 = vrcp.f32 %v1433_v20 }
 0x689   : > { %4422 = vrcp.f32 %v1439_v18 }
 0x68a   : > { %v1436_v22 = vpop.xlane.xlu0 %1435 }
 0x68b   : > { %4424 = vrcp.f32 %v1436_v22 }
 0x692   : > { %v1617_v24 = vpop.xlane.xlu1 %1616 }
 0x694   : > { %v4419_v25 = vpop.eup %4418 }
 0x695   : > { %v4421_v27 = vpop.eup %4420  ;;  %v1450_v32 = vmul.f32 %v4419_v25, %v4407_v59 }
 0x696   : > { %v1620_v28 = vpop.xlane.xlu0 %1619  ;;  %v4423_v29 = vpop.eup %4422  ;;  %v1447_v21 = vmul.f32 %v4421_v27, %v4992_v51 }
 0x697   : > { %v1611_v30 = vpop.xlane.xlu1 %1610  ;;  %4426 = vrcp.f32 %v1620_v28  ;;  %v1449_v37 = vmul.f32 %v4423_v29, %v4988_v45 }
 0x698   : > { %v4425_v31 = vpop.eup %4424  ;;  %4428 = vrcp.f32 %v1611_v30 }
 0x699   : > { %v1448_v33 = vmul.f32 %v4425_v31, %v4409_v4  ;;  %4430 = vrcp.f32 %v1617_v24  ;;  %v1452_v39 = vpack.c.bf16 %v1450_v32, %v1449_v37 }
 0x69a   : > { %v1614_v34 = vpop.xlane.xlu0 %1613 }
 0x69b   : > { %4432 = vrcp.f32 %v1614_v34  ;;  %v1451_v38 = vpack.c.bf16 %v1448_v33, %v1447_v21  ;;  %v1632_v40 = vpop.permute.xlu1 %1631 }
 0x69d   : > { %4065 = vmatprep.mubr.msk.bf16.mxu0 %vm1236_vm3, %v1451_v38 }
 0x69e   : > { %4066 = vmatmul.mubr.msk.bf16.vlgmr.msra.gmra.mxu0 %vm1236_vm3, %v1452_v39  ;;  %v1699_v41 = vpop.permute.xlu0 %1698 }
 0x69f   : > { %4078 = vmatpush3.bf16.msra.mxu0 %v1634_v6  ;;  %v1710_v59 = vsel %vm1174_vm2, %v1699_v41, 0  ;;  %v1697_v60 = vpop.permute.xlu1 %1696 }
 0x6a0   : > { %4079 = vmatprep.subr.bf16.mxu0 %v1632_v40  ;;  %v1707_v4 = vsel %vm1174_vm2, %v1697_v60, 0 }
 0x6a2   : > { %v1693_v57 = vpop.permute.xlu0 %1692 }
 0x6a3   : > { %4080 = vmatpush3.bf16.msra.mxu0 %v1632_v40  ;;  %v1695_v5 = vpop.permute.xlu1 %1694 }
 0x6a4   : > { %4238 = vmatprep.subr.msk.bf16.mxu0 %vm1174_vm2, %v1699_v41  ;;  %v4427_v42 = vpop.eup %4426 }
 0x6a5   : > { %v4429_v43 = vpop.eup %4428  ;;  %v1628_v50 = vmul.f32 %v4427_v42, %v4415_v13 }
 0x6a6   : > { %v4431_v46 = vpop.eup %4430  ;;  %v1625_v45 = vmul.f32 %v4429_v43, %v4413_v10 }
 0x6a7   : > { %v1627_v53 = vmul.f32 %v4431_v46, %v4411_v8 }
 0x6a8   : > { %v4433_v49 = vpop.eup %4432 }
 0x6a9   : > { %v1626_v51 = vmul.f32 %v4433_v49, %v4417_v15  ;;  %v1630_v56 = vpack.c.bf16 %v1628_v50, %v1627_v53 }
 0x6ab   : > { %v1629_v54 = vpack.c.bf16 %v1626_v51, %v1625_v45 }
 0x6ad   : > { %4081 = vmatprep.mubr.msk.bf16.mxu0 %vm1236_vm3, %v1629_v54 }
 0x6ae   : > { %4082 = vmatmul.mubr.msk.bf16.vlgmr.msra.gmra.mxu0 %vm1236_vm3, %v1630_v56 }
 0x6af   : > { %4086 = vmatpush3.bf16.xpose.msra.mxu0 %v1710_v59  ;;  %4089 = vmatprep.mubr.msk.bf16.mxu0 %vm1174_vm2, %v1693_v57 }
 0x6b0   : > { %4239 = vmatprep.subr.msk.bf16.mxu0 %vm1174_vm2, %v1697_v60 }
 0x6b7   : > { %4088 = vmatpush3.bf16.xpose.msra.mxu0 %v1707_v4 }
 0x6b8   : > { %4109 = vmatprep.subr.bf16.mxu0 %v5026_v3 }
 0x6be   : > { %4090 = vmatmul.mubr.msk.bf16.vlgmr.msra.gmra.mxu0 %vm1174_vm2, %v1695_v5 }
 0x6bf   : > { %4110 = vmatpush3.bf16.msra.mxu0 %v5026_v3 }
 0x6c0   : > { %4111 = vmatprep.subr.bf16.mxu0 %v4914_v47 }
 0x6c3   : > { %4112 = vmatpush3.bf16.msra.mxu0 %v4914_v47 }
 0x75e   : > { %v5034_v48 = vpop.f32.mrf.mxu0 }
 0x760   : > { %v5036_v6 = vpop.f32.mrf.mxu0 }
 0x762   : > { %v5038_v26 = vpop.f32.mrf.mxu0 }
 0x763   : > { %v4287_v58 = vpack.i.bf16 %v5038_v26, %v5034_v48 }
 0x764   : > { %v5042_v7 = vpop.f32.mrf.mxu0 }
 0x765   : > { %v4282_v8 = vpack.i.bf16 %v5042_v7, %v5036_v6 }
 0x76e   : > { %v5046_v9 = vpop.f32.mrf.mxu0 }
 0x770   : > { %v5048_v10 = vpop.f32.mrf.mxu0 }
 0x772   : > { %v5050_v13 = vpop.f32.mrf.mxu0 }
 0x773   : > { %v4297_v14 = vpack.i.bf16 %v5050_v13, %v5046_v9 }
 0x774   : > { %v5054_v15 = vpop.f32.mrf.mxu0 }
 0x775   : > { %v4292_v16 = vpack.i.bf16 %v5054_v15, %v5048_v10 }
 0x77e   : > { %v4091_v17 = vpop.f32.mrf.mxu0 }
 0x77f   : > { %v1767_v24 = vsel %vm1236_vm3, %v4091_v17, -inf }
 0x780   : > { %v1746_v18 = vpop.f32.mrf.mxu0 }
 0x781   : > { %v1761_v19 = vsel %vm1236_vm3, %v1746_v18, -inf }
 0x782   : > { %1762 = vmax.xlane.f32.xlu0 %v1761_v19  ;;  %v4092_v20 = vpop.f32.mrf.mxu0 }
 0x783   : > { %v1770_v27 = vsel %vm1236_vm3, %v4092_v20, -inf }
 0x784   : > { %v1749_v22 = vpop.f32.mrf.mxu0 }
 0x785   : > { %v1764_v25 = vsel %vm1236_vm3, %v1749_v22, -inf }
 0x786   : > { %1768 = vmax.xlane.f32.xlu0 %v1767_v24  ;;  %1765 = vmax.xlane.f32.xlu1 %v1764_v25 }
 0x78a   : > { %1771 = vmax.xlane.f32.xlu0 %v1770_v27 }
 0x797   : > { %1809 = vrot.lane.b32.xlu1 %v4898_v35, %s4585_s2 }
 0x80b   : > { %v1763_v28 = vpop.xlane.xlu0 %1762 }
 0x80c   : > { %v1773_v29 = vsub.f32 %v1746_v18, %v1763_v28 }
 0x80e   : > { %v1777_v21 = vmul.f32 1.442695, %v1773_v29 }
 0x80f   : > { %v1769_v30 = vpop.xlane.xlu0 %1768  ;;  %v1766_v31 = vpop.xlane.xlu1 %1765 }
 0x810   : > { %v1775_v32 = vsub.f32 %v4091_v17, %v1769_v30  ;;  %v1774_v34 = vsub.f32 %v1749_v22, %v1766_v31 }
 0x812   : > { %v1781_v33 = vmul.f32 1.442695, %v1775_v32  ;;  %v1779_v40 = vmul.f32 1.442695, %v1774_v34 }
 0x813   : > { %v1772_v37 = vpop.xlane.xlu0 %1771  ;;  %v1810_v38 = vpop.permute.xlu1 %1809 }
 0x814   : > { %4434 = vpow2.f32 %v1781_v33  ;;  %v1776_v39 = vsub.f32 %v4092_v20, %v1772_v37  ;;  %4093 = vmatprep.subr.bf16.mxu1 %v1810_v38 }
 0x815   : > { %4094 = vmatpush3.bf16.msra.mxu1 %v1810_v38  ;;  %4436 = vpow2.f32 %v1777_v21 }
 0x816   : > { %v1783_v41 = vmul.f32 1.442695, %v1776_v39 }
 0x818   : > { %4438 = vpow2.f32 %v1783_v41 }
 0x819   : > { %4440 = vpow2.f32 %v1779_v40 }
 0x821   : > { %v4435_v35 = vpop.eup %4434 }
 0x822   : > { %v1791_v42 = vsel %vm1236_vm3, %v4435_v35, 0.0  ;;  %v4437_v43 = vpop.eup %4436 }
 0x823   : > { %1792 = vadd.xlane.f32.xlu1 %v1791_v42  ;;  %v1785_v50 = vsel %vm1236_vm3, %v4437_v43, 0.0 }
 0x825   : > { %v4439_v46 = vpop.eup %4438 }
 0x826   : > { %v1794_v49 = vsel %vm1236_vm3, %v4439_v46, 0.0  ;;  %v4441_v45 = vpop.eup %4440 }
 0x827   : > { %1795 = vadd.xlane.f32.xlu0 %v1794_v49  ;;  %1786 = vadd.xlane.f32.xlu1 %v1785_v50  ;;  %v1788_v51 = vsel %vm1236_vm3, %v4441_v45, 0.0 }
 0x82b   : > { %1789 = vadd.xlane.f32.xlu0 %v1788_v51 }
 0x838   : > { %1937 = vrot.lane.b32.xlu1 %v4918_v52, %s4579_s22 }
 0x83c   : > { %1935 = vrot.lane.b32.xlu1 %v4911_v44, %s4579_s22  ;;  %s5649_s22 = scalar_lea.vmem %s5608_s8, %s4705_s0 }
 0x841   : > { %1807 = vrot.lane.b32.xlu0 %v4902_v36, %s4585_s2 }
 0x8ac   : > { %v1793_v53 = vpop.xlane.xlu1 %1792 }
 0x8b0   : > { %v1796_v54 = vpop.xlane.xlu0 %1795  ;;  %v1787_v56 = vpop.xlane.xlu1 %1786 }
 0x8b1   : > { %4442 = vrcp.f32 %v1796_v54 }
 0x8b2   : > { %4444 = vrcp.f32 %v1787_v56 }
 0x8b3   : > { %4446 = vrcp.f32 %v1793_v53 }
 0x8b4   : > { %v1790_v57 = vpop.xlane.xlu0 %1789  ;;  %v1938_v60 = vpop.permute.xlu1 %1937 }
 0x8b5   : > { %4448 = vrcp.f32 %v1790_v57  ;;  %v1949_v24 = vsel %vm1174_vm2, %v1938_v60, 0 }
 0x8b8   : > { %v1808_v59 = vpop.permute.xlu0 %1807  ;;  %v1936_v25 = vpop.permute.xlu1 %1935 }
 0x8b9   : > { %4095 = vmatprep.subr.bf16.mxu1 %v1808_v59  ;;  %v1946_v27 = vsel %vm1174_vm2, %v1936_v25, 0 }
 0x8ba   : > { %4096 = vmatpush3.bf16.msra.mxu1 %v1808_v59 }
 0x8bb   : > { %4240 = vmatprep.subr.msk.bf16.mxu1 %vm1174_vm2, %v1938_v60 }
 0x8be   : > { %v4443_v61 = vpop.eup %4442 }
 0x8bf   : > { %v4445_v62 = vpop.eup %4444  ;;  %v1804_v17 = vmul.f32 %v4443_v61, %v4439_v46 }
 0x8c0   : > { %v4447_v4 = vpop.eup %4446  ;;  %v1801_v36 = vmul.f32 %v4445_v62, %v4437_v43 }
 0x8c1   : > { %v1803_v19 = vmul.f32 %v4447_v4, %v4435_v35 }
 0x8c2   : > { %v4449_v5 = vpop.eup %4448 }
 0x8c3   : > { %v1802_v18 = vmul.f32 %v4449_v5, %v4441_v45  ;;  %v1806_v22 = vpack.c.bf16 %v1804_v17, %v1803_v19 }
 0x8c5   : > { %v1805_v20 = vpack.c.bf16 %v1802_v18, %v1801_v36 }
 0x8c7   : > { %4097 = vmatprep.mubr.msk.bf16.mxu1 %vm1236_vm3, %v1805_v20 }
 0x8c8   : > { %4098 = vmatmul.mubr.msk.bf16.vlgmr.msra.gmra.mxu1 %vm1236_vm3, %v1806_v22 }
 0x8c9   : > { %4102 = vmatpush3.bf16.xpose.msra.mxu1 %v1949_v24  ;;  %4105 = vmatprep.mubr.msk.bf16.mxu1 %vm1174_vm2, %v4911_v44 }
 0x8ca   : > { %4241 = vmatprep.subr.msk.bf16.mxu1 %vm1174_vm2, %v1936_v25 }
 0x8d1   : > { %4104 = vmatpush3.bf16.xpose.msra.mxu1 %v1946_v27 }
 0x8d8   : > { %4106 = vmatmul.mubr.msk.bf16.vlgmr.msra.gmra.mxu1 %vm1174_vm2, %v4918_v52 }
 0x988   : > { %v5084_v28 = vpop.f32.mrf.mxu1 }
 0x98a   : > { %v5086_v29 = vpop.f32.mrf.mxu1 }
 0x98c   : > { %v5088_v30 = vpop.f32.mrf.mxu1 }
 0x98d   : > { %v4307_v31 = vpack.i.bf16 %v5088_v30, %v5084_v28 }
 0x98e   : > { %v5092_v32 = vpop.f32.mrf.mxu1 }
 0x98f   : > { %v4302_v21 = vpack.i.bf16 %v5092_v32, %v5086_v29 }
 0x998   : > { %v4107_v33 = vpop.f32.mrf.mxu1 }
 0x999   : > { %v2006_v40 = vsel %vm1236_vm3, %v4107_v33, -inf }
 0x99a   : > { %v1985_v34 = vpop.f32.mrf.mxu1 }
 0x99b   : > { %v2000_v37 = vsel %vm1236_vm3, %v1985_v34, -inf }
 0x99c   : > { %2001 = vmax.xlane.f32.xlu0 %v2000_v37  ;;  %v4108_v38 = vpop.f32.mrf.mxu1 }
 0x99d   : > { %v2009_v35 = vsel %vm1236_vm3, %v4108_v38, -inf }
 0x99e   : > { %v1988_v39 = vpop.f32.mrf.mxu1 }
 0x99f   : > { %v2003_v41 = vsel %vm1236_vm3, %v1988_v39, -inf }
 0x9a0   : > { %2007 = vmax.xlane.f32.xlu0 %v2006_v40  ;;  %2004 = vmax.xlane.f32.xlu1 %v2003_v41 }
 0x9a4   : > { %2010 = vmax.xlane.f32.xlu0 %v2009_v35 }
 0xa25   : > { %v2002_v42 = vpop.xlane.xlu0 %2001 }
 0xa26   : > { %v2012_v43 = vsub.f32 %v1985_v34, %v2002_v42 }
 0xa28   : > { %v2016_v51 = vmul.f32 1.442695, %v2012_v43 }
 0xa29   : > { %v2008_v46 = vpop.xlane.xlu0 %2007  ;;  %v2005_v49 = vpop.xlane.xlu1 %2004 }
 0xa2a   : > { %v2014_v50 = vsub.f32 %v4107_v33, %v2008_v46  ;;  %v2013_v45 = vsub.f32 %v1988_v39, %v2005_v49 }
 0xa2c   : > { %v2020_v53 = vmul.f32 1.442695, %v2014_v50  ;;  %v2018_v54 = vmul.f32 1.442695, %v2013_v45 }
 0xa2d   : > { %v2011_v56 = vpop.xlane.xlu0 %2010 }
 0xa2e   : > { %4450 = vpow2.f32 %v2020_v53  ;;  %v2015_v57 = vsub.f32 %v4108_v38, %v2011_v56 }
 0xa2f   : > { %4452 = vpow2.f32 %v2018_v54 }
 0xa30   : > { %4454 = vpow2.f32 %v2016_v51  ;;  %v2022_v59 = vmul.f32 1.442695, %v2015_v57 }
 0xa32   : > { %4456 = vpow2.f32 %v2022_v59 }
 0xa3b   : > { %v4451_v60 = vpop.eup %4450 }
 0xa3c   : > { %v4453_v61 = vpop.eup %4452  ;;  %v2030_v62 = vsel %vm1236_vm3, %v4451_v60, 0.0 }
 0xa3d   : > { %v4455_v4 = vpop.eup %4454  ;;  %2031 = vadd.xlane.f32.xlu1 %v2030_v62  ;;  %v2027_v5 = vsel %vm1236_vm3, %v4453_v61, 0.0 }
 0xa3e   : > { %2028 = vadd.xlane.f32.xlu0 %v2027_v5  ;;  %v2024_v36 = vsel %vm1236_vm3, %v4455_v4, 0.0 }
 0xa3f   : > { %v4457_v17 = vpop.eup %4456 }
 0xa40   : > { %v2033_v18 = vsel %vm1236_vm3, %v4457_v17, 0.0 }
 0xa41   : > { %2025 = vadd.xlane.f32.xlu1 %v2024_v36 }
 0xa42   : > { %2034 = vadd.xlane.f32.xlu0 %v2033_v18 }
 0xa52   : > { %2107 = vrot.lane.b32.xlu1 %v4918_v52, %s4580_s19 }
 0xa56   : > { %2101 = vrot.lane.b32.xlu1 %v4911_v44, %s4582_s29 }
 0xa58   : > { %2105 = vrot.lane.b32.xlu0 %v4911_v44, %s4580_s19 }
 0xa5a   : > { %2103 = vrot.lane.b32.xlu1 %v4918_v52, %s4582_s29 }
 0xac6   : > { %v2032_v19 = vpop.xlane.xlu1 %2031 }
 0xac7   : > { %v2029_v20 = vpop.xlane.xlu0 %2028 }
 0xac8   : > { %4458 = vrcp.f32 %v2029_v20 }
 0xac9   : > { %4460 = vrcp.f32 %v2032_v19 }
 0xaca   : > { %v2026_v22 = vpop.xlane.xlu1 %2025 }
 0xacb   : > { %v2035_v24 = vpop.xlane.xlu0 %2034  ;;  %4462 = vrcp.f32 %v2026_v22 }
 0xacc   : > { %4464 = vrcp.f32 %v2035_v24 }
 0xace   : > { %v2108_v25 = vpop.permute.xlu1 %2107 }
 0xacf   : > { %4242 = vmatprep.subr.msk.bf16.mxu0 %vm1174_vm2, %v2108_v25  ;;  %v2119_v43 = vsel %vm1174_vm2, %v2108_v25, 0  ;;  %v2106_v49 = vpop.permute.xlu0 %2105 }
 0xad0   : > { %v2116_v50 = vsel %vm1174_vm2, %v2106_v49, 0 }
 0xad2   : > { %v2102_v46 = vpop.permute.xlu1 %2101 }
 0xad5   : > { %v4459_v27 = vpop.eup %4458 }
 0xad6   : > { %v4461_v33 = vpop.eup %4460  ;;  %v2041_v39 = vmul.f32 %v4459_v27, %v4453_v61  ;;  %v2104_v45 = vpop.permute.xlu1 %2103 }
 0xad7   : > { %v2042_v40 = vmul.f32 %v4461_v33, %v4451_v60 }
 0xad8   : > { %v4463_v34 = vpop.eup %4462 }
 0xad9   : > { %v4465_v37 = vpop.eup %4464  ;;  %v2040_v38 = vmul.f32 %v4463_v34, %v4455_v4 }
 0xada   : > { %v2043_v41 = vmul.f32 %v4465_v37, %v4457_v17 }
 0xadb   : > { %v2044_v35 = vpack.c.bf16 %v2041_v39, %v2040_v38 }
 0xadc   : > { %v2045_v42 = vpack.c.bf16 %v2043_v41, %v2042_v40 }
 0xadd   : > { %4113 = vmatprep.mubr.msk.bf16.mxu0 %vm1236_vm3, %v2044_v35 }
 0xade   : > { %4114 = vmatmul.mubr.msk.bf16.vlgmr.msra.gmra.mxu0 %vm1236_vm3, %v2045_v42 }
 0xadf   : > { %4118 = vmatpush3.bf16.xpose.msra.mxu0 %v2119_v43  ;;  %4121 = vmatprep.mubr.msk.bf16.mxu0 %vm1174_vm2, %v2102_v46 }
 0xae0   : > { %4243 = vmatprep.subr.msk.bf16.mxu0 %vm1174_vm2, %v2106_v49 }
 0xae7   : > { %4120 = vmatpush3.bf16.xpose.msra.mxu0 %v2116_v50 }
 0xaee   : > { %4122 = vmatmul.mubr.msk.bf16.vlgmr.msra.gmra.mxu0 %vm1174_vm2, %v2104_v45 }
 0xb9e   : > { %v5120_v51 = vpop.f32.mrf.mxu0 }
 0xba0   : > { %v5122_v53 = vpop.f32.mrf.mxu0 }
 0xba2   : > { %v5124_v54 = vpop.f32.mrf.mxu0 }
 0xba4   : > { %v5126_v56 = vpop.f32.mrf.mxu0 }
 0xbae   : > { %v4123_v57 = vpop.f32.mrf.mxu0 }
 0xbaf   : > { %v2176_v4 = vsel %vm1236_vm3, %v4123_v57, -inf }
 0xbb0   : > { %v2155_v59 = vpop.f32.mrf.mxu0 }
 0xbb1   : > { %v2170_v60 = vsel %vm1236_vm3, %v2155_v59, -inf }
 0xbb2   : > { %2171 = vmax.xlane.f32.xlu0 %v2170_v60  ;;  %v4124_v61 = vpop.f32.mrf.mxu0 }
 0xbb3   : > { %v2179_v17 = vsel %vm1236_vm3, %v4124_v61, -inf }
 0xbb4   : > { %v2158_v62 = vpop.f32.mrf.mxu0 }
 0xbb5   : > { %v2173_v5 = vsel %vm1236_vm3, %v2158_v62, -inf }
 0xbb6   : > { %2177 = vmax.xlane.f32.xlu0 %v2176_v4  ;;  %2174 = vmax.xlane.f32.xlu1 %v2173_v5 }
 0xbba   : > { %2180 = vmax.xlane.f32.xlu0 %v2179_v17 }
 0xbc7   : > { %2220 = vrot.lane.b32.xlu1 %v5026_v3, %s4582_s29 }
 0xc3b   : > { %v2172_v36 = vpop.xlane.xlu0 %2171 }
 0xc3c   : > { %v2182_v18 = vsub.f32 %v2155_v59, %v2172_v36 }
 0xc3e   : > { %v2186_v24 = vmul.f32 1.442695, %v2182_v18 }
 0xc3f   : > { %v2178_v19 = vpop.xlane.xlu0 %2177  ;;  %v2175_v20 = vpop.xlane.xlu1 %2174 }
 0xc40   : > { %v2184_v22 = vsub.f32 %v4123_v57, %v2178_v19  ;;  %v2183_v27 = vsub.f32 %v2158_v62, %v2175_v20 }
 0xc42   : > { %v2190_v25 = vmul.f32 1.442695, %v2184_v22  ;;  %v2188_v38 = vmul.f32 1.442695, %v2183_v27 }
 0xc43   : > { %v2181_v33 = vpop.xlane.xlu0 %2180  ;;  %v2221_v34 = vpop.permute.xlu1 %2220 }
 0xc44   : > { %4466 = vpow2.f32 %v2190_v25  ;;  %v2185_v37 = vsub.f32 %v4124_v61, %v2181_v33  ;;  %4125 = vmatprep.subr.bf16.mxu1 %v2221_v34 }
 0xc45   : > { %4126 = vmatpush3.bf16.msra.mxu1 %v2221_v34  ;;  %4468 = vpow2.f32 %v2186_v24 }
 0xc46   : > { %v2192_v39 = vmul.f32 1.442695, %v2185_v37 }
 0xc48   : > { %4470 = vpow2.f32 %v2192_v39 }
 0xc49   : > { %4472 = vpow2.f32 %v2188_v38 }
 0xc51   : > { %v4467_v40 = vpop.eup %4466 }
 0xc52   : > { %v2200_v41 = vsel %vm1236_vm3, %v4467_v40, 0.0  ;;  %v4469_v35 = vpop.eup %4468 }
 0xc53   : > { %2201 = vadd.xlane.f32.xlu1 %v2200_v41  ;;  %v2194_v46 = vsel %vm1236_vm3, %v4469_v35, 0.0 }
 0xc55   : > { %v4471_v42 = vpop.eup %4470 }
 0xc56   : > { %v2203_v43 = vsel %vm1236_vm3, %v4471_v42, 0.0  ;;  %v4473_v49 = vpop.eup %4472 }
 0xc57   : > { %2204 = vadd.xlane.f32.xlu0 %v2203_v43  ;;  %2195 = vadd.xlane.f32.xlu1 %v2194_v46  ;;  %v2197_v50 = vsel %vm1236_vm3, %v4473_v49, 0.0 }
 0xc5b   : > { %2198 = vadd.xlane.f32.xlu0 %v2197_v50 }
 0xc68   : > { %2285 = vrot.lane.b32.xlu1 %v4918_v52, %s4583_s18 }
 0xc6c   : > { %2283 = vrot.lane.b32.xlu1 %v4911_v44, %s4583_s18 }
 0xc70   : > { %2281 = vrot.lane.b32.xlu1 %v4918_v52, %s4581_s23 }
 0xc71   : > { %2218 = vrot.lane.b32.xlu0 %v4914_v47, %s4582_s29  ;;  %s5650_s29 = scalar_lea.vmem %s5609_s9, %s4705_s0  ;;  %s5652_s0 = sld [smem:[#allocation15_spill]] (!%p3838_p6) }
 0xc75   : > { %2279 = vrot.lane.b32.xlu0 %v4911_v44, %s4581_s23 }
 0xcdc   : > { %v2202_v45 = vpop.xlane.xlu1 %2201 }
 0xce0   : > { %v2205_v57 = vpop.xlane.xlu0 %2204  ;;  %v2196_v59 = vpop.xlane.xlu1 %2195 }
 0xce1   : > { %4474 = vrcp.f32 %v2205_v57 }
 0xce2   : > { %4476 = vrcp.f32 %v2196_v59 }
 0xce3   : > { %4478 = vrcp.f32 %v2202_v45 }
 0xce4   : > { %v2199_v60 = vpop.xlane.xlu0 %2198  ;;  %v2286_v62 = vpop.permute.xlu1 %2285 }
 0xce5   : > { %4480 = vrcp.f32 %v2199_v60  ;;  %v2297_v27 = vsel %vm1174_vm2, %v2286_v62, 0 }
 0xce8   : > { %v2219_v61 = vpop.permute.xlu0 %2218  ;;  %v2284_v34 = vpop.permute.xlu1 %2283 }
 0xce9   : > { %4127 = vmatprep.subr.bf16.mxu1 %v2219_v61  ;;  %v2294_v37 = vsel %vm1174_vm2, %v2284_v34, 0 }
 0xcea   : > { %4128 = vmatpush3.bf16.msra.mxu1 %v2219_v61 }
 0xceb   : > { %4244 = vmatprep.subr.msk.bf16.mxu1 %vm1174_vm2, %v2286_v62 }
 0xcec   : > { %v2280_v33 = vpop.permute.xlu0 %2279  ;;  %v2282_v38 = vpop.permute.xlu1 %2281 }
 0xcee   : > { %v4475_v4 = vpop.eup %4474 }
 0xcef   : > { %v4477_v5 = vpop.eup %4476  ;;  %v2213_v18 = vmul.f32 %v4475_v4, %v4471_v42 }
 0xcf0   : > { %v4479_v17 = vpop.eup %4478  ;;  %v2210_v19 = vmul.f32 %v4477_v5, %v4469_v35 }
 0xcf1   : > { %v2212_v22 = vmul.f32 %v4479_v17, %v4467_v40 }
 0xcf2   : > { %v4481_v36 = vpop.eup %4480 }
 0xcf3   : > { %v2211_v20 = vmul.f32 %v4481_v36, %v4473_v49  ;;  %v2215_v25 = vpack.c.bf16 %v2213_v18, %v2212_v22 }
 0xcf5   : > { %v2214_v24 = vpack.c.bf16 %v2211_v20, %v2210_v19 }
 0xcf7   : > { %4129 = vmatprep.mubr.msk.bf16.mxu1 %vm1236_vm3, %v2214_v24 }
 0xcf8   : > { %4130 = vmatmul.mubr.msk.bf16.vlgmr.msra.gmra.mxu1 %vm1236_vm3, %v2215_v25 }
 0xcf9   : > { %4134 = vmatpush3.bf16.xpose.msra.mxu1 %v2297_v27  ;;  %4137 = vmatprep.mubr.msk.bf16.mxu1 %vm1174_vm2, %v2280_v33 }
 0xcfa   : > { %4245 = vmatprep.subr.msk.bf16.mxu1 %vm1174_vm2, %v2284_v34 }
 0xd01   : > { %4136 = vmatpush3.bf16.xpose.msra.mxu1 %v2294_v37 }
 0xd08   : > { %4138 = vmatmul.mubr.msk.bf16.vlgmr.msra.gmra.mxu1 %vm1174_vm2, %v2282_v38 }
 0xdb8   : > { %v5156_v39 = vpop.f32.mrf.mxu1 }
 0xdba   : > { %v5158_v40 = vpop.f32.mrf.mxu1 }
 0xdbc   : > { %v5160_v41 = vpop.f32.mrf.mxu1 }
 0xdbd   : > { %v4317_v35 = vpack.i.bf16 %v5160_v41, %v5156_v39 }
 0xdbe   : > { %v5164_v42 = vpop.f32.mrf.mxu1 }
 0xdbf   : > { %v4312_v43 = vpack.i.bf16 %v5164_v42, %v5158_v40 }
 0xdc8   : > { %v4139_v46 = vpop.f32.mrf.mxu1 }
 0xdc9   : > { %v2354_v59 = vsel %vm1236_vm3, %v4139_v46, -inf }
 0xdca   : > { %v2333_v49 = vpop.f32.mrf.mxu1 }
 0xdcb   : > { %v2348_v50 = vsel %vm1236_vm3, %v2333_v49, -inf }
 0xdcc   : > { %2349 = vmax.xlane.f32.xlu0 %v2348_v50  ;;  %v4140_v45 = vpop.f32.mrf.mxu1 }
 0xdcd   : > { %v2357_v61 = vsel %vm1236_vm3, %v4140_v45, -inf }
 0xdce   : > { %v2336_v57 = vpop.f32.mrf.mxu1 }
 0xdcf   : > { %v2351_v60 = vsel %vm1236_vm3, %v2336_v57, -inf }
 0xdd0   : > { %2355 = vmax.xlane.f32.xlu0 %v2354_v59  ;;  %2352 = vmax.xlane.f32.xlu1 %v2351_v60 }
 0xdd4   : > { %2358 = vmax.xlane.f32.xlu0 %v2357_v61 }
 0xde1   : > { %2396 = vrot.lane.b32.xlu1 %v5026_v3, %s4581_s23 }
 0xe55   : > { %v2350_v62 = vpop.xlane.xlu0 %2349 }
 0xe56   : > { %v2360_v4 = vsub.f32 %v2333_v49, %v2350_v62 }
 0xe58   : > { %v2364_v18 = vmul.f32 1.442695, %v2360_v4 }
 0xe59   : > { %v2356_v5 = vpop.xlane.xlu0 %2355  ;;  %v2353_v17 = vpop.xlane.xlu1 %2352 }
 0xe5a   : > { %v2362_v36 = vsub.f32 %v4139_v46, %v2356_v5  ;;  %v2361_v20 = vsub.f32 %v2336_v57, %v2353_v17 }
 0xe5c   : > { %v2368_v19 = vmul.f32 1.442695, %v2362_v36  ;;  %v2366_v27 = vmul.f32 1.442695, %v2361_v20 }
 0xe5d   : > { %v2359_v22 = vpop.xlane.xlu0 %2358  ;;  %v2397_v24 = vpop.permute.xlu1 %2396 }
 0xe5e   : > { %4482 = vpow2.f32 %v2368_v19  ;;  %v2363_v25 = vsub.f32 %v4140_v45, %v2359_v22  ;;  %4141 = vmatprep.subr.bf16.mxu0 %v2397_v24 }
 0xe5f   : > { %4142 = vmatpush3.bf16.msra.mxu0 %v2397_v24  ;;  %4484 = vpow2.f32 %v2364_v18 }
 0xe60   : > { %v2370_v33 = vmul.f32 1.442695, %v2363_v25 }
 0xe62   : > { %4486 = vpow2.f32 %v2370_v33 }
 0xe63   : > { %4488 = vpow2.f32 %v2366_v27 }
 0xe6b   : > { %v4483_v34 = vpop.eup %4482 }
 0xe6c   : > { %v2378_v37 = vsel %vm1236_vm3, %v4483_v34, 0.0  ;;  %v4485_v38 = vpop.eup %4484 }
 0xe6d   : > { %2379 = vadd.xlane.f32.xlu1 %v2378_v37  ;;  %v2372_v50 = vsel %vm1236_vm3, %v4485_v38, 0.0 }
 0xe6f   : > { %v4487_v46 = vpop.eup %4486 }
 0xe70   : > { %v2381_v49 = vsel %vm1236_vm3, %v4487_v46, 0.0  ;;  %v4489_v57 = vpop.eup %4488 }
 0xe71   : > { %2382 = vadd.xlane.f32.xlu0 %v2381_v49  ;;  %2373 = vadd.xlane.f32.xlu1 %v2372_v50  ;;  %v2375_v45 = vsel %vm1236_vm3, %v4489_v57, 0.0 }
 0xe75   : > { %2376 = vadd.xlane.f32.xlu0 %v2375_v45 }
 0xe82   : > { %2461 = vrot.lane.b32.xlu1 %v4918_v52, %s4584_s20 }
 0xe86   : > { %2459 = vrot.lane.b32.xlu1 %v4911_v44, %s4584_s20 }
 0xe8a   : > { %2457 = vrot.lane.b32.xlu1 %v4918_v52, %s4585_s2 }
 0xe8b   : > { %2394 = vrot.lane.b32.xlu0 %v4914_v47, %s4581_s23 }
 0xe8f   : > { %2455 = vrot.lane.b32.xlu0 %v4911_v44, %s4585_s2 }
 0xef6   : > { %v2380_v59 = vpop.xlane.xlu1 %2379 }
 0xefa   : > { %v2383_v60 = vpop.xlane.xlu0 %2382  ;;  %v2374_v61 = vpop.xlane.xlu1 %2373 }
 0xefb   : > { %4490 = vrcp.f32 %v2383_v60 }
 0xefc   : > { %4492 = vrcp.f32 %v2374_v61 }
 0xefd   : > { %4494 = vrcp.f32 %v2380_v59 }
 0xefe   : > { %v2377_v62 = vpop.xlane.xlu0 %2376  ;;  %v2462_v5 = vpop.permute.xlu1 %2461 }
 0xeff   : > { %4496 = vrcp.f32 %v2377_v62  ;;  %v2473_v27 = vsel %vm1174_vm2, %v2462_v5, 0 }
 0xf02   : > { %v2395_v4 = vpop.permute.xlu0 %2394  ;;  %v2460_v37 = vpop.permute.xlu1 %2459 }
 0xf03   : > { %4143 = vmatprep.subr.bf16.mxu0 %v2395_v4 }
 0xf04   : > { %4144 = vmatpush3.bf16.msra.mxu0 %v2395_v4 }
 0xf05   : > { %4246 = vmatprep.subr.msk.bf16.mxu0 %vm1174_vm2, %v2462_v5 }
 0xf06   : > { %v2456_v33 = vpop.permute.xlu0 %2455 }
 0xf08   : > { %v4491_v52 = vpop.eup %4490 }
 0xf09   : > { %v4493_v17 = vpop.eup %4492  ;;  %v2391_v19 = vmul.f32 %v4491_v52, %v4487_v46  ;;  %v2470_v46 = vsel %vm1174_vm2, %v2460_v37, 0 }
 0xf0a   : > { %v4495_v36 = vpop.eup %4494  ;;  %v2388_v44 = vmul.f32 %v4493_v17, %v4485_v38  ;;  %v2458_v38 = vpop.permute.xlu1 %2457 }
 0xf0b   : > { %v2390_v22 = vmul.f32 %v4495_v36, %v4483_v34 }
 0xf0c   : > { %v4497_v18 = vpop.eup %4496 }
 0xf0d   : > { %v2389_v20 = vmul.f32 %v4497_v18, %v4489_v57  ;;  %v2393_v25 = vpack.c.bf16 %v2391_v19, %v2390_v22 }
 0xf0f   : > { %v2392_v24 = vpack.c.bf16 %v2389_v20, %v2388_v44 }
 0xf11   : > { %4145 = vmatprep.mubr.msk.bf16.mxu0 %vm1236_vm3, %v2392_v24 }
 0xf12   : > { %4146 = vmatmul.mubr.msk.bf16.vlgmr.msra.gmra.mxu0 %vm1236_vm3, %v2393_v25 }
 0xf13   : > { %4150 = vmatpush3.bf16.xpose.msra.mxu0 %v2473_v27  ;;  %4153 = vmatprep.mubr.msk.bf16.mxu0 %vm1174_vm2, %v2456_v33 }
 0xf14   : > { %4247 = vmatprep.subr.msk.bf16.mxu0 %vm1174_vm2, %v2460_v37 }
 0xf1b   : > { %4152 = vmatpush3.bf16.xpose.msra.mxu0 %v2470_v46 }
 0xf22   : > { %4154 = vmatmul.mubr.msk.bf16.vlgmr.msra.gmra.mxu0 %vm1174_vm2, %v2458_v38 }
 0xf23   : > { %3042 = vmatprep.mubr.bf16.mxu0 %v4578_v55 }
 0xfd2   : > { %v4147_v34 = vpop.f32.mrf.mxu0 }
 0xfd4   : > { %v2440_v49 = vpop.f32.mrf.mxu0 }
 0xfd6   : > { %v4148_v50 = vpop.f32.mrf.mxu0 }
 0xfd7   : > { %v4327_v57 = vpack.i.bf16 %v4148_v50, %v4147_v34 }
 0xfd8   : > { %v2443_v45 = vpop.f32.mrf.mxu0 }
 0xfd9   : > { %v4322_v59 = vpack.i.bf16 %v2443_v45, %v2440_v49 }
 0xfe2   : > { %v4155_v60 = vpop.f32.mrf.mxu0 }
 0xfe3   : > { %v2530_v52 = vsel %vm1236_vm3, %v4155_v60, -inf }
 0xfe4   : > { %v2509_v61 = vpop.f32.mrf.mxu0 }
 0xfe5   : > { %v2524_v62 = vsel %vm1236_vm3, %v2509_v61, -inf }
 0xfe6   : > { %2525 = vmax.xlane.f32.xlu0 %v2524_v62  ;;  %v4156_v4 = vpop.f32.mrf.mxu0 }
 0xfe7   : > { %v2533_v36 = vsel %vm1236_vm3, %v4156_v4, -inf }
 0xfe8   : > { %v2512_v5 = vpop.f32.mrf.mxu0 }
 0xfe9   : > { %v2527_v17 = vsel %vm1236_vm3, %v2512_v5, -inf }
 0xfea   : > { %2531 = vmax.xlane.f32.xlu0 %v2530_v52  ;;  %2528 = vmax.xlane.f32.xlu1 %v2527_v17 }
 0xfee   : > { %2534 = vmax.xlane.f32.xlu0 %v2533_v36 }
0x106f   : > { %v2526_v18 = vpop.xlane.xlu0 %2525 }
0x1070   : > { %v2536_v19 = vsub.f32 %v2509_v61, %v2526_v18 }
0x1072   : > { %v2540_v24 = vmul.f32 1.442695, %v2536_v19  ;;  %v4355_v19 = vld [vmem:[%s4727_s17 + $0x10] sm:$0xff]  }
0x1073   : > { %v2532_v44 = vpop.xlane.xlu0 %2531  ;;  %v2529_v20 = vpop.xlane.xlu1 %2528 }
0x1074   : > { %v2538_v22 = vsub.f32 %v4155_v60, %v2532_v44  ;;  %v2537_v27 = vsub.f32 %v2512_v5, %v2529_v20  ;;  %v4356_v44 = vld [vmem:[%s4727_s17 + $0x8] sm:$0xff]  }
0x1076   : > { %v2544_v25 = vmul.f32 1.442695, %v2538_v22  ;;  %v2542_v46 = vmul.f32 1.442695, %v2537_v27 }
0x1077   : > { %v2535_v33 = vpop.xlane.xlu0 %2534 }
0x1078   : > { %4498 = vpow2.f32 %v2544_v25  ;;  %v2539_v37 = vsub.f32 %v4156_v4, %v2535_v33  ;;  %v4357_v33 = vld [vmem:[%s4727_s17] sm:$0xff]  }
0x1079   : > { %4500 = vpow2.f32 %v2540_v24 }
0x107a   : > { %v2546_v38 = vmul.f32 1.442695, %v2539_v37 }
0x107c   : > { %4502 = vpow2.f32 %v2546_v38 }
0x107d   : > { %4504 = vpow2.f32 %v2542_v46 }
0x1085   : > { %v5201_v34 = vpop.eup %4498 }
0x1086   : > { %v2554_v49 = vsel %vm1236_vm3, %v5201_v34, 0.0  ;;  %v4501_v50 = vpop.eup %4500 }
0x1087   : > { %2555 = vadd.xlane.f32.xlu1 %v2554_v49  ;;  %v2548_v61 = vsel %vm1236_vm3, %v4501_v50, 0.0 }
0x1089   : > { %v4503_v45 = vpop.eup %4502 }
0x108a   : > { %v2557_v60 = vsel %vm1236_vm3, %v4503_v45, 0.0  ;;  %v4505_v62 = vpop.eup %4504 }
0x108b   : > { %2558 = vadd.xlane.f32.xlu0 %v2557_v60  ;;  %2549 = vadd.xlane.f32.xlu1 %v2548_v61  ;;  %v2551_v4 = vsel %vm1236_vm3, %v4505_v62, 0.0 }
0x108f   : > { %2552 = vadd.xlane.f32.xlu0 %v2551_v4 }
0x109c   : > { %2572 = vrot.lane.b32.xlu1 %v5026_v3, %s4585_s2 }
0x10a0   : > { %4283 = vrot.lane.b32.xlu1 %v4282_v8, %s4584_s20 }
0x10a4   : > { %4288 = vrot.lane.b32.xlu1 %v4287_v58, %s4584_s20  ;;  %v4354_v58 = vld [vmem:[%s4727_s17 + $0x18] sm:$0xff]  }
0x10a5   : > { %2570 = vrot.lane.b32.xlu0 %v4914_v47, %s4585_s2 }
0x10a8   : > { %4298 = vrot.lane.b32.xlu1 %v4297_v14, %s4583_s18 }
0x10a9   : > { %4293 = vrot.lane.b32.xlu0 %v4292_v16, %s4583_s18 }
0x10ac   : > { %4308 = vrot.lane.b32.xlu1 %v4307_v31, %s4580_s19 }
0x10ad   : > { %4303 = vrot.lane.b32.xlu0 %v4302_v21, %s4580_s19 }
0x10b0   : > { %4318 = vrot.lane.b32.xlu1 %v4317_v35, %s4584_s20 }
0x10b1   : > { %4313 = vrot.lane.b32.xlu0 %v4312_v43, %s4584_s20 }
0x10b4   : > { %4328 = vrot.lane.b32.xlu1 %v4327_v57, %s4583_s18 }
0x10b5   : > { %4323 = vrot.lane.b32.xlu0 %v4322_v59, %s4583_s18 }
0x1110   : > { %v2556_v47 = vpop.xlane.xlu1 %2555 }
0x1111   : > { %4506 = vrcp.f32 %v2556_v47 }
0x1114   : > { %v2559_v3 = vpop.xlane.xlu0 %2558  ;;  %v2550_v48 = vpop.xlane.xlu1 %2549 }
0x1115   : > { %4508 = vrcp.f32 %v2559_v3 }
0x1116   : > { %4510 = vrcp.f32 %v2550_v48 }
0x1118   : > { %v2553_v6 = vpop.xlane.xlu0 %2552  ;;  %v2573_v26 = vpop.permute.xlu1 %2572 }
0x1119   : > { %4512 = vrcp.f32 %v2553_v6  ;;  %4157 = vmatprep.subr.bf16.mxu1 %v2573_v26 }
0x111a   : > { %4158 = vmatpush3.bf16.msra.mxu1 %v2573_v26 }
0x111c   : > { %v2571_v7 = vpop.permute.xlu0 %2570  ;;  %v4284_v8 = vpop.permute.xlu1 %4283 }
0x111d   : > { %4159 = vmatprep.subr.bf16.mxu1 %v2571_v7  ;;  %v4286_v13 = vunpack.i.h.bf16 %v4284_v8  ;;  %v4285_v14 = vunpack.i.l.bf16 %v4284_v8 }
0x111e   : > { %4160 = vmatpush3.bf16.msra.mxu1 %v2571_v7  ;;  %v4507_v10 = vpop.eup %4506 }
0x111f   : > { %4165 = vmatprep.subr.bf16.mxu1 %v4354_v58  ;;  %v1917_v40 = vsel %vm1174_vm2, %v4972_v2, %v4286_v13  ;;  %v1916_v41 = vsel %vm1174_vm2, %v4968_v0, %v4285_v14  ;;  %v2566_v17 = vmul.f32 %v4507_v10, %v5201_v34  ;;  %v4546_v13 = vld [vmem:[#allocation2] sm:$0xff] }
0x1120   : > { %v4294_v9 = vpop.permute.xlu0 %4293  ;;  %v4289_v31 = vpop.permute.xlu1 %4288 }
0x1121   : > { %v4296_v16 = vunpack.i.h.bf16 %v4294_v9  ;;  %v4295_v28 = vunpack.i.l.bf16 %v4294_v9  ;;  %v4291_v22 = vunpack.i.h.bf16 %v4289_v31  ;;  %v4290_v24 = vunpack.i.l.bf16 %v4289_v31 }
0x1122   : > { %v4509_v15 = vpop.eup %4508 }
0x1123   : > { %v4511_v30 = vpop.eup %4510  ;;  %v2567_v35 = vmul.f32 %v4509_v15, %v4503_v45  ;;  %v1920_v42 = vsel %vm1236_vm3, %v1916_v41, %v4295_v28  ;;  %v1921_v43 = vsel %vm1236_vm3, %v1917_v40, %v4296_v16  ;;  %v1919_v38 = vsel %vm1174_vm2, %v4970_v1, %v4291_v22  ;;  %v4547_v15 = vld [vmem:[#allocation2 + $0x8] sm:$0xff]  ;;  %v4548_v28 = vld [vmem:[#allocation2 + $0x10] sm:$0xff] }
0x1124   : > { %v4304_v29 = vpop.permute.xlu0 %4303  ;;  %v2564_v57 = vmul.f32 %v4511_v30, %v4501_v50  ;;  %v4299_v18 = vpop.permute.xlu1 %4298  ;;  %v1918_v34 = vsel %vm1174_vm2, %v4966_v63, %v4290_v24 }
0x1125   : > { %v4306_v32 = vunpack.i.h.bf16 %v4304_v29  ;;  %v4305_v21 = vunpack.i.l.bf16 %v4304_v29  ;;  %v2569_v2 = vpack.c.bf16 %v2567_v35, %v2566_v17  ;;  %v4301_v25 = vunpack.i.h.bf16 %v4299_v18 }
0x1126   : > { %v4513_v39 = vpop.eup %4512  ;;  %v4300_v27 = vunpack.i.l.bf16 %v4299_v18 }
0x1127   : > { %v2565_v59 = vmul.f32 %v4513_v39, %v4505_v62  ;;  %v1925_v5 = vsel %vm1924_vm4, %v1920_v42, %v4305_v21  ;;  %v1926_v52 = vsel %vm1924_vm4, %v1921_v43, %v4306_v32  ;;  %v1923_v50 = vsel %vm1236_vm3, %v1919_v38, %v4301_v25  ;;  %v4549_v21 = vld [vmem:[#allocation2 + $0x18] sm:$0xff] }
0x1128   : > { %v2691_v0 = vpack.c.bf16 %v1926_v52, %v1925_v5  ;;  %v4309_v20 = vpop.permute.xlu1 %4308  ;;  %v1922_v49 = vsel %vm1236_vm3, %v1918_v34, %v4300_v27  ;;  %v4314_v42 = vpop.permute.xlu0 %4313 }
0x1129   : > { %v2568_v36 = vpack.c.bf16 %v2565_v59, %v2564_v57  ;;  %v4311_v37 = vunpack.i.h.bf16 %v4309_v20  ;;  %v4310_v46 = vunpack.i.l.bf16 %v4309_v20  ;;  %v4316_v59 = vunpack.i.h.bf16 %v4314_v42 }
0x112a   : > { %v4315_v5 = vunpack.i.l.bf16 %v4314_v42 }
0x112b   : > { %4161 = vmatprep.mubr.msk.bf16.mxu1 %vm1236_vm3, %v2568_v36  ;;  %v1927_v45 = vsel %vm1924_vm4, %v1922_v49, %v4310_v46  ;;  %v1928_v60 = vsel %vm1924_vm4, %v1923_v50, %v4311_v37  ;;  %v2680_v22 = vsel %vm1174_vm2, %v5126_v56, %v4316_v59 }
0x112c   : > { %4162 = vmatmul.mubr.msk.bf16.vlgmr.msra.gmra.mxu1 %vm1236_vm3, %v2569_v2  ;;  %v2692_v61 = vpack.c.bf16 %v1928_v60, %v1927_v45  ;;  %v4319_v35 = vpop.permute.xlu1 %4318  ;;  %v4324_v57 = vpop.permute.xlu0 %4323  ;;  %v2679_v24 = vsel %vm1174_vm2, %v5122_v53, %v4315_v5 }
0x112d   : > { %4166 = vmatpush3.bf16.msra.mxu1 %v4354_v58  ;;  %4173 = vmatprep.mubr.msk.bf16.mxu1 %vm1078_vm1, %v2691_v0  ;;  %v5278_v58 = vld [vmem:[%s5648_s21] ss:$0 sm:$0xff]  ;;  %v4321_v52 = vunpack.i.h.bf16 %v4319_v35  ;;  %v4320_v17 = vunpack.i.l.bf16 %v4319_v35  ;;  %v4326_v2 = vunpack.i.h.bf16 %v4324_v57 }
0x112e   : > { %4167 = vmatprep.subr.bf16.mxu1 %v4355_v19 }
0x112f   : > { %v2682_v25 = vsel %vm1174_vm2, %v5124_v54, %v4321_v52  ;;  %v2681_v27 = vsel %vm1174_vm2, %v5120_v51, %v4320_v17  ;;  %v2684_v56 = vsel %vm1236_vm3, %v2680_v22, %v4326_v2  ;;  %v4361_v22 = vld [vmem:[%s4740_s24 + $0x20] ss:$8 sps:$4 sm:$0xff]  }
0x1130   : > { %v4329_v43 = vpop.permute.xlu1 %4328 }
0x1131   : > { %4168 = vmatpush3.bf16.msra.mxu1 %v4355_v19  ;;  %v4331_v36 = vunpack.i.h.bf16 %v4329_v43  ;;  %v4330_v18 = vunpack.i.l.bf16 %v4329_v43  ;;  %v4325_v19 = vunpack.i.l.bf16 %v4324_v57  ;;  %v4553_v57 = vld [vmem:[#allocation2 + $0x38] sm:$0xff] }
0x1132   : > { %4169 = vmatprep.subr.bf16.mxu1 %v4356_v44 }
0x1133   : > { %v2685_v37 = vsel %vm1236_vm3, %v2681_v27, %v4330_v18  ;;  %v2686_v46 = vsel %vm1236_vm3, %v2682_v25, %v4331_v36  ;;  %v2683_v49 = vsel %vm1236_vm3, %v2679_v24, %v4325_v19  ;;  %v4366_v24 = vld [vmem:[%s4740_s24 + $0x14] ss:$8 sps:$4 sm:$0xff]   ;;  %v4364_v25 = vld [vmem:[%s4740_s24 + $0x10] ss:$8 sps:$4 sm:$0xff]   ;;  %v4369_v27 = vld [vmem:[%s4740_s24 + $0x4] ss:$8 sps:$4 sm:$0xff]  }
0x1135   : > { %4170 = vmatpush3.bf16.msra.mxu1 %v4356_v44 }
0x1136   : > { %4171 = vmatprep.subr.bf16.mxu1 %v4357_v33 }
0x1139   : > { %4172 = vmatpush3.bf16.msra.mxu1 %v4357_v33 }
0x113c   : > { %4174 = vmatmul.mubr.msk.bf16.vlgmr.msra.gmra.mxu1 %vm1078_vm1, %v2692_v61 }
0x11ec   : > { %v4163_v62 = vpop.f32.mrf.mxu1 }
0x11ee   : > { %v2616_v1 = vpop.f32.mrf.mxu1 }
0x11f0   : > { %v4164_v4 = vpop.f32.mrf.mxu1 }
0x11f1   : > { %v4337_v47 = vpack.i.bf16 %v4164_v4, %v4163_v62 }
0x11f2   : > { %v2619_v63 = vpop.f32.mrf.mxu1 }
0x11f3   : > { %v4332_v3 = vpack.i.bf16 %v2619_v63, %v2616_v1  ;;  %4338 = vrot.lane.b32.xlu1 %v4337_v47, %s4580_s19 }
0x11f5   : > { %4333 = vrot.lane.b32.xlu0 %v4332_v3, %s4580_s19 }
0x11fc   : > { %v4175_v48 = vpop.f32.mrf.mxu1 }
0x11fd   : > { %v2780_v10 = vadd.f32 %v4175_v48, %v5278_v58 }
0x11fe   : > { %v2771_v6 = vpop.f32.mrf.mxu1 }
0x11ff   : > { %v2772_v7 = vadd.f32 %v5278_v58, %v2771_v6  ;;  %v5285_v29 = vadd.f32 %v4548_v28, %v2780_v10 }
0x1200   : > { %v4176_v26 = vpop.f32.mrf.mxu1 }
0x1201   : > { %v2802_v14 = vadd.f32 %v4546_v13, %v2772_v7  ;;  %v2783_v30 = vadd.f32 %v4176_v26, %v5278_v58  ;;  %v2816_v40 = vsel %vm1078_vm1, %v5285_v29, 0.0  ;;  %v4550_v26 = vld [vmem:[#allocation2 + $0x20] sm:$0xff] }
0x1202   : > { %v2774_v8 = vpop.f32.mrf.mxu1 }
0x1203   : > { %v2775_v9 = vadd.f32 %v5278_v58, %v2774_v8  ;;  %v2810_v31 = vsel %vm1078_vm1, %v2802_v14, 0.0  ;;  %v5291_v39 = vadd.f32 %v4549_v21, %v2783_v30 }
0x1205   : > { %v5283_v16 = vadd.f32 %v4547_v15, %v2775_v9  ;;  %v2819_v41 = vsel %vm1078_vm1, %v5291_v39, 0.0  ;;  %v4551_v15 = vld [vmem:[#allocation2 + $0x30] sm:$0xff] }
0x1207   : > { %v2813_v32 = vsel %vm1078_vm1, %v5283_v16, 0.0 }
0x1214   : > { %2811 = vadd.xlane.f32.xlu0 %v2810_v31 }
0x1217   : > { %2814 = vadd.xlane.f32.xlu1 %v2813_v32 }
0x1218   : > { %2817 = vadd.xlane.f32.xlu0 %v2816_v40  ;;  %v4552_v40 = vld [vmem:[#allocation2 + $0x28] sm:$0xff] }
0x121c   : > { %2820 = vadd.xlane.f32.xlu0 %v2819_v41 }
0x1265   : > { %v4339_v0 = vpop.permute.xlu1 %4338 }
0x1266   : > { %v4341_v44 = vunpack.i.h.bf16 %v4339_v0  ;;  %v4340_v20 = vunpack.i.l.bf16 %v4339_v0  ;;  %v4360_v0 = vld [vmem:[%s4740_s24 + $0x34] ss:$8 sps:$4 sm:$0xff]  }
0x1267   : > { %v4334_v33 = vpop.permute.xlu0 %4333  ;;  %3018 = vmatprep.subr.bf16.mxu0 %v4360_v0  ;;  %v4370_v0 = vld [vmem:[%s4751_s3 + $0x78] sm:$0xff]  }
0x1268   : > { %v4336_v38 = vunpack.i.h.bf16 %v4334_v33  ;;  %v4335_v34 = vunpack.i.l.bf16 %v4334_v33  ;;  %v2689_v50 = vsel %vm1924_vm4, %v2685_v37, %v4340_v20  ;;  %v2690_v53 = vsel %vm1924_vm4, %v2686_v46, %v4341_v44  ;;  %v4358_v44 = vld [vmem:[%s4740_s24 + $0x30] ss:$8 sps:$4 sm:$0xff]   ;;  %v4363_v20 = vld [vmem:[%s4740_s24 + $0x24] ss:$8 sps:$4 sm:$0xff]   ;;  %v4367_v33 = vld [vmem:[%s4740_s24] ss:$8 sps:$4 sm:$0xff]   ;;  %3944 = vmatprep.subr.bf16.mxu1 %v4370_v0 }
0x1269   : > { %v2694_v60 = vpack.c.bf16 %v2690_v53, %v2689_v50  ;;  %3019 = vmatpush1.bf16.msra.mxu0 %v4358_v44  ;;  %v4371_v44 = vld [vmem:[%s4751_s3 + $0x38] sm:$0xff]  }
0x126a   : > { %v2688_v54 = vsel %vm1924_vm4, %v2684_v56, %v4336_v38  ;;  %v2687_v45 = vsel %vm1924_vm4, %v2683_v49, %v4335_v34  ;;  %3020 = vmatprep.subr.bf16.mxu0 %v4363_v20  ;;  %v4372_v20 = vld [vmem:[%s4751_s3 + $0x70] sm:$0xff]   ;;  %3945 = vmatpush3.bf16.msra.mxu1 %v4371_v44 }
0x126b   : > { %v2693_v51 = vpack.c.bf16 %v2688_v54, %v2687_v45  ;;  %3946 = vmatprep.subr.bf16.mxu1 %v4372_v20 }
0x126d   : > { %4177 = vmatprep.mubr.msk.bf16.mxu1 %vm1078_vm1, %v2693_v51  ;;  %3021 = vmatpush1.bf16.msra.mxu0 %v4361_v22  ;;  %v4373_v22 = vld [vmem:[%s4751_s3 + $0x30] sm:$0xff]  }
0x126e   : > { %4178 = vmatmul.mubr.msk.bf16.gmra.mxu1 %vm1078_vm1, %v2694_v60  ;;  %3022 = vmatprep.subr.bf16.mxu0 %v4366_v24  ;;  %v4374_v24 = vld [vmem:[%s4751_s3 + $0x68] sm:$0xff]  }
0x126f   : > { %3947 = vmatpush3.bf16.msra.mxu1 %v4373_v22 }
0x1270   : > { %3948 = vmatprep.subr.bf16.mxu1 %v4374_v24 }
0x1271   : > { %3023 = vmatpush1.bf16.msra.mxu0 %v4364_v25  ;;  %v4375_v25 = vld [vmem:[%s4751_s3 + $0x28] sm:$0xff]  }
0x1272   : > { %3024 = vmatprep.subr.bf16.mxu0 %v4369_v27  ;;  %v4376_v27 = vld [vmem:[%s4751_s3 + $0x60] sm:$0xff]  }
0x1273   : > { %3949 = vmatpush3.bf16.msra.mxu1 %v4375_v25 }
0x1274   : > { %3950 = vmatprep.subr.bf16.mxu1 %v4376_v27 }
0x1275   : > { %3025 = vmatpush1.bf16.msra.mxu0 %v4367_v33  ;;  %v4377_v33 = vld [vmem:[%s4751_s3 + $0x20] sm:$0xff]  }
0x1277   : > { %3951 = vmatpush3.bf16.msra.mxu1 %v4377_v33 }
0x129d   : > { %v2812_v61 = vpop.xlane.xlu0 %2811 }
0x129e   : > { %v2835_v1 = vmul.f32 0.015625, %v2812_v61 }
0x12a0   : > { %v2815_v63 = vpop.xlane.xlu1 %2814  ;;  %v5317_v8 = vsub.f32 %v2802_v14, %v2835_v1 }
0x12a1   : > { %v2818_v4 = vpop.xlane.xlu0 %2817  ;;  %v2836_v9 = vmul.f32 0.015625, %v2815_v63 }
0x12a2   : > { %v2837_v10 = vmul.f32 0.015625, %v2818_v4  ;;  %v2851_v42 = vmul.f32 %v5317_v8, %v5317_v8 }
0x12a3   : > { %v5323_v35 = vsub.f32 %v5283_v16, %v2836_v9 }
0x12a4   : > { %v5326_v14 = vsub.f32 %v5285_v29, %v2837_v10  ;;  %v2859_v16 = vsel %vm1078_vm1, %v2851_v42, 0.0  ;;  %v5380_v42 = vld [vmem:[%s5649_s22] ss:$0 sm:$0xff] }
0x12a5   : > { %v2821_v21 = vpop.xlane.xlu0 %2820  ;;  %v2852_v17 = vmul.f32 %v5323_v35, %v5323_v35 }
0x12a6   : > { %v2838_v43 = vmul.f32 0.015625, %v2821_v21  ;;  %v2853_v36 = vmul.f32 %v5326_v14, %v5326_v14 }
0x12a7   : > { %v2862_v18 = vsel %vm1078_vm1, %v2852_v17, 0.0 }
0x12a8   : > { %v5334_v52 = vsub.f32 %v5291_v39, %v2838_v43  ;;  %v2865_v2 = vsel %vm1078_vm1, %v2853_v36, 0.0 }
0x12aa   : > { %v2854_v39 = vmul.f32 %v5334_v52, %v5334_v52 }
0x12ac   : > { %v2868_v19 = vsel %vm1078_vm1, %v2854_v39, 0.0 }
0x132e   : > { %v4179_v62 = vpop.f32.mrf.mxu1 }
0x132f   : > { %v2796_v3 = vadd.f32 %v4179_v62, %v5278_v58 }
0x1330   : > { %v2787_v47 = vpop.f32.mrf.mxu1 }
0x1331   : > { %v2788_v48 = vadd.f32 %v5278_v58, %v2787_v47  ;;  %v2808_v28 = vadd.f32 %v4551_v15, %v2796_v3 }
0x1332   : > { %v4180_v6 = vpop.f32.mrf.mxu1 }
0x1333   : > { %v2806_v7 = vadd.f32 %v4550_v26, %v2788_v48  ;;  %v2799_v30 = vadd.f32 %v4180_v6, %v5278_v58 }
0x1334   : > { %v2790_v13 = vpop.f32.mrf.mxu1 }
0x1335   : > { %v2791_v31 = vadd.f32 %v5278_v58, %v2790_v13  ;;  %v2822_v32 = vsel %vm1078_vm1, %v2806_v7, 0.0  ;;  %v2809_v59 = vadd.f32 %v4553_v57, %v2799_v30  ;;  %v2828_v58 = vsel %vm1078_vm1, %v2808_v28, 0.0 }
0x1336   : > { %2823 = vadd.xlane.f32.xlu1 %v2822_v32 }
0x1337   : > { %v2807_v41 = vadd.f32 %v4552_v40, %v2791_v31  ;;  %v2831_v29 = vsel %vm1078_vm1, %v2809_v59, 0.0 }
0x1339   : > { %v2825_v5 = vsel %vm1078_vm1, %v2807_v41, 0.0 }
0x133a   : > { %2829 = vadd.xlane.f32.xlu1 %v2828_v58  ;;  %2826 = vadd.xlane.f32.xlu0 %v2825_v5  ;;  %v5389_v5 = vld [vmem:[%s5650_s29] ss:$0 sm:$0xff] }
0x133e   : > { %2832 = vadd.xlane.f32.xlu0 %v2831_v29  ;;  %2860 = vadd.xlane.f32.xlu1 %v2859_v16 }
0x1342   : > { %2863 = vadd.xlane.f32.xlu0 %v2862_v18  ;;  %2866 = vadd.xlane.f32.xlu1 %v2865_v2 }
0x1346   : > { %2869 = vadd.xlane.f32.xlu0 %v2868_v19 }
0x13bf   : > { %v2824_v37 = vpop.xlane.xlu1 %2823 }
0x13c0   : > { %v2839_v46 = vmul.f32 0.015625, %v2824_v37  ;;  %v4378_v37 = vld [vmem:[%s4751_s3 + $0x58] sm:$0xff]  }
0x13c1   : > { %3952 = vmatprep.subr.bf16.mxu1 %v4378_v37 }
0x13c2   : > { %v5354_v38 = vsub.f32 %v2806_v7, %v2839_v46  ;;  %v4379_v46 = vld [vmem:[%s4751_s3 + $0x18] sm:$0xff]  }
0x13c3   : > { %v2830_v34 = vpop.xlane.xlu1 %2829  ;;  %v2827_v49 = vpop.xlane.xlu0 %2826  ;;  %3953 = vmatpush3.bf16.msra.mxu1 %v4379_v46 }
0x13c4   : > { %v2841_v56 = vmul.f32 0.015625, %v2830_v34  ;;  %v2840_v50 = vmul.f32 0.015625, %v2827_v49  ;;  %v2855_v53 = vmul.f32 %v5354_v38, %v5354_v38  ;;  %v4380_v34 = vld [vmem:[%s4751_s3 + $0x50] sm:$0xff]  }
0x13c5   : > { %v4381_v49 = vld [vmem:[%s4751_s3 + $0x10] sm:$0xff]   ;;  %3954 = vmatprep.subr.bf16.mxu1 %v4380_v34 }
0x13c6   : > { %v5358_v54 = vsub.f32 %v2808_v28, %v2841_v56  ;;  %v5360_v45 = vsub.f32 %v2807_v41, %v2840_v50  ;;  %v2871_v51 = vsel %vm1078_vm1, %v2855_v53, 0.0  ;;  %v4382_v56 = vld [vmem:[%s4751_s3 + $0x48] sm:$0xff]   ;;  %v4384_v53 = vld [vmem:[%s4751_s3 + $0x40] sm:$0xff]  }
0x13c7   : > { %v2861_v60 = vpop.xlane.xlu1 %2860  ;;  %2872 = vadd.xlane.f32.xlu1 %v2871_v51  ;;  %v2833_v61 = vpop.xlane.xlu0 %2832  ;;  %3955 = vmatpush3.bf16.msra.mxu1 %v4381_v49  ;;  %v4383_v50 = vld [vmem:[%s4751_s3 + $0x8] sm:$0xff]   ;;  %v4385_v51 = vld [vmem:[%s4751_s3] sm:$0xff]  }
0x13c8   : > { %v2883_v62 = vmul.f32 0.015625, %v2861_v60  ;;  %v2842_v1 = vmul.f32 0.015625, %v2833_v61  ;;  %v2857_v4 = vmul.f32 %v5358_v54, %v5358_v54  ;;  %v2856_v47 = vmul.f32 %v5360_v45, %v5360_v45  ;;  %3956 = vmatprep.subr.bf16.mxu1 %v4382_v56 }
0x13ca   : > { %v2891_v63 = vadd.f32 1e-05, %v2883_v62  ;;  %v5367_v3 = vsub.f32 %v2809_v59, %v2842_v1  ;;  %v2877_v48 = vsel %vm1078_vm1, %v2857_v4, 0.0  ;;  %v2874_v6 = vsel %vm1078_vm1, %v2856_v47, 0.0 }
0x13cb   : > { %2878 = vadd.xlane.f32.xlu1 %v2877_v48  ;;  %v2867_v26 = vpop.xlane.xlu1 %2866  ;;  %2875 = vadd.xlane.f32.xlu0 %v2874_v6  ;;  %v2864_v7 = vpop.xlane.xlu0 %2863 }
0x13cc   : > { %4514 = vrsqrt.f32 %v2891_v63  ;;  %v2885_v9 = vmul.f32 0.015625, %v2867_v26  ;;  %v2884_v10 = vmul.f32 0.015625, %v2864_v7  ;;  %v2858_v13 = vmul.f32 %v5367_v3, %v5367_v3  ;;  %3957 = vmatpush3.bf16.msra.mxu1 %v4383_v50 }
0x13cd   : > { %3958 = vmatprep.subr.bf16.mxu1 %v4384_v53 }
0x13ce   : > { %v2892_v15 = vadd.f32 1e-05, %v2884_v10  ;;  %v2880_v28 = vsel %vm1078_vm1, %v2858_v13, 0.0  ;;  %v2893_v30 = vadd.f32 1e-05, %v2885_v9 }
0x13cf   : > { %2881 = vadd.xlane.f32.xlu0 %v2880_v28  ;;  %v2870_v31 = vpop.xlane.xlu0 %2869 }
0x13d0   : > { %v2886_v32 = vmul.f32 0.015625, %v2870_v31  ;;  %4516 = vrsqrt.f32 %v2892_v15  ;;  %3959 = vmatpush3.bf16.msra.mxu1 %v4385_v51 }
0x13d1   : > { %4518 = vrsqrt.f32 %v2893_v30 }
0x13d2   : > { %v2894_v21 = vadd.f32 1e-05, %v2886_v32 }
0x13d4   : > { %4520 = vrsqrt.f32 %v2894_v21 }
0x13d9   : > { %v4515_v40 = vpop.eup %4514 }
0x13da   : > { %v2907_v41 = vmul.f32 %v4515_v40, %v5317_v8 }
0x13dc   : > { %v2921_v59 = vmul.f32 %v5380_v42, %v2907_v41 }
0x13dd   : > { %v4517_v43 = vpop.eup %4516 }
0x13de   : > { %v2908_v57 = vmul.f32 %v4517_v43, %v5323_v35  ;;  %v4519_v58 = vpop.eup %4518  ;;  %v5394_v17 = vadd.f32 %v5389_v5, %v2921_v59 }
0x13df   : > { %v2909_v36 = vmul.f32 %v4519_v58, %v5326_v14 }
0x13e0   : > { %v2922_v8 = vmul.f32 %v5380_v42, %v2908_v57 }
0x13e1   : > { %v4521_v16 = vpop.eup %4520 }
0x13e2   : > { %v2910_v29 = vmul.f32 %v4521_v16, %v5334_v52  ;;  %v5397_v35 = vadd.f32 %v5389_v5, %v2922_v8  ;;  %v2923_v52 = vmul.f32 %v5380_v42, %v2909_v36  ;;  %v991_v16 = vld [vmem:[%s4745_s28] sm:$0x3] }
0x13e4   : > { %v2943_v18 = vpack.c.bf16 %v5397_v35, %v5394_v17  ;;  %v2924_v2 = vmul.f32 %v5380_v42, %v2910_v29  ;;  %v5410_v14 = vadd.f32 %v5389_v5, %v2923_v52  ;;  %v2955_v29 = vrot.slane %v991_v16, %v1034_v23 }
0x13e6   : > { %3815 = vmatmul.mubr.msk.bf16.vlgmr.msra.gmra.mxu0 %vm1078_vm1, %v2943_v18  ;;  %v5407_v39 = vadd.f32 %v5389_v5, %v2924_v2 }
0x13e7   : > { %3052 = vmatprep.mubr.bf16.mxu0 %v4578_v55 }
0x13e8   : > { %v2944_v19 = vpack.c.bf16 %v5407_v39, %v5410_v14 }
0x13ee   : > { %3816 = vmatmul.mubr.msk.bf16.gmra.mxu0 %vm1078_vm1, %v2944_v19 }
0x13ef   : > { %3062 = vmatprep.mubr.bf16.mxu0 %v4578_v55 }
0x1450   : > { %v2873_v60 = vpop.xlane.xlu1 %2872 }
0x1451   : > { %v2887_v61 = vmul.f32 0.015625, %v2873_v60 }
0x1453   : > { %v2895_v62 = vadd.f32 1e-05, %v2887_v61 }
0x1454   : > { %v2879_v1 = vpop.xlane.xlu1 %2878  ;;  %v2876_v4 = vpop.xlane.xlu0 %2875 }
0x1455   : > { %4522 = vrsqrt.f32 %v2895_v62  ;;  %v2889_v47 = vmul.f32 0.015625, %v2879_v1  ;;  %v2888_v63 = vmul.f32 0.015625, %v2876_v4 }
0x1457   : > { %v2896_v48 = vadd.f32 1e-05, %v2888_v63  ;;  %v2897_v6 = vadd.f32 1e-05, %v2889_v47 }
0x1458   : > { %v2882_v26 = vpop.xlane.xlu0 %2881 }
0x1459   : > { %v2890_v7 = vmul.f32 0.015625, %v2882_v26  ;;  %4524 = vrsqrt.f32 %v2896_v48 }
0x145a   : > { %4526 = vrsqrt.f32 %v2897_v6 }
0x145b   : > { %v2898_v9 = vadd.f32 1e-05, %v2890_v7 }
0x145d   : > { %4528 = vrsqrt.f32 %v2898_v9 }
0x1462   : > { %v4523_v10 = vpop.eup %4522 }
0x1463   : > { %v2911_v13 = vmul.f32 %v4523_v10, %v5354_v38 }
0x1465   : > { %v2925_v30 = vmul.f32 %v5380_v42, %v2911_v13 }
0x1466   : > { %v4525_v15 = vpop.eup %4524 }
0x1467   : > { %v2912_v28 = vmul.f32 %v4525_v15, %v5360_v45  ;;  %v4527_v31 = vpop.eup %4526  ;;  %v5438_v41 = vadd.f32 %v5389_v5, %v2925_v30 }
0x1468   : > { %v2913_v38 = vmul.f32 %v4527_v31, %v5358_v54 }
0x1469   : > { %v2926_v21 = vmul.f32 %v5380_v42, %v2912_v28 }
0x146a   : > { %v4529_v32 = vpop.eup %4528  ;;  %v2927_v59 = vmul.f32 %v5380_v42, %v2913_v38 }
0x146b   : > { %v2914_v40 = vmul.f32 %v4529_v32, %v5367_v3  ;;  %v5441_v43 = vadd.f32 %v5389_v5, %v2926_v21 }
0x146c   : > { %v5454_v58 = vadd.f32 %v5389_v5, %v2927_v59 }
0x146d   : > { %v2945_v45 = vpack.c.bf16 %v5441_v43, %v5438_v41  ;;  %v2928_v57 = vmul.f32 %v5380_v42, %v2914_v40  ;;  %v2951_v42 = vrot.slane %v991_v16, %v1030_v12 }
0x146f   : > { %3817 = vmatmul.mubr.msk.bf16.gmra.mxu0 %vm1078_vm1, %v2945_v45  ;;  %v5451_v3 = vadd.f32 %v5389_v5, %v2928_v57 }
0x1470   : > { %3072 = vmatprep.mubr.bf16.mxu0 %v4578_v55 }
0x1471   : > { %v2946_v54 = vpack.c.bf16 %v5451_v3, %v5454_v58 }
0x1477   : > { %3818 = vmatmul.mubr.msk.bf16.gmra.mxu0 %vm1078_vm1, %v2946_v54 }
0x14a6   : > { %v3044_v8 = vpop.f32.mrf.mxu0 }
0x14a7   : > { %v3045_v52 = vadd.f32 %v3044_v8, %v2951_v42 }
0x14a8   : > { %v3046_v55 = vpop.f32.mrf.mxu0 }
0x14a9   : > { %v3047_v18 = vadd.f32 %v3046_v55, %v2955_v29  ;;  %v3083_v24 = vmax.f32 %v3045_v52, 0.0 }
0x14aa   : > { %v3048_v36 = vpop.f32.mrf.mxu0 }
0x14ab   : > { %v3049_v2 = vadd.f32 %v3048_v36, %v2951_v42  ;;  %v3084_v20 = vmax.f32 %v3047_v18, 0.0  ;;  %v3819_v18 = vld [vmem:[%s778_s4] ss:$0 sm:$0xff] }
0x14ac   : > { %v3050_v5 = vpop.f32.mrf.mxu0 }
0x14ad   : > { %v3051_v19 = vadd.f32 %v3050_v5, %v2955_v29  ;;  %v3085_v0 = vmax.f32 %v3049_v2, 0.0 }
0x14ae   : > { %v3054_v44 = vpop.f32.mrf.mxu0 }
0x14af   : > { %v3086_v22 = vmax.f32 %v3051_v19, 0.0  ;;  %v3099_v33 = vpack.c.bf16 %v3085_v0, %v3083_v24  ;;  %v3055_v11 = vadd.f32 %v3054_v44, %v2951_v42 }
0x14b0   : > { %v3056_v25 = vpop.f32.mrf.mxu0 }
0x14b1   : > { %v3100_v27 = vpack.c.bf16 %v3086_v22, %v3084_v20  ;;  %v3057_v23 = vadd.f32 %v3056_v25, %v2955_v29  ;;  %v3087_v53 = vmax.f32 %v3055_v11, 0.0 }
0x14b2   : > { %v3058_v37 = vpop.f32.mrf.mxu0 }
0x14b3   : > { %v3059_v46 = vadd.f32 %v3058_v37, %v2951_v42  ;;  %3241 = vmatprep.mubr.bf16.mxu1 %v3100_v27  ;;  %v3088_v56 = vmax.f32 %v3057_v23, 0.0 }
0x14b4   : > { %v3060_v12 = vpop.f32.mrf.mxu0  ;;  %3242 = vmatmul.mubr.bf16.vlgmr.msra.gmra.mxu1 %v3099_v33 }
0x14b5   : > { %v3061_v34 = vadd.f32 %v3060_v12, %v2955_v29  ;;  %v3089_v49 = vmax.f32 %v3059_v46, 0.0 }
0x14b7   : > { %v3090_v50 = vmax.f32 %v3061_v34, 0.0  ;;  %v3101_v60 = vpack.c.bf16 %v3089_v49, %v3087_v53 }
0x14b9   : > { %v3102_v51 = vpack.c.bf16 %v3090_v50, %v3088_v56 }
0x14bb   : > { %3249 = vmatprep.mubr.bf16.mxu1 %v3102_v51 }
0x14bc   : > { %3250 = vmatmul.mubr.bf16.gmra.mxu1 %v3101_v60 }
0x152f   : > { %v3064_v61 = vpop.f32.mrf.mxu0 }
0x1530   : > { %v3065_v63 = vadd.f32 %v3064_v61, %v2951_v42 }
0x1531   : > { %v3066_v62 = vpop.f32.mrf.mxu0 }
0x1532   : > { %v3067_v4 = vadd.f32 %v3066_v62, %v2955_v29  ;;  %v3091_v13 = vmax.f32 %v3065_v63, 0.0 }
0x1533   : > { %v3068_v1 = vpop.f32.mrf.mxu0 }
0x1534   : > { %v3069_v47 = vadd.f32 %v3068_v1, %v2951_v42  ;;  %v3092_v9 = vmax.f32 %v3067_v4, 0.0 }
0x1535   : > { %v3070_v48 = vpop.f32.mrf.mxu0 }
0x1536   : > { %v3071_v6 = vadd.f32 %v3070_v48, %v2955_v29  ;;  %v3093_v26 = vmax.f32 %v3069_v47, 0.0 }
0x1537   : > { %v3074_v7 = vpop.f32.mrf.mxu0 }
0x1538   : > { %v3094_v10 = vmax.f32 %v3071_v6, 0.0  ;;  %v3103_v30 = vpack.c.bf16 %v3093_v26, %v3091_v13  ;;  %v3075_v40 = vadd.f32 %v3074_v7, %v2951_v42 }
0x1539   : > { %v3076_v15 = vpop.f32.mrf.mxu0 }
0x153a   : > { %v3104_v28 = vpack.c.bf16 %v3094_v10, %v3092_v9  ;;  %v3077_v32 = vadd.f32 %v3076_v15, %v2955_v29  ;;  %v3095_v16 = vmax.f32 %v3075_v40, 0.0 }
0x153b   : > { %v3078_v31 = vpop.f32.mrf.mxu0 }
0x153c   : > { %v3079_v21 = vadd.f32 %v3078_v31, %v2951_v42  ;;  %3257 = vmatprep.mubr.bf16.mxu1 %v3104_v28  ;;  %v3096_v59 = vmax.f32 %v3077_v32, 0.0 }
0x153d   : > { %v3080_v38 = vpop.f32.mrf.mxu0  ;;  %3258 = vmatmul.mubr.bf16.gmra.mxu1 %v3103_v30 }
0x153e   : > { %v3081_v45 = vadd.f32 %v3080_v38, %v2955_v29  ;;  %v3097_v57 = vmax.f32 %v3079_v21, 0.0 }
0x1540   : > { %v3098_v54 = vmax.f32 %v3081_v45, 0.0  ;;  %v3105_v55 = vpack.c.bf16 %v3097_v57, %v3095_v16 }
0x1542   : > { %v3106_v8 = vpack.c.bf16 %v3098_v54, %v3096_v59 }
0x1544   : > { %3265 = vmatprep.mubr.bf16.mxu1 %v3106_v8 }
0x1545   : > { %3266 = vmatmul.mubr.bf16.gmra.mxu1 %v3105_v55 }
0x1574   : > { %v3960_v36 = vpop.f32.mrf.mxu1 }
0x1576   : > { %v3961_v2 = vpop.f32.mrf.mxu1 }
0x1577   : > { %v3962_v52 = vadd.f32 %v3961_v2, %v3960_v36 }
0x1578   : > { %v3963_v42 = vpop.f32.mrf.mxu1 }
0x1579   : > { %v3244_v5 = vadd.f32 %v3962_v52, %v3819_v18 }
0x157a   : > { %v3964_v19 = vpop.f32.mrf.mxu1 }
0x157b   : > { %v3965_v29 = vadd.f32 %v3964_v19, %v3963_v42  ;;  %v3274_v0 = vadd.f32 %v3244_v5, %v5394_v17 }
0x157c   : > { %v3966_v44 = vpop.f32.mrf.mxu1 }
0x157d   : > { %v3247_v20 = vadd.f32 %v3965_v29, %v3819_v18  ;;  %v3282_v22 = vsel %vm1078_vm1, %v3274_v0, 0.0 }
0x157e   : > { %3283 = vadd.xlane.f32.xlu1 %v3282_v22  ;;  %v3967_v24 = vpop.f32.mrf.mxu1 }
0x157f   : > { %v3968_v25 = vadd.f32 %v3967_v24, %v3966_v44  ;;  %v3275_v27 = vadd.f32 %v3247_v20, %v5397_v35 }
0x1580   : > { %v3969_v33 = vpop.f32.mrf.mxu1 }
0x1581   : > { %v3252_v37 = vadd.f32 %v3968_v25, %v3819_v18  ;;  %v3285_v23 = vsel %vm1078_vm1, %v3275_v27, 0.0 }
0x1582   : > { %3286 = vadd.xlane.f32.xlu0 %v3285_v23  ;;  %v3970_v46 = vpop.f32.mrf.mxu1 }
0x1583   : > { %v3971_v11 = vadd.f32 %v3970_v46, %v3969_v33  ;;  %v3276_v12 = vadd.f32 %v3252_v37, %v5410_v14 }
0x1585   : > { %v3255_v34 = vadd.f32 %v3971_v11, %v3819_v18  ;;  %v3288_v17 = vsel %vm1078_vm1, %v3276_v12, 0.0 }
0x1586   : > { %3289 = vadd.xlane.f32.xlu1 %v3288_v17 }
0x1587   : > { %v3277_v49 = vadd.f32 %v3255_v34, %v5407_v39 }
0x1589   : > { %v3291_v56 = vsel %vm1078_vm1, %v3277_v49, 0.0 }
0x158a   : > { %3292 = vadd.xlane.f32.xlu0 %v3291_v56 }
0x15fd   : > { %v3972_v50 = vpop.f32.mrf.mxu1 }
0x15ff   : > { %v3973_v35 = vpop.f32.mrf.mxu1 }
0x1600   : > { %v3974_v53 = vadd.f32 %v3973_v35, %v3972_v50 }
0x1601   : > { %v3975_v51 = vpop.f32.mrf.mxu1 }
0x1602   : > { %v3260_v60 = vadd.f32 %v3974_v53, %v3819_v18 }
0x1603   : > { %v3976_v61 = vpop.f32.mrf.mxu1 }
0x1604   : > { %v3977_v62 = vadd.f32 %v3976_v61, %v3975_v51  ;;  %v3278_v1 = vadd.f32 %v3260_v60, %v5438_v41 }
0x1605   : > { %v3978_v4 = vpop.f32.mrf.mxu1 }
0x1606   : > { %v3263_v14 = vadd.f32 %v3977_v62, %v3819_v18  ;;  %v3294_v47 = vsel %vm1078_vm1, %v3278_v1, 0.0 }
0x1607   : > { %v3284_v63 = vpop.xlane.xlu1 %3283  ;;  %3295 = vadd.xlane.f32.xlu1 %v3294_v47  ;;  %v3979_v48 = vpop.f32.mrf.mxu1 }
0x1608   : > { %v3306_v39 = vmul.f32 0.015625, %v3284_v63  ;;  %v3980_v6 = vadd.f32 %v3979_v48, %v3978_v4  ;;  %v3279_v26 = vadd.f32 %v3263_v14, %v5441_v43 }
0x1609   : > { %v3981_v7 = vpop.f32.mrf.mxu1 }
0x160a   : > { %v5480_v9 = vsub.f32 %v3274_v0, %v3306_v39  ;;  %v3268_v10 = vadd.f32 %v3980_v6, %v3819_v18  ;;  %v3297_v13 = vsel %vm1078_vm1, %v3279_v26, 0.0  ;;  %v3836_v39 = vld [vmem:[%s781_s5] ss:$0 sm:$0xff] }
0x160b   : > { %3298 = vadd.xlane.f32.xlu0 %v3297_v13  ;;  %v3982_v15 = vpop.f32.mrf.mxu1  ;;  %v3287_v41 = vpop.xlane.xlu0 %3286 }
0x160c   : > { %v3983_v28 = vadd.f32 %v3982_v15, %v3981_v7  ;;  %v3307_v30 = vmul.f32 0.015625, %v3287_v41  ;;  %v3280_v31 = vadd.f32 %v3268_v10, %v5454_v58  ;;  %v3322_v43 = vmul.f32 %v5480_v9, %v5480_v9 }
0x160e   : > { %v3271_v32 = vadd.f32 %v3983_v28, %v3819_v18  ;;  %v5484_v21 = vsub.f32 %v3275_v27, %v3307_v30  ;;  %v3300_v40 = vsel %vm1078_vm1, %v3280_v31, 0.0  ;;  %v3330_v16 = vsel %vm1078_vm1, %v3322_v43, 0.0 }
0x160f   : > { %v3290_v38 = vpop.xlane.xlu1 %3289  ;;  %3301 = vadd.xlane.f32.xlu1 %v3300_v40 }
0x1610   : > { %v3308_v45 = vmul.f32 0.015625, %v3290_v38  ;;  %v3281_v57 = vadd.f32 %v3271_v32, %v5451_v3  ;;  %v3323_v58 = vmul.f32 %v5484_v21, %v5484_v21 }
0x1612   : > { %v5490_v59 = vsub.f32 %v3276_v12, %v3308_v45  ;;  %v3303_v54 = vsel %vm1078_vm1, %v3281_v57, 0.0  ;;  %v3333_v2 = vsel %vm1078_vm1, %v3323_v58, 0.0 }
0x1613   : > { %3304 = vadd.xlane.f32.xlu0 %v3303_v54  ;;  %3331 = vadd.xlane.f32.xlu1 %v3330_v16  ;;  %v3293_v8 = vpop.xlane.xlu0 %3292 }
0x1614   : > { %v3309_v55 = vmul.f32 0.015625, %v3293_v8  ;;  %v3324_v36 = vmul.f32 %v5490_v59, %v5490_v59 }
0x1616   : > { %v5498_v18 = vsub.f32 %v3277_v49, %v3309_v55  ;;  %v3336_v3 = vsel %vm1078_vm1, %v3324_v36, 0.0 }
0x1617   : > { %3337 = vadd.xlane.f32.xlu1 %v3336_v3  ;;  %3334 = vadd.xlane.f32.xlu0 %v3333_v2 }
0x1618   : > { %v3325_v52 = vmul.f32 %v5498_v18, %v5498_v18 }
0x161a   : > { %v3339_v42 = vsel %vm1078_vm1, %v3325_v52, 0.0 }
0x161b   : > { %3340 = vadd.xlane.f32.xlu0 %v3339_v42 }
0x1690   : > { %v3296_v5 = vpop.xlane.xlu1 %3295 }
0x1691   : > { %v3310_v19 = vmul.f32 0.015625, %v3296_v5 }
0x1693   : > { %v5505_v29 = vsub.f32 %v3278_v1, %v3310_v19 }
0x1694   : > { %v3299_v0 = vpop.xlane.xlu0 %3298 }
0x1695   : > { %v3311_v44 = vmul.f32 0.015625, %v3299_v0  ;;  %v3326_v20 = vmul.f32 %v5505_v29, %v5505_v29 }
0x1697   : > { %v5509_v22 = vsub.f32 %v3279_v26, %v3311_v44  ;;  %v3342_v24 = vsel %vm1078_vm1, %v3326_v20, 0.0  ;;  %v3837_v26 = vld [vmem:[%s784_s30] ss:$0 sm:$0xff]  ;;  %s5651_s30 = sld [smem:[#allocation14_spill]] (!%p3838_p6) }
0x1698   : > { %3343 = vadd.xlane.f32.xlu1 %v3342_v24  ;;  %v3302_v25 = vpop.xlane.xlu1 %3301 }
0x1699   : > { %v3312_v27 = vmul.f32 0.015625, %v3302_v25  ;;  %v3327_v33 = vmul.f32 %v5509_v22, %v5509_v22 }
0x169b   : > { %v5514_v37 = vsub.f32 %v3280_v31, %v3312_v27  ;;  %v3345_v23 = vsel %vm1078_vm1, %v3327_v33, 0.0 }
0x169c   : > { %v3332_v46 = vpop.xlane.xlu1 %3331  ;;  %3346 = vadd.xlane.f32.xlu0 %v3345_v23  ;;  %v3305_v11 = vpop.xlane.xlu0 %3304 }
0x169d   : > { %v3354_v12 = vmul.f32 0.015625, %v3332_v46  ;;  %v3313_v34 = vmul.f32 0.015625, %v3305_v11  ;;  %v3328_v17 = vmul.f32 %v5514_v37, %v5514_v37 }
0x169f   : > { %v3362_v49 = vadd.f32 1e-05, %v3354_v12  ;;  %v5519_v56 = vsub.f32 %v3281_v57, %v3313_v34  ;;  %v3348_v50 = vsel %vm1078_vm1, %v3328_v17, 0.0 }
0x16a0   : > { %3349 = vadd.xlane.f32.xlu1 %v3348_v50  ;;  %v3338_v35 = vpop.xlane.xlu1 %3337  ;;  %v3335_v53 = vpop.xlane.xlu0 %3334 }
0x16a1   : > { %4530 = vrsqrt.f32 %v3362_v49  ;;  %v3356_v51 = vmul.f32 0.015625, %v3338_v35  ;;  %v3355_v60 = vmul.f32 0.015625, %v3335_v53  ;;  %v3329_v61 = vmul.f32 %v5519_v56, %v5519_v56 }
0x16a3   : > { %v3364_v62 = vadd.f32 1e-05, %v3356_v51  ;;  %v3363_v1 = vadd.f32 1e-05, %v3355_v60  ;;  %v3351_v4 = vsel %vm1078_vm1, %v3329_v61, 0.0 }
0x16a4   : > { %3352 = vadd.xlane.f32.xlu0 %v3351_v4  ;;  %v3341_v14 = vpop.xlane.xlu0 %3340 }
0x16a5   : > { %4532 = vrsqrt.f32 %v3364_v62  ;;  %v3357_v47 = vmul.f32 0.015625, %v3341_v14 }
0x16a6   : > { %4534 = vrsqrt.f32 %v3363_v1 }
0x16a7   : > { %v3365_v63 = vadd.f32 1e-05, %v3357_v47 }
0x16a9   : > { %4536 = vrsqrt.f32 %v3365_v63 }
0x16ae   : > { %v4531_v48 = vpop.eup %4530 }
0x16af   : > { %v3378_v6 = vmul.f32 %v4531_v48, %v5480_v9 }
0x16b1   : > { %v3392_v7 = vmul.f32 %v3836_v39, %v3378_v6 }
0x16b2   : > { %v4533_v10 = vpop.eup %4532 }
0x16b3   : > { %v4535_v13 = vpop.eup %4534  ;;  %v3406_v15 = vadd.f32 %v3837_v26, %v3392_v7  ;;  %v3380_v41 = vmul.f32 %v4533_v10, %v5490_v59 }
0x16b4   : > { %v3379_v28 = vmul.f32 %v4535_v13, %v5484_v21 }
0x16b5   : > { %3414 = vst.msk [vmem:[#allocation2] sm:$0xff] %vm1078_vm1, %v3406_v15  ;;  %v3394_v30 = vmul.f32 %v3836_v39, %v3380_v41 }
0x16b6   : > { %v4537_v31 = vpop.eup %4536  ;;  %v3393_v32 = vmul.f32 %v3836_v39, %v3379_v28 }
0x16b7   : > { %v3408_v40 = vadd.f32 %v3837_v26, %v3394_v30  ;;  %v3381_v9 = vmul.f32 %v4537_v31, %v5498_v18 }
0x16b8   : > { %v3407_v43 = vadd.f32 %v3837_v26, %v3393_v32 }
0x16b9   : > { %3416 = vst.msk [vmem:[#allocation2 + $0x10] sm:$0xff] %vm1078_vm1, %v3408_v40  ;;  %v3395_v38 = vmul.f32 %v3836_v39, %v3381_v9 }
0x16ba   : > { %3415 = vst.msk [vmem:[#allocation2 + $0x8] sm:$0xff] %vm1078_vm1, %v3407_v43 }
0x16bb   : > { %v3409_v45 = vadd.f32 %v3837_v26, %v3395_v38 }
0x16bd   : > { %3417 = vst.msk [vmem:[#allocation2 + $0x18] sm:$0xff] %vm1078_vm1, %v3409_v45 }
0x1721   : > { %v3344_v57 = vpop.xlane.xlu1 %3343 }
0x1722   : > { %v3358_v59 = vmul.f32 0.015625, %v3344_v57 }
0x1724   : > { %v3366_v21 = vadd.f32 1e-05, %v3358_v59 }
0x1725   : > { %v3347_v54 = vpop.xlane.xlu0 %3346 }
0x1726   : > { %4538 = vrsqrt.f32 %v3366_v21  ;;  %v3359_v16 = vmul.f32 0.015625, %v3347_v54 }
0x1728   : > { %v3367_v58 = vadd.f32 1e-05, %v3359_v16 }
0x1729   : > { %v3350_v8 = vpop.xlane.xlu1 %3349 }
0x172a   : > { %4540 = vrsqrt.f32 %v3367_v58  ;;  %v3360_v55 = vmul.f32 0.015625, %v3350_v8 }
0x172c   : > { %v3368_v36 = vadd.f32 1e-05, %v3360_v55 }
0x172d   : > { %v3353_v18 = vpop.xlane.xlu0 %3352 }
0x172e   : > { %4542 = vrsqrt.f32 %v3368_v36  ;;  %v3361_v3 = vmul.f32 0.015625, %v3353_v18 }
0x1730   : > { %v3369_v2 = vadd.f32 1e-05, %v3361_v3 }
0x1732   : > { %4544 = vrsqrt.f32 %v3369_v2 }
0x1733   : > { %v4539_v52 = vpop.eup %4538 }
0x1734   : > { %v3382_v42 = vmul.f32 %v4539_v52, %v5505_v29 }
0x1736   : > { %v3396_v5 = vmul.f32 %v3836_v39, %v3382_v42 }
0x1737   : > { %v4541_v19 = vpop.eup %4540 }
0x1738   : > { %v3410_v0 = vadd.f32 %v3837_v26, %v3396_v5  ;;  %v3383_v44 = vmul.f32 %v4541_v19, %v5509_v22 }
0x173a   : > { %3418 = vst.msk [vmem:[#allocation2 + $0x20] sm:$0xff] %vm1078_vm1, %v3410_v0  ;;  %v3397_v20 = vmul.f32 %v3836_v39, %v3383_v44 }
0x173b   : > { %v4543_v24 = vpop.eup %4542 }
0x173c   : > { %v3411_v25 = vadd.f32 %v3837_v26, %v3397_v20  ;;  %v3384_v27 = vmul.f32 %v4543_v24, %v5514_v37 }
0x173e   : > { %3419 = vst.msk [vmem:[#allocation2 + $0x28] sm:$0xff] %vm1078_vm1, %v3411_v25  ;;  %v3398_v33 = vmul.f32 %v3836_v39, %v3384_v27 }
0x173f   : > { %v4545_v23 = vpop.eup %4544 }
0x1740   : > { %v3412_v46 = vadd.f32 %v3837_v26, %v3398_v33  ;;  %v3385_v11 = vmul.f32 %v4545_v23, %v5519_v56 }
0x1742   : > { %3420 = vst.msk [vmem:[#allocation2 + $0x30] sm:$0xff] %vm1078_vm1, %v3412_v46  ;;  %v3399_v29 = vmul.f32 %v3836_v39, %v3385_v11  ;;  %3425 = sbr.rel (%p3838_p6) target bundleno = 6178 (0x1822), region = 100 }
0x1744   : > { %v3413_v12 = vadd.f32 %v3837_v26, %v3399_v29 }
0x1746   : > { %3421 = vst.msk [vmem:[#allocation2 + $0x38] sm:$0xff] %vm1078_vm1, %v3413_v12 }
0x1747   : > { %v3462_v22 = vld [vmem:[%s5651_s30 + $0x38] sm:$0xff]  ;;  %v3426_v37 = vsel %vm1078_vm1, %v3406_v15, 0.0  ;;  %v4586_v34 = vmov 0.0   ;;  %v3461_v17 = vld [vmem:[%s5651_s30 + $0x30] sm:$0xff]  ;;  %vm4587_vm5 = vmmov 0   ;;  %v3427_v49 = vsel %vm1078_vm1, %v3407_v43, 0.0 }
0x1748   : > { %4181 = vmatprep.subr.mxu0 %v4586_v34  ;;  %4197 = vmatprep.mubr.msk.f32.mxu0 %vm4587_vm5, %v4586_v34  ;;  %v3429_v56 = vsel %vm1078_vm1, %v3408_v40, 0.0  ;;  %v3428_v50 = vadd.f32 %v3427_v49, %v3426_v37  ;;  %v3439_v35 = vsel %vm1078_vm1, %v3410_v0, 0.0  ;;  %v3440_v53 = vsel %vm1078_vm1, %v3411_v25, 0.0  ;;  %v3460_v60 = vld [vmem:[%s5651_s30 + $0x28] sm:$0xff]  ;;  %v3459_v14 = vld [vmem:[%s5651_s30 + $0x20] sm:$0xff]  ;;  %v3458_v48 = vld [vmem:[%s5651_s30 + $0x18] sm:$0xff] }
0x1749   : > { %4182 = vmatpush3.msra.mxu0 %v3462_v22  ;;  %v3442_v51 = vsel %vm1078_vm1, %v3412_v46, 0.0  ;;  %v3431_v61 = vsel %vm1078_vm1, %v3409_v45, 0.0  ;;  %v3441_v62 = vadd.f32 %v3440_v53, %v3439_v35  ;;  %v3444_v4 = vsel %vm1078_vm1, %v3413_v12, 0.0  ;;  %v3457_v26 = vld [vmem:[%s5651_s30 + $0x10] sm:$0xff]  ;;  %v3456_v13 = vld [vmem:[%s5651_s30 + $0x8] sm:$0xff]  ;;  %v3455_v28 = vld [vmem:[%s5651_s30] sm:$0xff] }
0x174a   : > { %4183 = vmatprep.subr.mxu0 %v4586_v34  ;;  %v3430_v1 = vadd.f32 %v3429_v56, %v3428_v50  ;;  %vm3472_vm6 = vcmask 1041409   ;;  %v3839_v21 = vld [vmem:[%s5652_s0] ss:$0 sm:$0xff] }
0x174b   : > { %4184 = vmatpush3.msra.mxu0 %v3461_v17  ;;  %v3443_v47 = vadd.f32 %v3442_v51, %v3441_v62 }
0x174c   : > { %4185 = vmatprep.subr.mxu0 %v4586_v34  ;;  %v3432_v63 = vadd.f32 %v3431_v61, %v3430_v1 }
0x174d   : > { %4186 = vmatpush3.msra.mxu0 %v3460_v60  ;;  %v3445_v39 = vadd.f32 %v3444_v4, %v3443_v47 }
0x174e   : > { %4187 = vmatprep.subr.mxu0 %v4586_v34  ;;  %v3433_v6 = vrot.slane %v3432_v63, 4 }
0x174f   : > { %4188 = vmatpush3.msra.mxu0 %v3459_v14  ;;  %v3446_v7 = vrot.slane %v3445_v39, 4 }
0x1750   : > { %4189 = vmatprep.subr.mxu0 %v4586_v34  ;;  %v3434_v10 = vadd.f32 %v3433_v6, %v3432_v63 }
0x1751   : > { %4190 = vmatpush3.msra.mxu0 %v3458_v48  ;;  %v3447_v15 = vadd.f32 %v3446_v7, %v3445_v39 }
0x1752   : > { %4191 = vmatprep.subr.mxu0 %v4586_v34  ;;  %v3435_v41 = vrot.slane %v3434_v10, 2 }
0x1753   : > { %4192 = vmatpush3.msra.mxu0 %v3457_v26  ;;  %v3448_v30 = vrot.slane %v3447_v15, 2 }
0x1754   : > { %4193 = vmatprep.subr.mxu0 %v4586_v34  ;;  %v3436_v31 = vadd.f32 %v3435_v41, %v3434_v10 }
0x1755   : > { %4194 = vmatpush3.msra.mxu0 %v3456_v13  ;;  %v3449_v32 = vadd.f32 %v3448_v30, %v3447_v15 }
0x1756   : > { %4195 = vmatprep.subr.mxu0 %v4586_v34  ;;  %v3437_v40 = vrot.slane %v3436_v31, 1 }
0x1757   : > { %4196 = vmatpush3.msra.mxu0 %v3455_v28  ;;  %v3450_v9 = vrot.slane %v3449_v32, 1 }
0x1758   : > { %v3438_v43 = vadd.f32 %v3437_v40, %v3436_v31 }
0x1759   : > { %v3451_v38 = vadd.f32 %v3450_v9, %v3449_v32 }
0x175a   : > { %v3453_v45 = vmul.f32 0.03125, %v3438_v43 }
0x175b   : > { %v3454_v57 = vmul.f32 0.03125, %v3451_v38 }
0x175d   : > { %v3473_v59 = vsel %vm3472_vm6, %v3454_v57, %v3453_v45 }
0x175e   : > { %4198 = vmatmul.mubr.msk.f32.vlgmr.msra.gmra.mxu0 %vm1078_vm1, %v3473_v59 }
0x181e   : > { %v3542_v54 = vpop.f32.mrf.mxu0 }
0x181f   : > { %v3543_v16 = vadd.f32 %v3839_v21, %v3542_v54 }
0x1820   : > { %v4199_v58 = vpop.f32.mrf.mxu0 }
0x1821   : > { %3546 = vst [vmem:[%s5653_s16] sm:$0x3] %v3543_v16 }
0x1822 PF: > { %s5654_s27 = sld [smem:[#allocation4_spill]] }
0x1823   : > { %s5656_s28 = sld [smem:[#allocation5_spill]] }
0x1828   : > { %s28_s29 = sadd.s32 1, %s5654_s27   ;;  %s5655_s27 = sld [smem:[#allocation3_spill]] }
0x1829   : > { %p25_p7 = scmp.ge.s32.totalorder %s28_s29, 4  }
0x182b   :  { %27 = sbr.rel (!%p25_p7) target bundleno = 11 (0xb), region = 166 }

</bundles_post_ra>
